<compile_context>
chip_gen: v7x
topology: tpu7x:2x2x1
jax: 0.10.0
libtpu: 0.0.40
codegen_flags: <defaults>
</compile_context>

<pallas_src>
import functools

import jax
import jax.numpy as jnp
from jax import lax
from jax.experimental import pallas as pl
from jax.experimental.pallas import tpu as pltpu

HIDDEN = 32   # self.rnn.hidden_size
FC_MID = 16   # first Linear output


def rnn_encdec_kernel(x_all_ref, w_ih0_ref, w_hh0_ref, b0_ref,
                      w_ih1_ref, w_hh1_ref, b1_ref,
                      w_fc_ref, b_fc_ref,
                      y_ref,
                      xproj_ref, hdec_ref,
                      *, t_enc, t_dec, b_pad):
    H = HIDDEN

    # Resident weights (small: ~13 vregs) stay in registers for the whole run.
    w_hh0 = w_hh0_ref[...]                                   # (H, 4H)
    w_ih1 = w_ih1_ref[...]                                   # (H, 4H)
    w_hh1 = w_hh1_ref[...]                                   # (H, 4H)
    b1b = jnp.broadcast_to(b1_ref[...], (b_pad, 4 * H))      # hoisted broadcast

    # ---- prologue: batched input-side gate projection for ALL timesteps ----
    # One well-shaped MXU matmul; result written ONCE to VMEM scratch so the
    # unrolled time loops don't carry 16 live vregs (spill avoidance).
    xproj_ref[...] = (jnp.dot(x_all_ref[...], w_ih0_ref[...],
                              preferred_element_type=jnp.float32)
                      + b0_ref[...])                         # bias folded in

    def cell(gates, c):
        # Two full-vreg transcendentals (EUP), then aligned 32-lane slices.
        sig = jax.nn.sigmoid(gates)
        tnh = jnp.tanh(gates)
        i = sig[:, 0 * H:1 * H]
        f = sig[:, 1 * H:2 * H]
        g = tnh[:, 2 * H:3 * H]
        o = sig[:, 3 * H:4 * H]
        c_new = f * c + i * g
        h_new = o * jnp.tanh(c_new)
        return h_new, c_new

    def step(t, h0, c0, h1, c1):
        # 1-vreg static-offset load from scratch (vld slot has slack).
        xp_t = xproj_ref[t * b_pad:(t + 1) * b_pad, :]
        # layer 0: only the recurrent matmul sits on the per-step chain.
        gates0 = xp_t + jnp.dot(h0, w_hh0, preferred_element_type=jnp.float32)
        h0, c0 = cell(gates0, c0)
        # layer 1: two back-to-back MXU pushes, no per-step lane concat.
        # TODO(synk): nn.LSTM dropout=0.1 between layers is train-mode only;
        # eval-mode (no dropout) semantics implemented here.
        gates1 = (jnp.dot(h0, w_ih1, preferred_element_type=jnp.float32)
                  + jnp.dot(h1, w_hh1, preferred_element_type=jnp.float32)
                  + b1b)
        h1, c1 = cell(gates1, c1)
        return h0, c0, h1, c1

    # Zero initial state (PyTorch default when no state is passed to encode()).
    zeros = jnp.zeros((b_pad, H), jnp.float32)
    h0, c0, h1, c1 = zeros, zeros, zeros, zeros

    # ---- encode: fully-unrolled time loop, state carried in registers ----
    for t in range(t_enc):
        h0, c0, h1, c1 = step(t, h0, c0, h1, c1)

    # ---- decode: per-step static-offset store of h1 into VMEM scratch ----
    for t in range(t_dec):
        h0, c0, h1, c1 = step(t_enc + t, h0, c0, h1, c1)
        hdec_ref[t * b_pad:(t + 1) * b_pad, :] = h1

    # ---- epilogue: folded affine FC head, lane-dense output row ----
    hcat = hdec_ref[...]                                     # (t_dec*b_pad, H)
    # NT matmul: contract the H axis of both operands -> (8, t_dec*b_pad);
    # w_fc rows are identical (broadcast in wrapper), keep row 0.
    yr = lax.dot_general(w_fc_ref[...], hcat,
                         dimension_numbers=(((1,), (1,)), ((), ())),
                         preferred_element_type=jnp.float32)
    y_ref[...] = yr[0:1, :] + b_fc_ref[...]                  # single dense store


def rnn_model_forward(x_enc, x_dec, params):
    t_enc, batch, feat = x_enc.shape
    t_dec = x_dec.shape[0]
    t_total = t_enc + t_dec
    b_pad = max(8, ((batch + 7) // 8) * 8)     # pad batch to f32 sublane tile

    def pad_b(x):
        return jnp.pad(x.astype(jnp.float32),
                       ((0, 0), (0, b_pad - batch), (0, 0)))

    # Wrapper-side concat + flatten -> single pre-flattened input slab.
    x_all = jnp.concatenate([pad_b(x_enc), pad_b(x_dec)], axis=0)
    x_all = x_all.reshape(t_total * b_pad, feat)

    # Fold the purely-affine FC head (no nonlinearity between the Linears):
    #   y = Hf @ (w_fc1.T @ w_fc2.T) + (b_fc1 @ w_fc2.T + b_fc2)
    w_fc = params["w_fc1"].T @ params["w_fc2"].T                  # (H, 1)
    b_fc = (params["b_fc1"] @ params["w_fc2"].T
            + params["b_fc2"]).reshape(1, 1)                      # (1, 1)
    w_fc_rows = jnp.broadcast_to(w_fc.reshape(1, HIDDEN), (8, HIDDEN))

    args = (
        x_all,                                                    # ((Te+Td)*Bp, F)
        params["w_ih0"].T,                                        # (F, 4H)
        params["w_hh0"].T,                                        # (H, 4H)
        (params["b_ih0"] + params["b_hh0"]).reshape(1, -1),       # (1, 4H)
        params["w_ih1"].T,                                        # (H, 4H)
        params["w_hh1"].T,                                        # (H, 4H)
        (params["b_ih1"] + params["b_hh1"]).reshape(1, -1),       # (1, 4H)
        w_fc_rows,                                                # (8, H)
        b_fc,                                                     # (1, 1)
    )
    vmem = pl.BlockSpec(memory_space=pltpu.MemorySpace.VMEM)
    kernel = functools.partial(rnn_encdec_kernel,
                               t_enc=t_enc, t_dec=t_dec, b_pad=b_pad)
    y = pl.pallas_call(
        kernel,
        out_shape=jax.ShapeDtypeStruct((1, t_dec * b_pad), jnp.float32),
        in_specs=[vmem] * len(args),
        out_specs=vmem,
        scratch_shapes=[
            pltpu.VMEM((t_total * b_pad, 4 * HIDDEN), jnp.float32),  # xproj
            pltpu.VMEM((t_dec * b_pad, HIDDEN), jnp.float32),        # decode h1
        ],
    )(*args)
    # drop padded batch rows; row ordering (t, b) matches H.reshape(-1, hidden)
    y = y.reshape(t_dec, b_pad)[:, :batch]
    return y.reshape(t_dec * batch, 1)


# ---------------- pure-JAX reference (for correctness check) ----------------
def _ref_cell(x, h, c, w_ih, w_hh, b_ih, b_hh):
    g = x @ w_ih.T + h @ w_hh.T + b_ih + b_hh
    i, f, gg, o = jnp.split(g, 4, axis=-1)
    c_new = jax.nn.sigmoid(f) * c + jax.nn.sigmoid(i) * jnp.tanh(gg)
    h_new = jax.nn.sigmoid(o) * jnp.tanh(c_new)
    return h_new, c_new


def rnn_model_reference(x_enc, x_dec, params):
    batch = x_enc.shape[1]
    state0 = tuple(jnp.zeros((batch, HIDDEN), jnp.float32) for _ in range(4))

    def step(carry, x_t):
        h0, c0, h1, c1 = carry
        h0, c0 = _ref_cell(x_t, h0, c0, params["w_ih0"], params["w_hh0"],
                           params["b_ih0"], params["b_hh0"])
        h1, c1 = _ref_cell(h0, h1, c1, params["w_ih1"], params["w_hh1"],
                           params["b_ih1"], params["b_hh1"])
        return (h0, c0, h1, c1), h1

    state, _ = lax.scan(step, state0, x_enc)
    _, H = lax.scan(step, state, x_dec)          # (T_dec, B, HIDDEN)
    Hf = H.reshape(-1, HIDDEN)
    z = Hf @ params["w_fc1"].T + params["b_fc1"]
    return z @ params["w_fc2"].T + params["b_fc2"]


def make_params(key, feature_size):
    ks = jax.random.split(key, 12)
    s = 1.0 / jnp.sqrt(jnp.float32(HIDDEN))
    u = lambda k, shape, sc: jax.random.uniform(k, shape, jnp.float32, -sc, sc)
    return {
        "w_ih0": u(ks[0], (4 * HIDDEN, feature_size), s),
        "w_hh0": u(ks[1], (4 * HIDDEN, HIDDEN), s),
        "b_ih0": u(ks[2], (4 * HIDDEN,), s),
        "b_hh0": u(ks[3], (4 * HIDDEN,), s),
        "w_ih1": u(ks[4], (4 * HIDDEN, HIDDEN), s),
        "w_hh1": u(ks[5], (4 * HIDDEN, HIDDEN), s),
        "b_ih1": u(ks[6], (4 * HIDDEN,), s),
        "b_hh1": u(ks[7], (4 * HIDDEN,), s),
        "w_fc1": u(ks[8], (FC_MID, HIDDEN), 1.0 / jnp.sqrt(jnp.float32(HIDDEN))),
        "b_fc1": u(ks[9], (FC_MID,), 1.0 / jnp.sqrt(jnp.float32(HIDDEN))),
        "w_fc2": u(ks[10], (1, FC_MID), 1.0 / jnp.sqrt(jnp.float32(FC_MID))),
        "b_fc2": u(ks[11], (1,), 1.0 / jnp.sqrt(jnp.float32(FC_MID))),
    }


if __name__ == "__main__":
    FEATURE = 4
    BATCH = 2
    T_ENC = 8
    T_DEC = 8

    key = jax.random.PRNGKey(0)
    k_p, k_e, k_d = jax.random.split(key, 3)
    params = make_params(k_p, FEATURE)
    x_enc = jax.random.normal(k_e, (T_ENC, BATCH, FEATURE), jnp.float32)
    x_dec = jax.random.normal(k_d, (T_DEC, BATCH, FEATURE), jnp.float32)

    y = rnn_model_forward(x_enc, x_dec, params)
    jax.block_until_ready(y)

    assert y.shape == (T_DEC * BATCH, 1), y.shape

    y_ref = rnn_model_reference(x_enc, x_dec, params)
    jax.block_until_ready(y_ref)
    assert jnp.allclose(y, y_ref, atol=2e-3, rtol=2e-3), (
        float(jnp.max(jnp.abs(y - y_ref))))

    print("KERNEL_OK")
</pallas_src>

<mosaic_0001>
module attributes {stable_mosaic.version = 11 : i64} {
  func.func @rnn_encdec_kernel(%arg0: memref<128x4xf32, #tpu.memory_space<vmem>>, %arg1: memref<4x128xf32, #tpu.memory_space<vmem>>, %arg2: memref<32x128xf32, #tpu.memory_space<vmem>>, %arg3: memref<1x128xf32, #tpu.memory_space<vmem>>, %arg4: memref<32x128xf32, #tpu.memory_space<vmem>>, %arg5: memref<32x128xf32, #tpu.memory_space<vmem>>, %arg6: memref<1x128xf32, #tpu.memory_space<vmem>>, %arg7: memref<8x32xf32, #tpu.memory_space<vmem>>, %arg8: memref<1x1xf32, #tpu.memory_space<vmem>>, %arg9: memref<1x64xf32, #tpu.memory_space<vmem>>, %arg10: memref<128x128xf32, #tpu.memory_space<vmem>>, %arg11: memref<64x32xf32, #tpu.memory_space<vmem>>) attributes {dimension_semantics = [], scalar_prefetch = 0 : i64, scratch_operands = 2 : i64, tpu.core_type = #tpu.core_type<tc>} {
    %c0 = arith.constant 0 : index
    %c0_0 = arith.constant 0 : index
    %0 = vector.load %arg2[%c0, %c0_0] : memref<32x128xf32, #tpu.memory_space<vmem>>, vector<32x128xf32>
    %c0_1 = arith.constant 0 : index
    %c0_2 = arith.constant 0 : index
    %1 = vector.load %arg4[%c0_1, %c0_2] : memref<32x128xf32, #tpu.memory_space<vmem>>, vector<32x128xf32>
    %c0_3 = arith.constant 0 : index
    %c0_4 = arith.constant 0 : index
    %2 = vector.load %arg5[%c0_3, %c0_4] : memref<32x128xf32, #tpu.memory_space<vmem>>, vector<32x128xf32>
    %c0_5 = arith.constant 0 : index
    %c0_6 = arith.constant 0 : index
    %3 = vector.load %arg6[%c0_5, %c0_6] : memref<1x128xf32, #tpu.memory_space<vmem>>, vector<1x128xf32>
    %4 = vector.shape_cast %3 : vector<1x128xf32> to vector<1x128xf32>
    %5 = vector.broadcast %4 : vector<1x128xf32> to vector<8x128xf32>
    %c0_7 = arith.constant 0 : index
    %c0_8 = arith.constant 0 : index
    %6 = vector.load %arg0[%c0_7, %c0_8] : memref<128x4xf32, #tpu.memory_space<vmem>>, vector<128x4xf32>
    %c0_9 = arith.constant 0 : index
    %c0_10 = arith.constant 0 : index
    %7 = vector.load %arg1[%c0_9, %c0_10] : memref<4x128xf32, #tpu.memory_space<vmem>>, vector<4x128xf32>
    %cst = arith.constant dense<0.000000e+00> : vector<128x128xf32>
    %8 = tpu.matmul %6, %7, %cst {dimension_numbers = #tpu.dot_dimension_numbers<[1], [0], [0], [1], [0, 0, 1, 1], [], []>} : vector<128x4xf32>, vector<4x128xf32>, vector<128x128xf32> -> vector<128x128xf32>
    %c0_11 = arith.constant 0 : index
    %c0_12 = arith.constant 0 : index
    %9 = vector.load %arg3[%c0_11, %c0_12] : memref<1x128xf32, #tpu.memory_space<vmem>>, vector<1x128xf32>
    %10 = vector.broadcast %9 : vector<1x128xf32> to vector<128x128xf32>
    %11 = arith.addf %8, %10 : vector<128x128xf32>
    %c0_13 = arith.constant 0 : index
    %c0_14 = arith.constant 0 : index
    %12 = vector.load %arg10[%c0_13, %c0_14] : memref<128x128xf32, #tpu.memory_space<vmem>>, vector<128x128xf32>
    tpu.vector_store %arg10[%c0_13, %c0_14], %11 {strides = array<i32>} : memref<128x128xf32, #tpu.memory_space<vmem>>, vector<128x128xf32>,
    %cst_15 = arith.constant 0.000000e+00 : f32
    %13 = vector.broadcast %cst_15 : f32 to vector<8x32xf32>
    %c0_16 = arith.constant 0 : index
    %c0_17 = arith.constant 0 : index
    %14 = vector.load %arg10[%c0_16, %c0_17] : memref<128x128xf32, #tpu.memory_space<vmem>>, vector<8x128xf32>
    %cst_18 = arith.constant dense<0.000000e+00> : vector<8x128xf32>
    %15 = tpu.matmul %13, %0, %cst_18 {dimension_numbers = #tpu.dot_dimension_numbers<[1], [0], [0], [1], [0, 0, 1, 1], [], []>} : vector<8x32xf32>, vector<32x128xf32>, vector<8x128xf32> -> vector<8x128xf32>
    %16 = arith.addf %14, %15 : vector<8x128xf32>
    %17 = arith.negf %16 : vector<8x128xf32>
    %18 = math.exp %17 : vector<8x128xf32>
    %cst_19 = arith.constant 1.000000e+00 : f32
    %19 = vector.broadcast %cst_19 : f32 to vector<8x128xf32>
    %20 = arith.addf %19, %18 : vector<8x128xf32>
    %21 = arith.divf %19, %20 : vector<8x128xf32>
    %22 = math.tanh %16 : vector<8x128xf32>
    %23 = vector.extract_strided_slice %21 {offsets = [0, 0], sizes = [8, 32], strides = [1, 1]} : vector<8x128xf32> to vector<8x32xf32>
    %24 = vector.extract_strided_slice %21 {offsets = [0, 32], sizes = [8, 32], strides = [1, 1]} : vector<8x128xf32> to vector<8x32xf32>
    %25 = vector.extract_strided_slice %22 {offsets = [0, 64], sizes = [8, 32], strides = [1, 1]} : vector<8x128xf32> to vector<8x32xf32>
    %26 = vector.extract_strided_slice %21 {offsets = [0, 96], sizes = [8, 32], strides = [1, 1]} : vector<8x128xf32> to vector<8x32xf32>
    %27 = arith.mulf %24, %13 : vector<8x32xf32>
    %28 = arith.mulf %23, %25 : vector<8x32xf32>
    %29 = arith.addf %27, %28 : vector<8x32xf32>
    %30 = math.tanh %29 : vector<8x32xf32>
    %31 = arith.mulf %26, %30 : vector<8x32xf32>
    %cst_20 = arith.constant dense<0.000000e+00> : vector<8x128xf32>
    %32 = tpu.matmul %31, %1, %cst_20 {dimension_numbers = #tpu.dot_dimension_numbers<[1], [0], [0], [1], [0, 0, 1, 1], [], []>} : vector<8x32xf32>, vector<32x128xf32>, vector<8x128xf32> -> vector<8x128xf32>
    %cst_21 = arith.constant dense<0.000000e+00> : vector<8x128xf32>
    %33 = tpu.matmul %13, %2, %cst_21 {dimension_numbers = #tpu.dot_dimension_numbers<[1], [0], [0], [1], [0, 0, 1, 1], [], []>} : vector<8x32xf32>, vector<32x128xf32>, vector<8x128xf32> -> vector<8x128xf32>
    %34 = arith.addf %32, %33 : vector<8x128xf32>
    %35 = arith.addf %34, %5 : vector<8x128xf32>
    %36 = arith.negf %35 : vector<8x128xf32>
    %37 = math.exp %36 : vector<8x128xf32>
    %cst_22 = arith.constant 1.000000e+00 : f32
    %38 = vector.broadcast %cst_22 : f32 to vector<8x128xf32>
    %39 = arith.addf %38, %37 : vector<8x128xf32>
    %40 = arith.divf %38, %39 : vector<8x128xf32>
    %41 = math.tanh %35 : vector<8x128xf32>
    %42 = vector.extract_strided_slice %40 {offsets = [0, 0], sizes = [8, 32], strides = [1, 1]} : vector<8x128xf32> to vector<8x32xf32>
    %43 = vector.extract_strided_slice %40 {offsets = [0, 32], sizes = [8, 32], strides = [1, 1]} : vector<8x128xf32> to vector<8x32xf32>
    %44 = vector.extract_strided_slice %41 {offsets = [0, 64], sizes = [8, 32], strides = [1, 1]} : vector<8x128xf32> to vector<8x32xf32>
    %45 = vector.extract_strided_slice %40 {offsets = [0, 96], sizes = [8, 32], strides = [1, 1]} : vector<8x128xf32> to vector<8x32xf32>
    %46 = arith.mulf %43, %13 : vector<8x32xf32>
    %47 = arith.mulf %42, %44 : vector<8x32xf32>
    %48 = arith.addf %46, %47 : vector<8x32xf32>
    %49 = math.tanh %48 : vector<8x32xf32>
    %50 = arith.mulf %45, %49 : vector<8x32xf32>
    %c8 = arith.constant 8 : index
    %c0_23 = arith.constant 0 : index
    %51 = vector.load %arg10[%c8, %c0_23] : memref<128x128xf32, #tpu.memory_space<vmem>>, vector<8x128xf32>
    %cst_24 = arith.constant dense<0.000000e+00> : vector<8x128xf32>
    %52 = tpu.matmul %31, %0, %cst_24 {dimension_numbers = #tpu.dot_dimension_numbers<[1], [0], [0], [1], [0, 0, 1, 1], [], []>} : vector<8x32xf32>, vector<32x128xf32>, vector<8x128xf32> -> vector<8x128xf32>
    %53 = arith.addf %51, %52 : vector<8x128xf32>
    %54 = arith.negf %53 : vector<8x128xf32>
    %55 = math.exp %54 : vector<8x128xf32>
    %cst_25 = arith.constant 1.000000e+00 : f32
    %56 = vector.broadcast %cst_25 : f32 to vector<8x128xf32>
    %57 = arith.addf %56, %55 : vector<8x128xf32>
    %58 = arith.divf %56, %57 : vector<8x128xf32>
    %59 = math.tanh %53 : vector<8x128xf32>
    %60 = vector.extract_strided_slice %58 {offsets = [0, 0], sizes = [8, 32], strides = [1, 1]} : vector<8x128xf32> to vector<8x32xf32>
    %61 = vector.extract_strided_slice %58 {offsets = [0, 32], sizes = [8, 32], strides = [1, 1]} : vector<8x128xf32> to vector<8x32xf32>
    %62 = vector.extract_strided_slice %59 {offsets = [0, 64], sizes = [8, 32], strides = [1, 1]} : vector<8x128xf32> to vector<8x32xf32>
    %63 = vector.extract_strided_slice %58 {offsets = [0, 96], sizes = [8, 32], strides = [1, 1]} : vector<8x128xf32> to vector<8x32xf32>
    %64 = arith.mulf %61, %29 : vector<8x32xf32>
    %65 = arith.mulf %60, %62 : vector<8x32xf32>
    %66 = arith.addf %64, %65 : vector<8x32xf32>
    %67 = math.tanh %66 : vector<8x32xf32>
    %68 = arith.mulf %63, %67 : vector<8x32xf32>
    %cst_26 = arith.constant dense<0.000000e+00> : vector<8x128xf32>
    %69 = tpu.matmul %68, %1, %cst_26 {dimension_numbers = #tpu.dot_dimension_numbers<[1], [0], [0], [1], [0, 0, 1, 1], [], []>} : vector<8x32xf32>, vector<32x128xf32>, vector<8x128xf32> -> vector<8x128xf32>
    %cst_27 = arith.constant dense<0.000000e+00> : vector<8x128xf32>
    %70 = tpu.matmul %50, %2, %cst_27 {dimension_numbers = #tpu.dot_dimension_numbers<[1], [0], [0], [1], [0, 0, 1, 1], [], []>} : vector<8x32xf32>, vector<32x128xf32>, vector<8x128xf32> -> vector<8x128xf32>
    %71 = arith.addf %69, %70 : vector<8x128xf32>
    %72 = arith.addf %71, %5 : vector<8x128xf32>
    %73 = arith.negf %72 : vector<8x128xf32>
    %74 = math.exp %73 : vector<8x128xf32>
    %cst_28 = arith.constant 1.000000e+00 : f32
    %75 = vector.broadcast %cst_28 : f32 to vector<8x128xf32>
    %76 = arith.addf %75, %74 : vector<8x128xf32>
    %77 = arith.divf %75, %76 : vector<8x128xf32>
    %78 = math.tanh %72 : vector<8x128xf32>
    %79 = vector.extract_strided_slice %77 {offsets = [0, 0], sizes = [8, 32], strides = [1, 1]} : vector<8x128xf32> to vector<8x32xf32>
    %80 = vector.extract_strided_slice %77 {offsets = [0, 32], sizes = [8, 32], strides = [1, 1]} : vector<8x128xf32> to vector<8x32xf32>
    %81 = vector.extract_strided_slice %78 {offsets = [0, 64], sizes = [8, 32], strides = [1, 1]} : vector<8x128xf32> to vector<8x32xf32>
    %82 = vector.extract_strided_slice %77 {offsets = [0, 96], sizes = [8, 32], strides = [1, 1]} : vector<8x128xf32> to vector<8x32xf32>
    %83 = arith.mulf %80, %48 : vector<8x32xf32>
    %84 = arith.mulf %79, %81 : vector<8x32xf32>
    %85 = arith.addf %83, %84 : vector<8x32xf32>
    %86 = math.tanh %85 : vector<8x32xf32>
    %87 = arith.mulf %82, %86 : vector<8x32xf32>
    %c16 = arith.constant 16 : index
    %c0_29 = arith.constant 0 : index
    %88 = vector.load %arg10[%c16, %c0_29] : memref<128x128xf32, #tpu.memory_space<vmem>>, vector<8x128xf32>
    %cst_30 = arith.constant dense<0.000000e+00> : vector<8x128xf32>
    %89 = tpu.matmul %68, %0, %cst_30 {dimension_numbers = #tpu.dot_dimension_numbers<[1], [0], [0], [1], [0, 0, 1, 1], [], []>} : vector<8x32xf32>, vector<32x128xf32>, vector<8x128xf32> -> vector<8x128xf32>
    %90 = arith.addf %88, %89 : vector<8x128xf32>
    %91 = arith.negf %90 : vector<8x128xf32>
    %92 = math.exp %91 : vector<8x128xf32>
    %cst_31 = arith.constant 1.000000e+00 : f32
    %93 = vector.broadcast %cst_31 : f32 to vector<8x128xf32>
    %94 = arith.addf %93, %92 : vector<8x128xf32>
    %95 = arith.divf %93, %94 : vector<8x128xf32>
    %96 = math.tanh %90 : vector<8x128xf32>
    %97 = vector.extract_strided_slice %95 {offsets = [0, 0], sizes = [8, 32], strides = [1, 1]} : vector<8x128xf32> to vector<8x32xf32>
    %98 = vector.extract_strided_slice %95 {offsets = [0, 32], sizes = [8, 32], strides = [1, 1]} : vector<8x128xf32> to vector<8x32xf32>
    %99 = vector.extract_strided_slice %96 {offsets = [0, 64], sizes = [8, 32], strides = [1, 1]} : vector<8x128xf32> to vector<8x32xf32>
    %100 = vector.extract_strided_slice %95 {offsets = [0, 96], sizes = [8, 32], strides = [1, 1]} : vector<8x128xf32> to vector<8x32xf32>
    %101 = arith.mulf %98, %66 : vector<8x32xf32>
    %102 = arith.mulf %97, %99 : vector<8x32xf32>
    %103 = arith.addf %101, %102 : vector<8x32xf32>
    %104 = math.tanh %103 : vector<8x32xf32>
    %105 = arith.mulf %100, %104 : vector<8x32xf32>
    %cst_32 = arith.constant dense<0.000000e+00> : vector<8x128xf32>
    %106 = tpu.matmul %105, %1, %cst_32 {dimension_numbers = #tpu.dot_dimension_numbers<[1], [0], [0], [1], [0, 0, 1, 1], [], []>} : vector<8x32xf32>, vector<32x128xf32>, vector<8x128xf32> -> vector<8x128xf32>
    %cst_33 = arith.constant dense<0.000000e+00> : vector<8x128xf32>
    %107 = tpu.matmul %87, %2, %cst_33 {dimension_numbers = #tpu.dot_dimension_numbers<[1], [0], [0], [1], [0, 0, 1, 1], [], []>} : vector<8x32xf32>, vector<32x128xf32>, vector<8x128xf32> -> vector<8x128xf32>
    %108 = arith.addf %106, %107 : vector<8x128xf32>
    %109 = arith.addf %108, %5 : vector<8x128xf32>
    %110 = arith.negf %109 : vector<8x128xf32>
    %111 = math.exp %110 : vector<8x128xf32>
    %cst_34 = arith.constant 1.000000e+00 : f32
    %112 = vector.broadcast %cst_34 : f32 to vector<8x128xf32>
    %113 = arith.addf %112, %111 : vector<8x128xf32>
    %114 = arith.divf %112, %113 : vector<8x128xf32>
    %115 = math.tanh %109 : vector<8x128xf32>
    %116 = vector.extract_strided_slice %114 {offsets = [0, 0], sizes = [8, 32], strides = [1, 1]} : vector<8x128xf32> to vector<8x32xf32>
    %117 = vector.extract_strided_slice %114 {offsets = [0, 32], sizes = [8, 32], strides = [1, 1]} : vector<8x128xf32> to vector<8x32xf32>
    %118 = vector.extract_strided_slice %115 {offsets = [0, 64], sizes = [8, 32], strides = [1, 1]} : vector<8x128xf32> to vector<8x32xf32>
    %119 = vector.extract_strided_slice %114 {offsets = [0, 96], sizes = [8, 32], strides = [1, 1]} : vector<8x128xf32> to vector<8x32xf32>
    %120 = arith.mulf %117, %85 : vector<8x32xf32>
    %121 = arith.mulf %116, %118 : vector<8x32xf32>
    %122 = arith.addf %120, %121 : vector<8x32xf32>
    %123 = math.tanh %122 : vector<8x32xf32>
    %124 = arith.mulf %119, %123 : vector<8x32xf32>
    %c24 = arith.constant 24 : index
    %c0_35 = arith.constant 0 : index
    %125 = vector.load %arg10[%c24, %c0_35] : memref<128x128xf32, #tpu.memory_space<vmem>>, vector<8x128xf32>
    %cst_36 = arith.constant dense<0.000000e+00> : vector<8x128xf32>
    %126 = tpu.matmul %105, %0, %cst_36 {dimension_numbers = #tpu.dot_dimension_numbers<[1], [0], [0], [1], [0, 0, 1, 1], [], []>} : vector<8x32xf32>, vector<32x128xf32>, vector<8x128xf32> -> vector<8x128xf32>
    %127 = arith.addf %125, %126 : vector<8x128xf32>
    %128 = arith.negf %127 : vector<8x128xf32>
    %129 = math.exp %128 : vector<8x128xf32>
    %cst_37 = arith.constant 1.000000e+00 : f32
    %130 = vector.broadcast %cst_37 : f32 to vector<8x128xf32>
    %131 = arith.addf %130, %129 : vector<8x128xf32>
    %132 = arith.divf %130, %131 : vector<8x128xf32>
    %133 = math.tanh %127 : vector<8x128xf32>
    %134 = vector.extract_strided_slice %132 {offsets = [0, 0], sizes = [8, 32], strides = [1, 1]} : vector<8x128xf32> to vector<8x32xf32>
    %135 = vector.extract_strided_slice %132 {offsets = [0, 32], sizes = [8, 32], strides = [1, 1]} : vector<8x128xf32> to vector<8x32xf32>
    %136 = vector.extract_strided_slice %133 {offsets = [0, 64], sizes = [8, 32], strides = [1, 1]} : vector<8x128xf32> to vector<8x32xf32>
    %137 = vector.extract_strided_slice %132 {offsets = [0, 96], sizes = [8, 32], strides = [1, 1]} : vector<8x128xf32> to vector<8x32xf32>
    %138 = arith.mulf %135, %103 : vector<8x32xf32>
    %139 = arith.mulf %134, %136 : vector<8x32xf32>
    %140 = arith.addf %138, %139 : vector<8x32xf32>
    %141 = math.tanh %140 : vector<8x32xf32>
    %142 = arith.mulf %137, %141 : vector<8x32xf32>
    %cst_38 = arith.constant dense<0.000000e+00> : vector<8x128xf32>
    %143 = tpu.matmul %142, %1, %cst_38 {dimension_numbers = #tpu.dot_dimension_numbers<[1], [0], [0], [1], [0, 0, 1, 1], [], []>} : vector<8x32xf32>, vector<32x128xf32>, vector<8x128xf32> -> vector<8x128xf32>
    %cst_39 = arith.constant dense<0.000000e+00> : vector<8x128xf32>
    %144 = tpu.matmul %124, %2, %cst_39 {dimension_numbers = #tpu.dot_dimension_numbers<[1], [0], [0], [1], [0, 0, 1, 1], [], []>} : vector<8x32xf32>, vector<32x128xf32>, vector<8x128xf32> -> vector<8x128xf32>
    %145 = arith.addf %143, %144 : vector<8x128xf32>
    %146 = arith.addf %145, %5 : vector<8x128xf32>
    %147 = arith.negf %146 : vector<8x128xf32>
    %148 = math.exp %147 : vector<8x128xf32>
    %cst_40 = arith.constant 1.000000e+00 : f32
    %149 = vector.broadcast %cst_40 : f32 to vector<8x128xf32>
    %150 = arith.addf %149, %148 : vector<8x128xf32>
    %151 = arith.divf %149, %150 : vector<8x128xf32>
    %152 = math.tanh %146 : vector<8x128xf32>
    %153 = vector.extract_strided_slice %151 {offsets = [0, 0], sizes = [8, 32], strides = [1, 1]} : vector<8x128xf32> to vector<8x32xf32>
    %154 = vector.extract_strided_slice %151 {offsets = [0, 32], sizes = [8, 32], strides = [1, 1]} : vector<8x128xf32> to vector<8x32xf32>
    %155 = vector.extract_strided_slice %152 {offsets = [0, 64], sizes = [8, 32], strides = [1, 1]} : vector<8x128xf32> to vector<8x32xf32>
    %156 = vector.extract_strided_slice %151 {offsets = [0, 96], sizes = [8, 32], strides = [1, 1]} : vector<8x128xf32> to vector<8x32xf32>
    %157 = arith.mulf %154, %122 : vector<8x32xf32>
    %158 = arith.mulf %153, %155 : vector<8x32xf32>
    %159 = arith.addf %157, %158 : vector<8x32xf32>
    %160 = math.tanh %159 : vector<8x32xf32>
    %161 = arith.mulf %156, %160 : vector<8x32xf32>
    %c32 = arith.constant 32 : index
    %c0_41 = arith.constant 0 : index
    %162 = vector.load %arg10[%c32, %c0_41] : memref<128x128xf32, #tpu.memory_space<vmem>>, vector<8x128xf32>
    %cst_42 = arith.constant dense<0.000000e+00> : vector<8x128xf32>
    %163 = tpu.matmul %142, %0, %cst_42 {dimension_numbers = #tpu.dot_dimension_numbers<[1], [0], [0], [1], [0, 0, 1, 1], [], []>} : vector<8x32xf32>, vector<32x128xf32>, vector<8x128xf32> -> vector<8x128xf32>
    %164 = arith.addf %162, %163 : vector<8x128xf32>
    %165 = arith.negf %164 : vector<8x128xf32>
    %166 = math.exp %165 : vector<8x128xf32>
    %cst_43 = arith.constant 1.000000e+00 : f32
    %167 = vector.broadcast %cst_43 : f32 to vector<8x128xf32>
    %168 = arith.addf %167, %166 : vector<8x128xf32>
    %169 = arith.divf %167, %168 : vector<8x128xf32>
    %170 = math.tanh %164 : vector<8x128xf32>
    %171 = vector.extract_strided_slice %169 {offsets = [0, 0], sizes = [8, 32], strides = [1, 1]} : vector<8x128xf32> to vector<8x32xf32>
    %172 = vector.extract_strided_slice %169 {offsets = [0, 32], sizes = [8, 32], strides = [1, 1]} : vector<8x128xf32> to vector<8x32xf32>
    %173 = vector.extract_strided_slice %170 {offsets = [0, 64], sizes = [8, 32], strides = [1, 1]} : vector<8x128xf32> to vector<8x32xf32>
    %174 = vector.extract_strided_slice %169 {offsets = [0, 96], sizes = [8, 32], strides = [1, 1]} : vector<8x128xf32> to vector<8x32xf32>
    %175 = arith.mulf %172, %140 : vector<8x32xf32>
    %176 = arith.mulf %171, %173 : vector<8x32xf32>
    %177 = arith.addf %175, %176 : vector<8x32xf32>
    %178 = math.tanh %177 : vector<8x32xf32>
    %179 = arith.mulf %174, %178 : vector<8x32xf32>
    %cst_44 = arith.constant dense<0.000000e+00> : vector<8x128xf32>
    %180 = tpu.matmul %179, %1, %cst_44 {dimension_numbers = #tpu.dot_dimension_numbers<[1], [0], [0], [1], [0, 0, 1, 1], [], []>} : vector<8x32xf32>, vector<32x128xf32>, vector<8x128xf32> -> vector<8x128xf32>
    %cst_45 = arith.constant dense<0.000000e+00> : vector<8x128xf32>
    %181 = tpu.matmul %161, %2, %cst_45 {dimension_numbers = #tpu.dot_dimension_numbers<[1], [0], [0], [1], [0, 0, 1, 1], [], []>} : vector<8x32xf32>, vector<32x128xf32>, vector<8x128xf32> -> vector<8x128xf32>
    %182 = arith.addf %180, %181 : vector<8x128xf32>
    %183 = arith.addf %182, %5 : vector<8x128xf32>
    %184 = arith.negf %183 : vector<8x128xf32>
    %185 = math.exp %184 : vector<8x128xf32>
    %cst_46 = arith.constant 1.000000e+00 : f32
    %186 = vector.broadcast %cst_46 : f32 to vector<8x128xf32>
    %187 = arith.addf %186, %185 : vector<8x128xf32>
    %188 = arith.divf %186, %187 : vector<8x128xf32>
    %189 = math.tanh %183 : vector<8x128xf32>
    %190 = vector.extract_strided_slice %188 {offsets = [0, 0], sizes = [8, 32], strides = [1, 1]} : vector<8x128xf32> to vector<8x32xf32>
    %191 = vector.extract_strided_slice %188 {offsets = [0, 32], sizes = [8, 32], strides = [1, 1]} : vector<8x128xf32> to vector<8x32xf32>
    %192 = vector.extract_strided_slice %189 {offsets = [0, 64], sizes = [8, 32], strides = [1, 1]} : vector<8x128xf32> to vector<8x32xf32>
    %193 = vector.extract_strided_slice %188 {offsets = [0, 96], sizes = [8, 32], strides = [1, 1]} : vector<8x128xf32> to vector<8x32xf32>
    %194 = arith.mulf %191, %159 : vector<8x32xf32>
    %195 = arith.mulf %190, %192 : vector<8x32xf32>
    %196 = arith.addf %194, %195 : vector<8x32xf32>
    %197 = math.tanh %196 : vector<8x32xf32>
    %198 = arith.mulf %193, %197 : vector<8x32xf32>
    %c40 = arith.constant 40 : index
    %c0_47 = arith.constant 0 : index
    %199 = vector.load %arg10[%c40, %c0_47] : memref<128x128xf32, #tpu.memory_space<vmem>>, vector<8x128xf32>
    %cst_48 = arith.constant dense<0.000000e+00> : vector<8x128xf32>
    %200 = tpu.matmul %179, %0, %cst_48 {dimension_numbers = #tpu.dot_dimension_numbers<[1], [0], [0], [1], [0, 0, 1, 1], [], []>} : vector<8x32xf32>, vector<32x128xf32>, vector<8x128xf32> -> vector<8x128xf32>
    %201 = arith.addf %199, %200 : vector<8x128xf32>
    %202 = arith.negf %201 : vector<8x128xf32>
    %203 = math.exp %202 : vector<8x128xf32>
    %cst_49 = arith.constant 1.000000e+00 : f32
    %204 = vector.broadcast %cst_49 : f32 to vector<8x128xf32>
    %205 = arith.addf %204, %203 : vector<8x128xf32>
    %206 = arith.divf %204, %205 : vector<8x128xf32>
    %207 = math.tanh %201 : vector<8x128xf32>
    %208 = vector.extract_strided_slice %206 {offsets = [0, 0], sizes = [8, 32], strides = [1, 1]} : vector<8x128xf32> to vector<8x32xf32>
    %209 = vector.extract_strided_slice %206 {offsets = [0, 32], sizes = [8, 32], strides = [1, 1]} : vector<8x128xf32> to vector<8x32xf32>
    %210 = vector.extract_strided_slice %207 {offsets = [0, 64], sizes = [8, 32], strides = [1, 1]} : vector<8x128xf32> to vector<8x32xf32>
    %211 = vector.extract_strided_slice %206 {offsets = [0, 96], sizes = [8, 32], strides = [1, 1]} : vector<8x128xf32> to vector<8x32xf32>
    %212 = arith.mulf %209, %177 : vector<8x32xf32>
    %213 = arith.mulf %208, %210 : vector<8x32xf32>
    %214 = arith.addf %212, %213 : vector<8x32xf32>
    %215 = math.tanh %214 : vector<8x32xf32>
    %216 = arith.mulf %211, %215 : vector<8x32xf32>
    %cst_50 = arith.constant dense<0.000000e+00> : vector<8x128xf32>
    %217 = tpu.matmul %216, %1, %cst_50 {dimension_numbers = #tpu.dot_dimension_numbers<[1], [0], [0], [1], [0, 0, 1, 1], [], []>} : vector<8x32xf32>, vector<32x128xf32>, vector<8x128xf32> -> vector<8x128xf32>
    %cst_51 = arith.constant dense<0.000000e+00> : vector<8x128xf32>
    %218 = tpu.matmul %198, %2, %cst_51 {dimension_numbers = #tpu.dot_dimension_numbers<[1], [0], [0], [1], [0, 0, 1, 1], [], []>} : vector<8x32xf32>, vector<32x128xf32>, vector<8x128xf32> -> vector<8x128xf32>
    %219 = arith.addf %217, %218 : vector<8x128xf32>
    %220 = arith.addf %219, %5 : vector<8x128xf32>
    %221 = arith.negf %220 : vector<8x128xf32>
    %222 = math.exp %221 : vector<8x128xf32>
    %cst_52 = arith.constant 1.000000e+00 : f32
    %223 = vector.broadcast %cst_52 : f32 to vector<8x128xf32>
    %224 = arith.addf %223, %222 : vector<8x128xf32>
    %225 = arith.divf %223, %224 : vector<8x128xf32>
    %226 = math.tanh %220 : vector<8x128xf32>
    %227 = vector.extract_strided_slice %225 {offsets = [0, 0], sizes = [8, 32], strides = [1, 1]} : vector<8x128xf32> to vector<8x32xf32>
    %228 = vector.extract_strided_slice %225 {offsets = [0, 32], sizes = [8, 32], strides = [1, 1]} : vector<8x128xf32> to vector<8x32xf32>
    %229 = vector.extract_strided_slice %226 {offsets = [0, 64], sizes = [8, 32], strides = [1, 1]} : vector<8x128xf32> to vector<8x32xf32>
    %230 = vector.extract_strided_slice %225 {offsets = [0, 96], sizes = [8, 32], strides = [1, 1]} : vector<8x128xf32> to vector<8x32xf32>
    %231 = arith.mulf %228, %196 : vector<8x32xf32>
    %232 = arith.mulf %227, %229 : vector<8x32xf32>
    %233 = arith.addf %231, %232 : vector<8x32xf32>
    %234 = math.tanh %233 : vector<8x32xf32>
    %235 = arith.mulf %230, %234 : vector<8x32xf32>
    %c48 = arith.constant 48 : index
    %c0_53 = arith.constant 0 : index
    %236 = vector.load %arg10[%c48, %c0_53] : memref<128x128xf32, #tpu.memory_space<vmem>>, vector<8x128xf32>
    %cst_54 = arith.constant dense<0.000000e+00> : vector<8x128xf32>
    %237 = tpu.matmul %216, %0, %cst_54 {dimension_numbers = #tpu.dot_dimension_numbers<[1], [0], [0], [1], [0, 0, 1, 1], [], []>} : vector<8x32xf32>, vector<32x128xf32>, vector<8x128xf32> -> vector<8x128xf32>
    %238 = arith.addf %236, %237 : vector<8x128xf32>
    %239 = arith.negf %238 : vector<8x128xf32>
    %240 = math.exp %239 : vector<8x128xf32>
    %cst_55 = arith.constant 1.000000e+00 : f32
    %241 = vector.broadcast %cst_55 : f32 to vector<8x128xf32>
    %242 = arith.addf %241, %240 : vector<8x128xf32>
    %243 = arith.divf %241, %242 : vector<8x128xf32>
    %244 = math.tanh %238 : vector<8x128xf32>
    %245 = vector.extract_strided_slice %243 {offsets = [0, 0], sizes = [8, 32], strides = [1, 1]} : vector<8x128xf32> to vector<8x32xf32>
    %246 = vector.extract_strided_slice %243 {offsets = [0, 32], sizes = [8, 32], strides = [1, 1]} : vector<8x128xf32> to vector<8x32xf32>
    %247 = vector.extract_strided_slice %244 {offsets = [0, 64], sizes = [8, 32], strides = [1, 1]} : vector<8x128xf32> to vector<8x32xf32>
    %248 = vector.extract_strided_slice %243 {offsets = [0, 96], sizes = [8, 32], strides = [1, 1]} : vector<8x128xf32> to vector<8x32xf32>
    %249 = arith.mulf %246, %214 : vector<8x32xf32>
    %250 = arith.mulf %245, %247 : vector<8x32xf32>
    %251 = arith.addf %249, %250 : vector<8x32xf32>
    %252 = math.tanh %251 : vector<8x32xf32>
    %253 = arith.mulf %248, %252 : vector<8x32xf32>
    %cst_56 = arith.constant dense<0.000000e+00> : vector<8x128xf32>
    %254 = tpu.matmul %253, %1, %cst_56 {dimension_numbers = #tpu.dot_dimension_numbers<[1], [0], [0], [1], [0, 0, 1, 1], [], []>} : vector<8x32xf32>, vector<32x128xf32>, vector<8x128xf32> -> vector<8x128xf32>
    %cst_57 = arith.constant dense<0.000000e+00> : vector<8x128xf32>
    %255 = tpu.matmul %235, %2, %cst_57 {dimension_numbers = #tpu.dot_dimension_numbers<[1], [0], [0], [1], [0, 0, 1, 1], [], []>} : vector<8x32xf32>, vector<32x128xf32>, vector<8x128xf32> -> vector<8x128xf32>
    %256 = arith.addf %254, %255 : vector<8x128xf32>
    %257 = arith.addf %256, %5 : vector<8x128xf32>
    %258 = arith.negf %257 : vector<8x128xf32>
    %259 = math.exp %258 : vector<8x128xf32>
    %cst_58 = arith.constant 1.000000e+00 : f32
    %260 = vector.broadcast %cst_58 : f32 to vector<8x128xf32>
    %261 = arith.addf %260, %259 : vector<8x128xf32>
    %262 = arith.divf %260, %261 : vector<8x128xf32>
    %263 = math.tanh %257 : vector<8x128xf32>
    %264 = vector.extract_strided_slice %262 {offsets = [0, 0], sizes = [8, 32], strides = [1, 1]} : vector<8x128xf32> to vector<8x32xf32>
    %265 = vector.extract_strided_slice %262 {offsets = [0, 32], sizes = [8, 32], strides = [1, 1]} : vector<8x128xf32> to vector<8x32xf32>
    %266 = vector.extract_strided_slice %263 {offsets = [0, 64], sizes = [8, 32], strides = [1, 1]} : vector<8x128xf32> to vector<8x32xf32>
    %267 = vector.extract_strided_slice %262 {offsets = [0, 96], sizes = [8, 32], strides = [1, 1]} : vector<8x128xf32> to vector<8x32xf32>
    %268 = arith.mulf %265, %233 : vector<8x32xf32>
    %269 = arith.mulf %264, %266 : vector<8x32xf32>
    %270 = arith.addf %268, %269 : vector<8x32xf32>
    %271 = math.tanh %270 : vector<8x32xf32>
    %272 = arith.mulf %267, %271 : vector<8x32xf32>
    %c56 = arith.constant 56 : index
    %c0_59 = arith.constant 0 : index
    %273 = vector.load %arg10[%c56, %c0_59] : memref<128x128xf32, #tpu.memory_space<vmem>>, vector<8x128xf32>
    %cst_60 = arith.constant dense<0.000000e+00> : vector<8x128xf32>
    %274 = tpu.matmul %253, %0, %cst_60 {dimension_numbers = #tpu.dot_dimension_numbers<[1], [0], [0], [1], [0, 0, 1, 1], [], []>} : vector<8x32xf32>, vector<32x128xf32>, vector<8x128xf32> -> vector<8x128xf32>
    %275 = arith.addf %273, %274 : vector<8x128xf32>
    %276 = arith.negf %275 : vector<8x128xf32>
    %277 = math.exp %276 : vector<8x128xf32>
    %cst_61 = arith.constant 1.000000e+00 : f32
    %278 = vector.broadcast %cst_61 : f32 to vector<8x128xf32>
    %279 = arith.addf %278, %277 : vector<8x128xf32>
    %280 = arith.divf %278, %279 : vector<8x128xf32>
    %281 = math.tanh %275 : vector<8x128xf32>
    %282 = vector.extract_strided_slice %280 {offsets = [0, 0], sizes = [8, 32], strides = [1, 1]} : vector<8x128xf32> to vector<8x32xf32>
    %283 = vector.extract_strided_slice %280 {offsets = [0, 32], sizes = [8, 32], strides = [1, 1]} : vector<8x128xf32> to vector<8x32xf32>
    %284 = vector.extract_strided_slice %281 {offsets = [0, 64], sizes = [8, 32], strides = [1, 1]} : vector<8x128xf32> to vector<8x32xf32>
    %285 = vector.extract_strided_slice %280 {offsets = [0, 96], sizes = [8, 32], strides = [1, 1]} : vector<8x128xf32> to vector<8x32xf32>
    %286 = arith.mulf %283, %251 : vector<8x32xf32>
    %287 = arith.mulf %282, %284 : vector<8x32xf32>
    %288 = arith.addf %286, %287 : vector<8x32xf32>
    %289 = math.tanh %288 : vector<8x32xf32>
    %290 = arith.mulf %285, %289 : vector<8x32xf32>
    %cst_62 = arith.constant dense<0.000000e+00> : vector<8x128xf32>
    %291 = tpu.matmul %290, %1, %cst_62 {dimension_numbers = #tpu.dot_dimension_numbers<[1], [0], [0], [1], [0, 0, 1, 1], [], []>} : vector<8x32xf32>, vector<32x128xf32>, vector<8x128xf32> -> vector<8x128xf32>
    %cst_63 = arith.constant dense<0.000000e+00> : vector<8x128xf32>
    %292 = tpu.matmul %272, %2, %cst_63 {dimension_numbers = #tpu.dot_dimension_numbers<[1], [0], [0], [1], [0, 0, 1, 1], [], []>} : vector<8x32xf32>, vector<32x128xf32>, vector<8x128xf32> -> vector<8x128xf32>
    %293 = arith.addf %291, %292 : vector<8x128xf32>
    %294 = arith.addf %293, %5 : vector<8x128xf32>
    %295 = arith.negf %294 : vector<8x128xf32>
    %296 = math.exp %295 : vector<8x128xf32>
    %cst_64 = arith.constant 1.000000e+00 : f32
    %297 = vector.broadcast %cst_64 : f32 to vector<8x128xf32>
    %298 = arith.addf %297, %296 : vector<8x128xf32>
    %299 = arith.divf %297, %298 : vector<8x128xf32>
    %300 = math.tanh %294 : vector<8x128xf32>
    %301 = vector.extract_strided_slice %299 {offsets = [0, 0], sizes = [8, 32], strides = [1, 1]} : vector<8x128xf32> to vector<8x32xf32>
    %302 = vector.extract_strided_slice %299 {offsets = [0, 32], sizes = [8, 32], strides = [1, 1]} : vector<8x128xf32> to vector<8x32xf32>
    %303 = vector.extract_strided_slice %300 {offsets = [0, 64], sizes = [8, 32], strides = [1, 1]} : vector<8x128xf32> to vector<8x32xf32>
    %304 = vector.extract_strided_slice %299 {offsets = [0, 96], sizes = [8, 32], strides = [1, 1]} : vector<8x128xf32> to vector<8x32xf32>
    %305 = arith.mulf %302, %270 : vector<8x32xf32>
    %306 = arith.mulf %301, %303 : vector<8x32xf32>
    %307 = arith.addf %305, %306 : vector<8x32xf32>
    %308 = math.tanh %307 : vector<8x32xf32>
    %309 = arith.mulf %304, %308 : vector<8x32xf32>
    %c64 = arith.constant 64 : index
    %c0_65 = arith.constant 0 : index
    %310 = vector.load %arg10[%c64, %c0_65] : memref<128x128xf32, #tpu.memory_space<vmem>>, vector<8x128xf32>
    %cst_66 = arith.constant dense<0.000000e+00> : vector<8x128xf32>
    %311 = tpu.matmul %290, %0, %cst_66 {dimension_numbers = #tpu.dot_dimension_numbers<[1], [0], [0], [1], [0, 0, 1, 1], [], []>} : vector<8x32xf32>, vector<32x128xf32>, vector<8x128xf32> -> vector<8x128xf32>
    %312 = arith.addf %310, %311 : vector<8x128xf32>
    %313 = arith.negf %312 : vector<8x128xf32>
    %314 = math.exp %313 : vector<8x128xf32>
    %cst_67 = arith.constant 1.000000e+00 : f32
    %315 = vector.broadcast %cst_67 : f32 to vector<8x128xf32>
    %316 = arith.addf %315, %314 : vector<8x128xf32>
    %317 = arith.divf %315, %316 : vector<8x128xf32>
    %318 = math.tanh %312 : vector<8x128xf32>
    %319 = vector.extract_strided_slice %317 {offsets = [0, 0], sizes = [8, 32], strides = [1, 1]} : vector<8x128xf32> to vector<8x32xf32>
    %320 = vector.extract_strided_slice %317 {offsets = [0, 32], sizes = [8, 32], strides = [1, 1]} : vector<8x128xf32> to vector<8x32xf32>
    %321 = vector.extract_strided_slice %318 {offsets = [0, 64], sizes = [8, 32], strides = [1, 1]} : vector<8x128xf32> to vector<8x32xf32>
    %322 = vector.extract_strided_slice %317 {offsets = [0, 96], sizes = [8, 32], strides = [1, 1]} : vector<8x128xf32> to vector<8x32xf32>
    %323 = arith.mulf %320, %288 : vector<8x32xf32>
    %324 = arith.mulf %319, %321 : vector<8x32xf32>
    %325 = arith.addf %323, %324 : vector<8x32xf32>
    %326 = math.tanh %325 : vector<8x32xf32>
    %327 = arith.mulf %322, %326 : vector<8x32xf32>
    %cst_68 = arith.constant dense<0.000000e+00> : vector<8x128xf32>
    %328 = tpu.matmul %327, %1, %cst_68 {dimension_numbers = #tpu.dot_dimension_numbers<[1], [0], [0], [1], [0, 0, 1, 1], [], []>} : vector<8x32xf32>, vector<32x128xf32>, vector<8x128xf32> -> vector<8x128xf32>
    %cst_69 = arith.constant dense<0.000000e+00> : vector<8x128xf32>
    %329 = tpu.matmul %309, %2, %cst_69 {dimension_numbers = #tpu.dot_dimension_numbers<[1], [0], [0], [1], [0, 0, 1, 1], [], []>} : vector<8x32xf32>, vector<32x128xf32>, vector<8x128xf32> -> vector<8x128xf32>
    %330 = arith.addf %328, %329 : vector<8x128xf32>
    %331 = arith.addf %330, %5 : vector<8x128xf32>
    %332 = arith.negf %331 : vector<8x128xf32>
    %333 = math.exp %332 : vector<8x128xf32>
    %cst_70 = arith.constant 1.000000e+00 : f32
    %334 = vector.broadcast %cst_70 : f32 to vector<8x128xf32>
    %335 = arith.addf %334, %333 : vector<8x128xf32>
    %336 = arith.divf %334, %335 : vector<8x128xf32>
    %337 = math.tanh %331 : vector<8x128xf32>
    %338 = vector.extract_strided_slice %336 {offsets = [0, 0], sizes = [8, 32], strides = [1, 1]} : vector<8x128xf32> to vector<8x32xf32>
    %339 = vector.extract_strided_slice %336 {offsets = [0, 32], sizes = [8, 32], strides = [1, 1]} : vector<8x128xf32> to vector<8x32xf32>
    %340 = vector.extract_strided_slice %337 {offsets = [0, 64], sizes = [8, 32], strides = [1, 1]} : vector<8x128xf32> to vector<8x32xf32>
    %341 = vector.extract_strided_slice %336 {offsets = [0, 96], sizes = [8, 32], strides = [1, 1]} : vector<8x128xf32> to vector<8x32xf32>
    %342 = arith.mulf %339, %307 : vector<8x32xf32>
    %343 = arith.mulf %338, %340 : vector<8x32xf32>
    %344 = arith.addf %342, %343 : vector<8x32xf32>
    %345 = math.tanh %344 : vector<8x32xf32>
    %346 = arith.mulf %341, %345 : vector<8x32xf32>
    %c0_71 = arith.constant 0 : index
    %c0_72 = arith.constant 0 : index
    %347 = vector.load %arg11[%c0_71, %c0_72] : memref<64x32xf32, #tpu.memory_space<vmem>>, vector<8x32xf32>
    tpu.vector_store %arg11[%c0_71, %c0_72], %346 {strides = array<i32>} : memref<64x32xf32, #tpu.memory_space<vmem>>, vector<8x32xf32>,
    %c72 = arith.constant 72 : index
    %c0_73 = arith.constant 0 : index
    %348 = vector.load %arg10[%c72, %c0_73] : memref<128x128xf32, #tpu.memory_space<vmem>>, vector<8x128xf32>
    %cst_74 = arith.constant dense<0.000000e+00> : vector<8x128xf32>
    %349 = tpu.matmul %327, %0, %cst_74 {dimension_numbers = #tpu.dot_dimension_numbers<[1], [0], [0], [1], [0, 0, 1, 1], [], []>} : vector<8x32xf32>, vector<32x128xf32>, vector<8x128xf32> -> vector<8x128xf32>
    %350 = arith.addf %348, %349 : vector<8x128xf32>
    %351 = arith.negf %350 : vector<8x128xf32>
    %352 = math.exp %351 : vector<8x128xf32>
    %cst_75 = arith.constant 1.000000e+00 : f32
    %353 = vector.broadcast %cst_75 : f32 to vector<8x128xf32>
    %354 = arith.addf %353, %352 : vector<8x128xf32>
    %355 = arith.divf %353, %354 : vector<8x128xf32>
    %356 = math.tanh %350 : vector<8x128xf32>
    %357 = vector.extract_strided_slice %355 {offsets = [0, 0], sizes = [8, 32], strides = [1, 1]} : vector<8x128xf32> to vector<8x32xf32>
    %358 = vector.extract_strided_slice %355 {offsets = [0, 32], sizes = [8, 32], strides = [1, 1]} : vector<8x128xf32> to vector<8x32xf32>
    %359 = vector.extract_strided_slice %356 {offsets = [0, 64], sizes = [8, 32], strides = [1, 1]} : vector<8x128xf32> to vector<8x32xf32>
    %360 = vector.extract_strided_slice %355 {offsets = [0, 96], sizes = [8, 32], strides = [1, 1]} : vector<8x128xf32> to vector<8x32xf32>
    %361 = arith.mulf %358, %325 : vector<8x32xf32>
    %362 = arith.mulf %357, %359 : vector<8x32xf32>
    %363 = arith.addf %361, %362 : vector<8x32xf32>
    %364 = math.tanh %363 : vector<8x32xf32>
    %365 = arith.mulf %360, %364 : vector<8x32xf32>
    %cst_76 = arith.constant dense<0.000000e+00> : vector<8x128xf32>
    %366 = tpu.matmul %365, %1, %cst_76 {dimension_numbers = #tpu.dot_dimension_numbers<[1], [0], [0], [1], [0, 0, 1, 1], [], []>} : vector<8x32xf32>, vector<32x128xf32>, vector<8x128xf32> -> vector<8x128xf32>
    %cst_77 = arith.constant dense<0.000000e+00> : vector<8x128xf32>
    %367 = tpu.matmul %346, %2, %cst_77 {dimension_numbers = #tpu.dot_dimension_numbers<[1], [0], [0], [1], [0, 0, 1, 1], [], []>} : vector<8x32xf32>, vector<32x128xf32>, vector<8x128xf32> -> vector<8x128xf32>
    %368 = arith.addf %366, %367 : vector<8x128xf32>
    %369 = arith.addf %368, %5 : vector<8x128xf32>
    %370 = arith.negf %369 : vector<8x128xf32>
    %371 = math.exp %370 : vector<8x128xf32>
    %cst_78 = arith.constant 1.000000e+00 : f32
    %372 = vector.broadcast %cst_78 : f32 to vector<8x128xf32>
    %373 = arith.addf %372, %371 : vector<8x128xf32>
    %374 = arith.divf %372, %373 : vector<8x128xf32>
    %375 = math.tanh %369 : vector<8x128xf32>
    %376 = vector.extract_strided_slice %374 {offsets = [0, 0], sizes = [8, 32], strides = [1, 1]} : vector<8x128xf32> to vector<8x32xf32>
    %377 = vector.extract_strided_slice %374 {offsets = [0, 32], sizes = [8, 32], strides = [1, 1]} : vector<8x128xf32> to vector<8x32xf32>
    %378 = vector.extract_strided_slice %375 {offsets = [0, 64], sizes = [8, 32], strides = [1, 1]} : vector<8x128xf32> to vector<8x32xf32>
    %379 = vector.extract_strided_slice %374 {offsets = [0, 96], sizes = [8, 32], strides = [1, 1]} : vector<8x128xf32> to vector<8x32xf32>
    %380 = arith.mulf %377, %344 : vector<8x32xf32>
    %381 = arith.mulf %376, %378 : vector<8x32xf32>
    %382 = arith.addf %380, %381 : vector<8x32xf32>
    %383 = math.tanh %382 : vector<8x32xf32>
    %384 = arith.mulf %379, %383 : vector<8x32xf32>
    %c8_79 = arith.constant 8 : index
    %c0_80 = arith.constant 0 : index
    %385 = vector.load %arg11[%c8_79, %c0_80] : memref<64x32xf32, #tpu.memory_space<vmem>>, vector<8x32xf32>
    tpu.vector_store %arg11[%c8_79, %c0_80], %384 {strides = array<i32>} : memref<64x32xf32, #tpu.memory_space<vmem>>, vector<8x32xf32>,
    %c80 = arith.constant 80 : index
    %c0_81 = arith.constant 0 : index
    %386 = vector.load %arg10[%c80, %c0_81] : memref<128x128xf32, #tpu.memory_space<vmem>>, vector<8x128xf32>
    %cst_82 = arith.constant dense<0.000000e+00> : vector<8x128xf32>
    %387 = tpu.matmul %365, %0, %cst_82 {dimension_numbers = #tpu.dot_dimension_numbers<[1], [0], [0], [1], [0, 0, 1, 1], [], []>} : vector<8x32xf32>, vector<32x128xf32>, vector<8x128xf32> -> vector<8x128xf32>
    %388 = arith.addf %386, %387 : vector<8x128xf32>
    %389 = arith.negf %388 : vector<8x128xf32>
    %390 = math.exp %389 : vector<8x128xf32>
    %cst_83 = arith.constant 1.000000e+00 : f32
    %391 = vector.broadcast %cst_83 : f32 to vector<8x128xf32>
    %392 = arith.addf %391, %390 : vector<8x128xf32>
    %393 = arith.divf %391, %392 : vector<8x128xf32>
    %394 = math.tanh %388 : vector<8x128xf32>
    %395 = vector.extract_strided_slice %393 {offsets = [0, 0], sizes = [8, 32], strides = [1, 1]} : vector<8x128xf32> to vector<8x32xf32>
    %396 = vector.extract_strided_slice %393 {offsets = [0, 32], sizes = [8, 32], strides = [1, 1]} : vector<8x128xf32> to vector<8x32xf32>
    %397 = vector.extract_strided_slice %394 {offsets = [0, 64], sizes = [8, 32], strides = [1, 1]} : vector<8x128xf32> to vector<8x32xf32>
    %398 = vector.extract_strided_slice %393 {offsets = [0, 96], sizes = [8, 32], strides = [1, 1]} : vector<8x128xf32> to vector<8x32xf32>
    %399 = arith.mulf %396, %363 : vector<8x32xf32>
    %400 = arith.mulf %395, %397 : vector<8x32xf32>
    %401 = arith.addf %399, %400 : vector<8x32xf32>
    %402 = math.tanh %401 : vector<8x32xf32>
    %403 = arith.mulf %398, %402 : vector<8x32xf32>
    %cst_84 = arith.constant dense<0.000000e+00> : vector<8x128xf32>
    %404 = tpu.matmul %403, %1, %cst_84 {dimension_numbers = #tpu.dot_dimension_numbers<[1], [0], [0], [1], [0, 0, 1, 1], [], []>} : vector<8x32xf32>, vector<32x128xf32>, vector<8x128xf32> -> vector<8x128xf32>
    %cst_85 = arith.constant dense<0.000000e+00> : vector<8x128xf32>
    %405 = tpu.matmul %384, %2, %cst_85 {dimension_numbers = #tpu.dot_dimension_numbers<[1], [0], [0], [1], [0, 0, 1, 1], [], []>} : vector<8x32xf32>, vector<32x128xf32>, vector<8x128xf32> -> vector<8x128xf32>
    %406 = arith.addf %404, %405 : vector<8x128xf32>
    %407 = arith.addf %406, %5 : vector<8x128xf32>
    %408 = arith.negf %407 : vector<8x128xf32>
    %409 = math.exp %408 : vector<8x128xf32>
    %cst_86 = arith.constant 1.000000e+00 : f32
    %410 = vector.broadcast %cst_86 : f32 to vector<8x128xf32>
    %411 = arith.addf %410, %409 : vector<8x128xf32>
    %412 = arith.divf %410, %411 : vector<8x128xf32>
    %413 = math.tanh %407 : vector<8x128xf32>
    %414 = vector.extract_strided_slice %412 {offsets = [0, 0], sizes = [8, 32], strides = [1, 1]} : vector<8x128xf32> to vector<8x32xf32>
    %415 = vector.extract_strided_slice %412 {offsets = [0, 32], sizes = [8, 32], strides = [1, 1]} : vector<8x128xf32> to vector<8x32xf32>
    %416 = vector.extract_strided_slice %413 {offsets = [0, 64], sizes = [8, 32], strides = [1, 1]} : vector<8x128xf32> to vector<8x32xf32>
    %417 = vector.extract_strided_slice %412 {offsets = [0, 96], sizes = [8, 32], strides = [1, 1]} : vector<8x128xf32> to vector<8x32xf32>
    %418 = arith.mulf %415, %382 : vector<8x32xf32>
    %419 = arith.mulf %414, %416 : vector<8x32xf32>
    %420 = arith.addf %418, %419 : vector<8x32xf32>
    %421 = math.tanh %420 : vector<8x32xf32>
    %422 = arith.mulf %417, %421 : vector<8x32xf32>
    %c16_87 = arith.constant 16 : index
    %c0_88 = arith.constant 0 : index
    %423 = vector.load %arg11[%c16_87, %c0_88] : memref<64x32xf32, #tpu.memory_space<vmem>>, vector<8x32xf32>
    tpu.vector_store %arg11[%c16_87, %c0_88], %422 {strides = array<i32>} : memref<64x32xf32, #tpu.memory_space<vmem>>, vector<8x32xf32>,
    %c88 = arith.constant 88 : index
    %c0_89 = arith.constant 0 : index
    %424 = vector.load %arg10[%c88, %c0_89] : memref<128x128xf32, #tpu.memory_space<vmem>>, vector<8x128xf32>
    %cst_90 = arith.constant dense<0.000000e+00> : vector<8x128xf32>
    %425 = tpu.matmul %403, %0, %cst_90 {dimension_numbers = #tpu.dot_dimension_numbers<[1], [0], [0], [1], [0, 0, 1, 1], [], []>} : vector<8x32xf32>, vector<32x128xf32>, vector<8x128xf32> -> vector<8x128xf32>
    %426 = arith.addf %424, %425 : vector<8x128xf32>
    %427 = arith.negf %426 : vector<8x128xf32>
    %428 = math.exp %427 : vector<8x128xf32>
    %cst_91 = arith.constant 1.000000e+00 : f32
    %429 = vector.broadcast %cst_91 : f32 to vector<8x128xf32>
    %430 = arith.addf %429, %428 : vector<8x128xf32>
    %431 = arith.divf %429, %430 : vector<8x128xf32>
    %432 = math.tanh %426 : vector<8x128xf32>
    %433 = vector.extract_strided_slice %431 {offsets = [0, 0], sizes = [8, 32], strides = [1, 1]} : vector<8x128xf32> to vector<8x32xf32>
    %434 = vector.extract_strided_slice %431 {offsets = [0, 32], sizes = [8, 32], strides = [1, 1]} : vector<8x128xf32> to vector<8x32xf32>
    %435 = vector.extract_strided_slice %432 {offsets = [0, 64], sizes = [8, 32], strides = [1, 1]} : vector<8x128xf32> to vector<8x32xf32>
    %436 = vector.extract_strided_slice %431 {offsets = [0, 96], sizes = [8, 32], strides = [1, 1]} : vector<8x128xf32> to vector<8x32xf32>
    %437 = arith.mulf %434, %401 : vector<8x32xf32>
    %438 = arith.mulf %433, %435 : vector<8x32xf32>
    %439 = arith.addf %437, %438 : vector<8x32xf32>
    %440 = math.tanh %439 : vector<8x32xf32>
    %441 = arith.mulf %436, %440 : vector<8x32xf32>
    %cst_92 = arith.constant dense<0.000000e+00> : vector<8x128xf32>
    %442 = tpu.matmul %441, %1, %cst_92 {dimension_numbers = #tpu.dot_dimension_numbers<[1], [0], [0], [1], [0, 0, 1, 1], [], []>} : vector<8x32xf32>, vector<32x128xf32>, vector<8x128xf32> -> vector<8x128xf32>
    %cst_93 = arith.constant dense<0.000000e+00> : vector<8x128xf32>
    %443 = tpu.matmul %422, %2, %cst_93 {dimension_numbers = #tpu.dot_dimension_numbers<[1], [0], [0], [1], [0, 0, 1, 1], [], []>} : vector<8x32xf32>, vector<32x128xf32>, vector<8x128xf32> -> vector<8x128xf32>
    %444 = arith.addf %442, %443 : vector<8x128xf32>
    %445 = arith.addf %444, %5 : vector<8x128xf32>
    %446 = arith.negf %445 : vector<8x128xf32>
    %447 = math.exp %446 : vector<8x128xf32>
    %cst_94 = arith.constant 1.000000e+00 : f32
    %448 = vector.broadcast %cst_94 : f32 to vector<8x128xf32>
    %449 = arith.addf %448, %447 : vector<8x128xf32>
    %450 = arith.divf %448, %449 : vector<8x128xf32>
    %451 = math.tanh %445 : vector<8x128xf32>
    %452 = vector.extract_strided_slice %450 {offsets = [0, 0], sizes = [8, 32], strides = [1, 1]} : vector<8x128xf32> to vector<8x32xf32>
    %453 = vector.extract_strided_slice %450 {offsets = [0, 32], sizes = [8, 32], strides = [1, 1]} : vector<8x128xf32> to vector<8x32xf32>
    %454 = vector.extract_strided_slice %451 {offsets = [0, 64], sizes = [8, 32], strides = [1, 1]} : vector<8x128xf32> to vector<8x32xf32>
    %455 = vector.extract_strided_slice %450 {offsets = [0, 96], sizes = [8, 32], strides = [1, 1]} : vector<8x128xf32> to vector<8x32xf32>
    %456 = arith.mulf %453, %420 : vector<8x32xf32>
    %457 = arith.mulf %452, %454 : vector<8x32xf32>
    %458 = arith.addf %456, %457 : vector<8x32xf32>
    %459 = math.tanh %458 : vector<8x32xf32>
    %460 = arith.mulf %455, %459 : vector<8x32xf32>
    %c24_95 = arith.constant 24 : index
    %c0_96 = arith.constant 0 : index
    %461 = vector.load %arg11[%c24_95, %c0_96] : memref<64x32xf32, #tpu.memory_space<vmem>>, vector<8x32xf32>
    tpu.vector_store %arg11[%c24_95, %c0_96], %460 {strides = array<i32>} : memref<64x32xf32, #tpu.memory_space<vmem>>, vector<8x32xf32>,
    %c96 = arith.constant 96 : index
    %c0_97 = arith.constant 0 : index
    %462 = vector.load %arg10[%c96, %c0_97] : memref<128x128xf32, #tpu.memory_space<vmem>>, vector<8x128xf32>
    %cst_98 = arith.constant dense<0.000000e+00> : vector<8x128xf32>
    %463 = tpu.matmul %441, %0, %cst_98 {dimension_numbers = #tpu.dot_dimension_numbers<[1], [0], [0], [1], [0, 0, 1, 1], [], []>} : vector<8x32xf32>, vector<32x128xf32>, vector<8x128xf32> -> vector<8x128xf32>
    %464 = arith.addf %462, %463 : vector<8x128xf32>
    %465 = arith.negf %464 : vector<8x128xf32>
    %466 = math.exp %465 : vector<8x128xf32>
    %cst_99 = arith.constant 1.000000e+00 : f32
    %467 = vector.broadcast %cst_99 : f32 to vector<8x128xf32>
    %468 = arith.addf %467, %466 : vector<8x128xf32>
    %469 = arith.divf %467, %468 : vector<8x128xf32>
    %470 = math.tanh %464 : vector<8x128xf32>
    %471 = vector.extract_strided_slice %469 {offsets = [0, 0], sizes = [8, 32], strides = [1, 1]} : vector<8x128xf32> to vector<8x32xf32>
    %472 = vector.extract_strided_slice %469 {offsets = [0, 32], sizes = [8, 32], strides = [1, 1]} : vector<8x128xf32> to vector<8x32xf32>
    %473 = vector.extract_strided_slice %470 {offsets = [0, 64], sizes = [8, 32], strides = [1, 1]} : vector<8x128xf32> to vector<8x32xf32>
    %474 = vector.extract_strided_slice %469 {offsets = [0, 96], sizes = [8, 32], strides = [1, 1]} : vector<8x128xf32> to vector<8x32xf32>
    %475 = arith.mulf %472, %439 : vector<8x32xf32>
    %476 = arith.mulf %471, %473 : vector<8x32xf32>
    %477 = arith.addf %475, %476 : vector<8x32xf32>
    %478 = math.tanh %477 : vector<8x32xf32>
    %479 = arith.mulf %474, %478 : vector<8x32xf32>
    %cst_100 = arith.constant dense<0.000000e+00> : vector<8x128xf32>
    %480 = tpu.matmul %479, %1, %cst_100 {dimension_numbers = #tpu.dot_dimension_numbers<[1], [0], [0], [1], [0, 0, 1, 1], [], []>} : vector<8x32xf32>, vector<32x128xf32>, vector<8x128xf32> -> vector<8x128xf32>
    %cst_101 = arith.constant dense<0.000000e+00> : vector<8x128xf32>
    %481 = tpu.matmul %460, %2, %cst_101 {dimension_numbers = #tpu.dot_dimension_numbers<[1], [0], [0], [1], [0, 0, 1, 1], [], []>} : vector<8x32xf32>, vector<32x128xf32>, vector<8x128xf32> -> vector<8x128xf32>
    %482 = arith.addf %480, %481 : vector<8x128xf32>
    %483 = arith.addf %482, %5 : vector<8x128xf32>
    %484 = arith.negf %483 : vector<8x128xf32>
    %485 = math.exp %484 : vector<8x128xf32>
    %cst_102 = arith.constant 1.000000e+00 : f32
    %486 = vector.broadcast %cst_102 : f32 to vector<8x128xf32>
    %487 = arith.addf %486, %485 : vector<8x128xf32>
    %488 = arith.divf %486, %487 : vector<8x128xf32>
    %489 = math.tanh %483 : vector<8x128xf32>
    %490 = vector.extract_strided_slice %488 {offsets = [0, 0], sizes = [8, 32], strides = [1, 1]} : vector<8x128xf32> to vector<8x32xf32>
    %491 = vector.extract_strided_slice %488 {offsets = [0, 32], sizes = [8, 32], strides = [1, 1]} : vector<8x128xf32> to vector<8x32xf32>
    %492 = vector.extract_strided_slice %489 {offsets = [0, 64], sizes = [8, 32], strides = [1, 1]} : vector<8x128xf32> to vector<8x32xf32>
    %493 = vector.extract_strided_slice %488 {offsets = [0, 96], sizes = [8, 32], strides = [1, 1]} : vector<8x128xf32> to vector<8x32xf32>
    %494 = arith.mulf %491, %458 : vector<8x32xf32>
    %495 = arith.mulf %490, %492 : vector<8x32xf32>
    %496 = arith.addf %494, %495 : vector<8x32xf32>
    %497 = math.tanh %496 : vector<8x32xf32>
    %498 = arith.mulf %493, %497 : vector<8x32xf32>
    %c32_103 = arith.constant 32 : index
    %c0_104 = arith.constant 0 : index
    %499 = vector.load %arg11[%c32_103, %c0_104] : memref<64x32xf32, #tpu.memory_space<vmem>>, vector<8x32xf32>
    tpu.vector_store %arg11[%c32_103, %c0_104], %498 {strides = array<i32>} : memref<64x32xf32, #tpu.memory_space<vmem>>, vector<8x32xf32>,
    %c104 = arith.constant 104 : index
    %c0_105 = arith.constant 0 : index
    %500 = vector.load %arg10[%c104, %c0_105] : memref<128x128xf32, #tpu.memory_space<vmem>>, vector<8x128xf32>
    %cst_106 = arith.constant dense<0.000000e+00> : vector<8x128xf32>
    %501 = tpu.matmul %479, %0, %cst_106 {dimension_numbers = #tpu.dot_dimension_numbers<[1], [0], [0], [1], [0, 0, 1, 1], [], []>} : vector<8x32xf32>, vector<32x128xf32>, vector<8x128xf32> -> vector<8x128xf32>
    %502 = arith.addf %500, %501 : vector<8x128xf32>
    %503 = arith.negf %502 : vector<8x128xf32>
    %504 = math.exp %503 : vector<8x128xf32>
    %cst_107 = arith.constant 1.000000e+00 : f32
    %505 = vector.broadcast %cst_107 : f32 to vector<8x128xf32>
    %506 = arith.addf %505, %504 : vector<8x128xf32>
    %507 = arith.divf %505, %506 : vector<8x128xf32>
    %508 = math.tanh %502 : vector<8x128xf32>
    %509 = vector.extract_strided_slice %507 {offsets = [0, 0], sizes = [8, 32], strides = [1, 1]} : vector<8x128xf32> to vector<8x32xf32>
    %510 = vector.extract_strided_slice %507 {offsets = [0, 32], sizes = [8, 32], strides = [1, 1]} : vector<8x128xf32> to vector<8x32xf32>
    %511 = vector.extract_strided_slice %508 {offsets = [0, 64], sizes = [8, 32], strides = [1, 1]} : vector<8x128xf32> to vector<8x32xf32>
    %512 = vector.extract_strided_slice %507 {offsets = [0, 96], sizes = [8, 32], strides = [1, 1]} : vector<8x128xf32> to vector<8x32xf32>
    %513 = arith.mulf %510, %477 : vector<8x32xf32>
    %514 = arith.mulf %509, %511 : vector<8x32xf32>
    %515 = arith.addf %513, %514 : vector<8x32xf32>
    %516 = math.tanh %515 : vector<8x32xf32>
    %517 = arith.mulf %512, %516 : vector<8x32xf32>
    %cst_108 = arith.constant dense<0.000000e+00> : vector<8x128xf32>
    %518 = tpu.matmul %517, %1, %cst_108 {dimension_numbers = #tpu.dot_dimension_numbers<[1], [0], [0], [1], [0, 0, 1, 1], [], []>} : vector<8x32xf32>, vector<32x128xf32>, vector<8x128xf32> -> vector<8x128xf32>
    %cst_109 = arith.constant dense<0.000000e+00> : vector<8x128xf32>
    %519 = tpu.matmul %498, %2, %cst_109 {dimension_numbers = #tpu.dot_dimension_numbers<[1], [0], [0], [1], [0, 0, 1, 1], [], []>} : vector<8x32xf32>, vector<32x128xf32>, vector<8x128xf32> -> vector<8x128xf32>
    %520 = arith.addf %518, %519 : vector<8x128xf32>
    %521 = arith.addf %520, %5 : vector<8x128xf32>
    %522 = arith.negf %521 : vector<8x128xf32>
    %523 = math.exp %522 : vector<8x128xf32>
    %cst_110 = arith.constant 1.000000e+00 : f32
    %524 = vector.broadcast %cst_110 : f32 to vector<8x128xf32>
    %525 = arith.addf %524, %523 : vector<8x128xf32>
    %526 = arith.divf %524, %525 : vector<8x128xf32>
    %527 = math.tanh %521 : vector<8x128xf32>
    %528 = vector.extract_strided_slice %526 {offsets = [0, 0], sizes = [8, 32], strides = [1, 1]} : vector<8x128xf32> to vector<8x32xf32>
    %529 = vector.extract_strided_slice %526 {offsets = [0, 32], sizes = [8, 32], strides = [1, 1]} : vector<8x128xf32> to vector<8x32xf32>
    %530 = vector.extract_strided_slice %527 {offsets = [0, 64], sizes = [8, 32], strides = [1, 1]} : vector<8x128xf32> to vector<8x32xf32>
    %531 = vector.extract_strided_slice %526 {offsets = [0, 96], sizes = [8, 32], strides = [1, 1]} : vector<8x128xf32> to vector<8x32xf32>
    %532 = arith.mulf %529, %496 : vector<8x32xf32>
    %533 = arith.mulf %528, %530 : vector<8x32xf32>
    %534 = arith.addf %532, %533 : vector<8x32xf32>
    %535 = math.tanh %534 : vector<8x32xf32>
    %536 = arith.mulf %531, %535 : vector<8x32xf32>
    %c40_111 = arith.constant 40 : index
    %c0_112 = arith.constant 0 : index
    %537 = vector.load %arg11[%c40_111, %c0_112] : memref<64x32xf32, #tpu.memory_space<vmem>>, vector<8x32xf32>
    tpu.vector_store %arg11[%c40_111, %c0_112], %536 {strides = array<i32>} : memref<64x32xf32, #tpu.memory_space<vmem>>, vector<8x32xf32>,
    %c112 = arith.constant 112 : index
    %c0_113 = arith.constant 0 : index
    %538 = vector.load %arg10[%c112, %c0_113] : memref<128x128xf32, #tpu.memory_space<vmem>>, vector<8x128xf32>
    %cst_114 = arith.constant dense<0.000000e+00> : vector<8x128xf32>
    %539 = tpu.matmul %517, %0, %cst_114 {dimension_numbers = #tpu.dot_dimension_numbers<[1], [0], [0], [1], [0, 0, 1, 1], [], []>} : vector<8x32xf32>, vector<32x128xf32>, vector<8x128xf32> -> vector<8x128xf32>
    %540 = arith.addf %538, %539 : vector<8x128xf32>
    %541 = arith.negf %540 : vector<8x128xf32>
    %542 = math.exp %541 : vector<8x128xf32>
    %cst_115 = arith.constant 1.000000e+00 : f32
    %543 = vector.broadcast %cst_115 : f32 to vector<8x128xf32>
    %544 = arith.addf %543, %542 : vector<8x128xf32>
    %545 = arith.divf %543, %544 : vector<8x128xf32>
    %546 = math.tanh %540 : vector<8x128xf32>
    %547 = vector.extract_strided_slice %545 {offsets = [0, 0], sizes = [8, 32], strides = [1, 1]} : vector<8x128xf32> to vector<8x32xf32>
    %548 = vector.extract_strided_slice %545 {offsets = [0, 32], sizes = [8, 32], strides = [1, 1]} : vector<8x128xf32> to vector<8x32xf32>
    %549 = vector.extract_strided_slice %546 {offsets = [0, 64], sizes = [8, 32], strides = [1, 1]} : vector<8x128xf32> to vector<8x32xf32>
    %550 = vector.extract_strided_slice %545 {offsets = [0, 96], sizes = [8, 32], strides = [1, 1]} : vector<8x128xf32> to vector<8x32xf32>
    %551 = arith.mulf %548, %515 : vector<8x32xf32>
    %552 = arith.mulf %547, %549 : vector<8x32xf32>
    %553 = arith.addf %551, %552 : vector<8x32xf32>
    %554 = math.tanh %553 : vector<8x32xf32>
    %555 = arith.mulf %550, %554 : vector<8x32xf32>
    %cst_116 = arith.constant dense<0.000000e+00> : vector<8x128xf32>
    %556 = tpu.matmul %555, %1, %cst_116 {dimension_numbers = #tpu.dot_dimension_numbers<[1], [0], [0], [1], [0, 0, 1, 1], [], []>} : vector<8x32xf32>, vector<32x128xf32>, vector<8x128xf32> -> vector<8x128xf32>
    %cst_117 = arith.constant dense<0.000000e+00> : vector<8x128xf32>
    %557 = tpu.matmul %536, %2, %cst_117 {dimension_numbers = #tpu.dot_dimension_numbers<[1], [0], [0], [1], [0, 0, 1, 1], [], []>} : vector<8x32xf32>, vector<32x128xf32>, vector<8x128xf32> -> vector<8x128xf32>
    %558 = arith.addf %556, %557 : vector<8x128xf32>
    %559 = arith.addf %558, %5 : vector<8x128xf32>
    %560 = arith.negf %559 : vector<8x128xf32>
    %561 = math.exp %560 : vector<8x128xf32>
    %cst_118 = arith.constant 1.000000e+00 : f32
    %562 = vector.broadcast %cst_118 : f32 to vector<8x128xf32>
    %563 = arith.addf %562, %561 : vector<8x128xf32>
    %564 = arith.divf %562, %563 : vector<8x128xf32>
    %565 = math.tanh %559 : vector<8x128xf32>
    %566 = vector.extract_strided_slice %564 {offsets = [0, 0], sizes = [8, 32], strides = [1, 1]} : vector<8x128xf32> to vector<8x32xf32>
    %567 = vector.extract_strided_slice %564 {offsets = [0, 32], sizes = [8, 32], strides = [1, 1]} : vector<8x128xf32> to vector<8x32xf32>
    %568 = vector.extract_strided_slice %565 {offsets = [0, 64], sizes = [8, 32], strides = [1, 1]} : vector<8x128xf32> to vector<8x32xf32>
    %569 = vector.extract_strided_slice %564 {offsets = [0, 96], sizes = [8, 32], strides = [1, 1]} : vector<8x128xf32> to vector<8x32xf32>
    %570 = arith.mulf %567, %534 : vector<8x32xf32>
    %571 = arith.mulf %566, %568 : vector<8x32xf32>
    %572 = arith.addf %570, %571 : vector<8x32xf32>
    %573 = math.tanh %572 : vector<8x32xf32>
    %574 = arith.mulf %569, %573 : vector<8x32xf32>
    %c48_119 = arith.constant 48 : index
    %c0_120 = arith.constant 0 : index
    %575 = vector.load %arg11[%c48_119, %c0_120] : memref<64x32xf32, #tpu.memory_space<vmem>>, vector<8x32xf32>
    tpu.vector_store %arg11[%c48_119, %c0_120], %574 {strides = array<i32>} : memref<64x32xf32, #tpu.memory_space<vmem>>, vector<8x32xf32>,
    %c120 = arith.constant 120 : index
    %c0_121 = arith.constant 0 : index
    %576 = vector.load %arg10[%c120, %c0_121] : memref<128x128xf32, #tpu.memory_space<vmem>>, vector<8x128xf32>
    %cst_122 = arith.constant dense<0.000000e+00> : vector<8x128xf32>
    %577 = tpu.matmul %555, %0, %cst_122 {dimension_numbers = #tpu.dot_dimension_numbers<[1], [0], [0], [1], [0, 0, 1, 1], [], []>} : vector<8x32xf32>, vector<32x128xf32>, vector<8x128xf32> -> vector<8x128xf32>
    %578 = arith.addf %576, %577 : vector<8x128xf32>
    %579 = arith.negf %578 : vector<8x128xf32>
    %580 = math.exp %579 : vector<8x128xf32>
    %cst_123 = arith.constant 1.000000e+00 : f32
    %581 = vector.broadcast %cst_123 : f32 to vector<8x128xf32>
    %582 = arith.addf %581, %580 : vector<8x128xf32>
    %583 = arith.divf %581, %582 : vector<8x128xf32>
    %584 = math.tanh %578 : vector<8x128xf32>
    %585 = vector.extract_strided_slice %583 {offsets = [0, 0], sizes = [8, 32], strides = [1, 1]} : vector<8x128xf32> to vector<8x32xf32>
    %586 = vector.extract_strided_slice %583 {offsets = [0, 32], sizes = [8, 32], strides = [1, 1]} : vector<8x128xf32> to vector<8x32xf32>
    %587 = vector.extract_strided_slice %584 {offsets = [0, 64], sizes = [8, 32], strides = [1, 1]} : vector<8x128xf32> to vector<8x32xf32>
    %588 = vector.extract_strided_slice %583 {offsets = [0, 96], sizes = [8, 32], strides = [1, 1]} : vector<8x128xf32> to vector<8x32xf32>
    %589 = arith.mulf %586, %553 : vector<8x32xf32>
    %590 = arith.mulf %585, %587 : vector<8x32xf32>
    %591 = arith.addf %589, %590 : vector<8x32xf32>
    %592 = math.tanh %591 : vector<8x32xf32>
    %593 = arith.mulf %588, %592 : vector<8x32xf32>
    %cst_124 = arith.constant dense<0.000000e+00> : vector<8x128xf32>
    %594 = tpu.matmul %593, %1, %cst_124 {dimension_numbers = #tpu.dot_dimension_numbers<[1], [0], [0], [1], [0, 0, 1, 1], [], []>} : vector<8x32xf32>, vector<32x128xf32>, vector<8x128xf32> -> vector<8x128xf32>
    %cst_125 = arith.constant dense<0.000000e+00> : vector<8x128xf32>
    %595 = tpu.matmul %574, %2, %cst_125 {dimension_numbers = #tpu.dot_dimension_numbers<[1], [0], [0], [1], [0, 0, 1, 1], [], []>} : vector<8x32xf32>, vector<32x128xf32>, vector<8x128xf32> -> vector<8x128xf32>
    %596 = arith.addf %594, %595 : vector<8x128xf32>
    %597 = arith.addf %596, %5 : vector<8x128xf32>
    %598 = arith.negf %597 : vector<8x128xf32>
    %599 = math.exp %598 : vector<8x128xf32>
    %cst_126 = arith.constant 1.000000e+00 : f32
    %600 = vector.broadcast %cst_126 : f32 to vector<8x128xf32>
    %601 = arith.addf %600, %599 : vector<8x128xf32>
    %602 = arith.divf %600, %601 : vector<8x128xf32>
    %603 = math.tanh %597 : vector<8x128xf32>
    %604 = vector.extract_strided_slice %602 {offsets = [0, 0], sizes = [8, 32], strides = [1, 1]} : vector<8x128xf32> to vector<8x32xf32>
    %605 = vector.extract_strided_slice %602 {offsets = [0, 32], sizes = [8, 32], strides = [1, 1]} : vector<8x128xf32> to vector<8x32xf32>
    %606 = vector.extract_strided_slice %603 {offsets = [0, 64], sizes = [8, 32], strides = [1, 1]} : vector<8x128xf32> to vector<8x32xf32>
    %607 = vector.extract_strided_slice %602 {offsets = [0, 96], sizes = [8, 32], strides = [1, 1]} : vector<8x128xf32> to vector<8x32xf32>
    %608 = arith.mulf %605, %572 : vector<8x32xf32>
    %609 = arith.mulf %604, %606 : vector<8x32xf32>
    %610 = arith.addf %608, %609 : vector<8x32xf32>
    %611 = math.tanh %610 : vector<8x32xf32>
    %612 = arith.mulf %607, %611 : vector<8x32xf32>
    %c56_127 = arith.constant 56 : index
    %c0_128 = arith.constant 0 : index
    %613 = vector.load %arg11[%c56_127, %c0_128] : memref<64x32xf32, #tpu.memory_space<vmem>>, vector<8x32xf32>
    tpu.vector_store %arg11[%c56_127, %c0_128], %612 {strides = array<i32>} : memref<64x32xf32, #tpu.memory_space<vmem>>, vector<8x32xf32>,
    %c0_129 = arith.constant 0 : index
    %c0_130 = arith.constant 0 : index
    %614 = vector.load %arg11[%c0_129, %c0_130] : memref<64x32xf32, #tpu.memory_space<vmem>>, vector<64x32xf32>
    %c0_131 = arith.constant 0 : index
    %c0_132 = arith.constant 0 : index
    %615 = vector.load %arg7[%c0_131, %c0_132] : memref<8x32xf32, #tpu.memory_space<vmem>>, vector<8x32xf32>
    %cst_133 = arith.constant dense<0.000000e+00> : vector<8x64xf32>
    %616 = tpu.matmul %615, %614, %cst_133 {dimension_numbers = #tpu.dot_dimension_numbers<[1], [1], [0], [0], [0, 0, 1, 0], [], []>} : vector<8x32xf32>, vector<64x32xf32>, vector<8x64xf32> -> vector<8x64xf32>
    %617 = vector.extract_strided_slice %616 {offsets = [0, 0], sizes = [1, 64], strides = [1, 1]} : vector<8x64xf32> to vector<1x64xf32>
    %c0_134 = arith.constant 0 : index
    %c0_135 = arith.constant 0 : index
    %618 = vector.load %arg8[%c0_134, %c0_135] : memref<1x1xf32, #tpu.memory_space<vmem>>, vector<1x1xf32>
    %619 = vector.broadcast %618 : vector<1x1xf32> to vector<1x64xf32>
    %620 = arith.addf %617, %619 : vector<1x64xf32>
    %c0_136 = arith.constant 0 : index
    %c0_137 = arith.constant 0 : index
    %621 = vector.load %arg9[%c0_136, %c0_137] : memref<1x64xf32, #tpu.memory_space<vmem>>, vector<1x64xf32>
    tpu.vector_store %arg9[%c0_136, %c0_137], %620 {strides = array<i32>} : memref<1x64xf32, #tpu.memory_space<vmem>>, vector<1x64xf32>,
    return
  }
}

</mosaic_0001>

<bundles_post_ra>
// kernel: tpu_custom_call.1
= control target key start
LH: loop header
LB: loop body
LE: loop exit
PB: predicated region body
PF: predicated region fallthrough
CT: control target
= control target key end

     0   :  { %s7223_s0 = inlined_call_operand.vmem [shape: f32[128,4], index: 0, kind: input, shape index: {}]   ;;  %s7224_s1 = inlined_call_operand.vmem [shape: f32[4,128], index: 1, kind: input, shape index: {}]   ;;  %s7225_s2 = inlined_call_operand.vmem [shape: f32[32,128], index: 2, kind: input, shape index: {}]   ;;  %s7226_s3 = inlined_call_operand.vmem [shape: f32[1,128], index: 3, kind: input, shape index: {}]   ;;  %s7227_s4 = inlined_call_operand.vmem [shape: f32[32,128], index: 4, kind: input, shape index: {}]   ;;  %s7228_s5 = inlined_call_operand.vmem [shape: f32[32,128], index: 5, kind: input, shape index: {}]   ;;  %s7229_s6 = inlined_call_operand.vmem [shape: f32[1,128], index: 6, kind: input, shape index: {}]   ;;  %s7230_s7 = inlined_call_operand.vmem [shape: f32[8,32], index: 7, kind: input, shape index: {}]   ;;  %s7231_s8 = inlined_call_operand.<no memory space> [shape: f32[1,1], index: 8, kind: input, shape index: {}]   ;;  %s7232_s9 = inlined_call_operand.hbm [shape: f32[1,64], index: 9, kind: output, shape index: {}]  }
   0x1   :  { %v14_v0 = vstv %s7231_s8 }
   0x2   :  { %15 = vst [vmem:[#allocation4] sm:$0x1] %v14_v0 }
   0x3   :  { %v70_v1 = vld [vmem:[%s7224_s1] sm:$0xf]  ;;  %vm127_vm0 = vcmask 1043456   ;;  %vm78_vm1 = vcmask 31744   ;;  %v63_v3 = vld [vmem:[%s7223_s0 + $0x48] sm:$0xff]  ;;  %v64_v6 = vld [vmem:[%s7223_s0 + $0x50] sm:$0xff] }
   0x4   :  { %v62_v2 = vld [vmem:[%s7223_s0 + $0x40] sm:$0xff]  ;;  %6028 = vmatprep.subr.msk.mxu1 %vm127_vm0, %v70_v1  ;;  %v36_v5 = vld [vmem:[%s7225_s2 + $0x8] sm:$0xff]  ;;  %5151 = vmatprep.subr.msk.mxu0 %vm127_vm0, %v70_v1  ;;  %v6322_v8 = vmov 0.0|0.0   ;;  %v37_v9 = vld [vmem:[%s7225_s2 + $0x10] sm:$0xff] }
   0x5   :  { %5165 = vmatprep.mubr.msk.f32.mxu1 %vm78_vm1, %v62_v2  ;;  %v35_v4 = vld [vmem:[%s7225_s2] sm:$0xff]  ;;  %6029 = vmatpush3.msk.msra.mxu1 %vm127_vm0, %v70_v1  ;;  %v38_v10 = vld [vmem:[%s7225_s2 + $0x18] sm:$0xff]  ;;  %v55_v14 = vld [vmem:[%s7223_s0 + $0x8] sm:$0xff] }
   0x6   :  { %v6403_v7 = vpack.c.bf16 %v36_v5, %v35_v4  ;;  %5166 = vmatmul.mubr.msk.f32.vlgmr.msra.gmra.mrb[0].mxu1 %vm78_vm1, %v63_v3  ;;  %5724 = vmatprep.subr.bf16.mxu1 %v6322_v8  ;;  %v65_v11 = vld [vmem:[%s7223_s0 + $0x58] sm:$0xff]  ;;  %v6419_v12 = vpack.c.bf16 %v38_v10, %v37_v9  ;;  %v54_v13 = vld [vmem:[%s7223_s0] sm:$0xff] }
   0x7   :  { %5168 = vmatprep.mubr.msk.f32.mxu1 %vm78_vm1, %v64_v6  ;;  %v66_v15 = vld [vmem:[%s7223_s0 + $0x60] sm:$0xff]  ;;  %5152 = vmatpush3.msk.msra.mxu0 %vm127_vm0, %v70_v1 }
   0x8   :  { %5726 = vmatpush3.bf16.msra.mxu1 %v6403_v7 }
   0x9   :  { %5727 = vmatprep.subr.bf16.mxu1 %v6322_v8 }
   0xa   :  { %16 = vsyncpa [#allocation6], 0  ;;  %5153 = vmatprep.mubr.msk.f32.mxu0 %vm78_vm1, %v54_v13  ;;  %5748 = vmatprep.subr.bf16.mxu0 %v6322_v8  ;;  %v67_v16 = vld [vmem:[%s7223_s0 + $0x68] sm:$0xff]  ;;  %v68_v17 = vld [vmem:[%s7223_s0 + $0x70] sm:$0xff]  ;;  %vm6323_vm2 = vmmov 0   ;;  %v6324_v19 = vmov 0.0  }
   0xb   :  { %5169 = vmatmul.mubr.msk.f32.gmra.mrb[2].mxu1 %vm78_vm1, %v65_v11  ;;  %5154 = vmatmul.mubr.msk.f32.vlgmr.msra.gmra.mrb[0].mxu0 %vm78_vm1, %v55_v14  ;;  %v69_v18 = vld [vmem:[%s7223_s0 + $0x78] sm:$0xff]  ;;  %v6473_v28 = vld [vmem:[%s7226_s3] ss:$0 sm:$0xff]  ;;  %s6325_s18 = smov 64   ;;  %s6326_s1 = smov 32   ;;  %v44_v46 = vld [vmem:[%s7228_s5 + $0x8] sm:$0xff] }
   0xc   :  { %5171 = vmatprep.mubr.msk.f32.mxu1 %vm78_vm1, %v66_v15  ;;  %5729 = vmatpush3.bf16.msra.mxu1 %v6419_v12  ;;  %v43_v45 = vld [vmem:[%s7228_s5] sm:$0xff]  ;;  %v45_v47 = vld [vmem:[%s7228_s5 + $0x10] sm:$0xff]  ;;  %v46_v49 = vld [vmem:[%s7228_s5 + $0x18] sm:$0xff]  ;;  %vm293_vm3 = vcmask 261120   ;;  %vm4763_vm5 = vcmask 516096  }
   0xd   :  { %5730 = vmatprep.subr.bf16.mxu1 %v6322_v8  ;;  %v6494_v48 = vpack.c.bf16 %v44_v46, %v43_v45  ;;  %v6500_v50 = vpack.c.bf16 %v46_v49, %v45_v47  ;;  %v39_v51 = vld [vmem:[%s7227_s4] sm:$0xff]  ;;  %v40_v52 = vld [vmem:[%s7227_s4 + $0x8] sm:$0xff]  ;;  %v41_v54 = vld [vmem:[%s7227_s4 + $0x10] sm:$0xff] }
   0xe   :  { %v6512_v53 = vpack.c.bf16 %v40_v52, %v39_v51  ;;  %v42_v55 = vld [vmem:[%s7227_s4 + $0x18] sm:$0xff]  ;;  %v6551_v63 = vld [vmem:[%s7229_s6] ss:$0 sm:$0xff]  ;;  %v60_v46 = vld [vmem:[%s7223_s0 + $0x30] sm:$0xff] }
   0xf   :  { %5172 = vmatmul.mubr.msk.f32.gmra.mrb[4].mxu1 %vm78_vm1, %v67_v16  ;;  %5750 = vmatpush3.bf16.msra.mxu0 %v6494_v48  ;;  %v6526_v57 = vpack.c.bf16 %v42_v55, %v41_v54  ;;  %v61_v47 = vld [vmem:[%s7223_s0 + $0x38] sm:$0xff]  ;;  %vm7179_vm4 = vmpackc.low %vm293_vm3, %vm293_vm3 }
  0x10   :  { %5174 = vmatprep.mubr.msk.f32.mxu1 %vm78_vm1, %v68_v17  ;;  %5751 = vmatprep.subr.bf16.mxu0 %v6322_v8 }
  0x13   :  { %5175 = vmatmul.mubr.msk.f32.gmra.mrb[6].mxu1 %vm78_vm1, %v69_v18  ;;  %5753 = vmatpush3.bf16.msra.mxu0 %v6500_v50 }
  0x14   :  { %5185 = vmatprep.mubr.msk.f32.mxu1 %vm6323_vm2, %v6324_v19  ;;  %5760 = vmatprep.subr.bf16.mxu0 %v6322_v8 }
  0x17   :  { %5186 = vmatmul.mubr.f32.vlgmr.msra.gmra.mrb[8].mxu1 %v6324_v19 }
  0x18   :  { %5196 = vmatprep.mubr.msk.f32.mxu1 %vm6323_vm2, %v6324_v19  ;;  %5732 = vmatpush3.bf16.msra.mxu1 %v6494_v48 }
  0x19   :  { %5733 = vmatprep.subr.bf16.mxu1 %v6322_v8 }
  0x1c   :  { %5735 = vmatpush3.bf16.msra.mxu1 %v6500_v50 }
  0x1d   :  { %5736 = vmatprep.subr.bf16.mxu1 %v6322_v8 }
  0x1f   :  { %5197 = vmatmul.mubr.f32.vlgmr.msra.gmra.mrb[10].mxu1 %v6324_v19 }
  0x20   :  { %5738 = vmatpush3.bf16.msra.mxu1 %v6512_v53  ;;  %5207 = vmatprep.mubr.msk.f32.mxu1 %vm6323_vm2, %v6324_v19 }
  0x21   :  { %5739 = vmatprep.subr.bf16.mxu1 %v6322_v8 }
  0x24   :  { %5741 = vmatpush3.bf16.msra.mxu1 %v6526_v57 }
  0x25   :  { %5742 = vmatprep.subr.bf16.mxu1 %v6322_v8 }
  0xd9   :  { %v6456_v20 = vpop.f32.mrb[0].mxu1 }
  0xda   :  { %v6458_v21 = vpop.f32.mrb[1].mxu1 }
  0xde   :  { %v6460_v22 = vpop.f32.mrb[2].mxu1  ;;  %v6462_v23 = vpop.f32.mrb[0].mxu0 }
  0xdf   :  { %v6464_v24 = vpop.f32.mrb[3].mxu1  ;;  %v197_v25 = vpop.f32.mrb[1].mxu0  ;;  %v203_v4 = vadd.f32 %v6462_v23, %v6473_v28 }
  0xe0   :  { %v198_v31 = vadd.f32 %v6473_v28, %v197_v25 }
  0xe2   :  { %v6466_v26 = vpop.f32.mrb[4].mxu1 }
  0xe3   :  { %v6468_v27 = vpop.f32.mrb[5].mxu1 }
  0xe6   :  { %v6475_v29 = vpop.f32.mrb[6].mxu1 }
  0xe7   :  { %v6477_v30 = vpop.f32.mrb[7].mxu1 }
  0xea   :  { %v363_v32 = vpop.f32.mrb[8].mxu1 }
  0xeb   :  { %v367_v33 = vadd.f32 %v363_v32, %v198_v31  ;;  %v5187_v34 = vpop.f32.mrb[9].mxu1 }
  0xed   :  { %6038 = vtanh.f32 %v367_v33  ;;  %v4798_v36 = vmul.f32 -1.442695, %v367_v33 }
  0xef   :  { %6040 = vpow2.f32 %v4798_v36 }
  0xf2   :  { %v458_v60 = vpop.f32.mrb[10].mxu1 }
  0xf3   :  { %v5198_v61 = vpop.f32.mrb[11].mxu1 }
  0xf7   :  { %v6039_v35 = vpop.eup %6038 }
  0xf8   :  { %377 = vrot.lane.b32.xlu0 %v6039_v35, %s6325_s18 }
  0xf9   :  { %v6041_v37 = vpop.eup %6040 }
  0xfa   :  { %v371_v38 = vadd.f32 1.0, %v6041_v37 }
  0xfc   :  { %6042 = vrcp.f32 %v371_v38 }
 0x106   :  { %v6043_v39 = vpop.eup %6042 }
 0x107   :  { %v375_v42 = vmul.f32 0.0, %v6043_v39 }
 0x16a   :  { %v378_v40 = vpop.permute.xlu0 %377 }
 0x16b   :  { %v380_v41 = vmul.f32 %v6043_v39, %v378_v40 }
 0x16d   :  { %382 = vrot.lane.b32.xlu0 %v380_v41, %s6326_s1  ;;  %v56_v41 = vld [vmem:[%s7223_s0 + $0x10] sm:$0xff] }
 0x16e   :  { %5156 = vmatprep.mubr.msk.f32.mxu0 %vm78_vm1, %v56_v41 }
 0x1df   :  { %v383_v43 = vpop.permute.xlu0 %382 }
 0x1e0   :  { %v6482_v44 = vadd.f32 %v383_v43, %v375_v42  ;;  %v57_v42 = vld [vmem:[%s7223_s0 + $0x18] sm:$0xff]  ;;  %v58_v43 = vld [vmem:[%s7223_s0 + $0x20] sm:$0xff] }
 0x1e1   :  { %5157 = vmatmul.mubr.msk.f32.gmra.mrb[2].mxu0 %vm78_vm1, %v57_v42 }
 0x1e2   :  { %6044 = vtanh.f32 %v6482_v44  ;;  %5159 = vmatprep.mubr.msk.f32.mxu0 %vm78_vm1, %v58_v43 }
 0x1ec   :  { %v6045_v56 = vpop.eup %6044 }
 0x1ed   :  { %388 = vrot.lane.b32.xlu1 %v6045_v56, %s6325_s18 }
 0x25f   :  { %v389_v58 = vpop.permute.xlu1 %388 }
 0x260   :  { %v391_v59 = vmul.f32 %v6043_v39, %v389_v58 }
 0x262   :  { %463 = vrot.lane.b32.xlu1 %v391_v59, %s6326_s1 }
 0x2b4   :  { %v6597_v56 = vpop.f32.mrb[2].mxu0 }
 0x2b5   :  { %v207_v58 = vpop.f32.mrb[3].mxu0 }
 0x2d4   :  { %v464_v62 = vpop.permute.xlu1 %463 }
 0x2d5   :  { %5208 = vmatmul.mubr.msk.f32.vlgmr.msra.gmra.mrb[12].mxu1 %vm293_vm3, %v464_v62 }
 0x2d6   :  { %5744 = vmatpush3.bf16.msra.mxu1 %v6403_v7  ;;  %5218 = vmatprep.mubr.msk.f32.mxu1 %vm6323_vm2, %v6324_v19 }
 0x2d7   :  { %5745 = vmatprep.subr.bf16.mxu1 %v6322_v8 }
 0x2da   :  { %5747 = vmatpush3.bf16.msra.mxu1 %v6419_v12 }
 0x2db   :  { %5754 = vmatprep.subr.bf16.mxu1 %v6322_v8 }
 0x2dd   :  { %5219 = vmatmul.mubr.msk.f32.vlgmr.msra.gmra.mrb[14].mxu1 %vm293_vm3, %v464_v62 }
 0x2de   :  { %5756 = vmatpush3.bf16.msra.mxu1 %v6512_v53  ;;  %5240 = vmatprep.mubr.msk.f32.mxu1 %vm6323_vm2, %v6324_v19 }
 0x2df   :  { %5757 = vmatprep.subr.bf16.mxu1 %v6322_v8 }
 0x2e2   :  { %5759 = vmatpush3.bf16.msra.mxu1 %v6526_v57 }
 0x2e3   :  { %5766 = vmatprep.subr.bf16.mxu1 %v6322_v8 }
 0x3a8   :  { %v533_v0 = vpop.f32.mrb[12].mxu1 }
 0x3a9   :  { %v534_v1 = vadd.f32 %v533_v0, %v458_v60  ;;  %v5209_v2 = vpop.f32.mrb[13].mxu1 }
 0x3ab   :  { %v537_v3 = vadd.f32 %v6551_v63, %v534_v1 }
 0x3ad   :  { %6046 = vtanh.f32 %v537_v3  ;;  %v4800_v13 = vmul.f32 -1.442695, %v537_v3 }
 0x3b0   :  { %v629_v5 = vpop.f32.mrb[14].mxu1 }
 0x3b1   :  { %v633_v6 = vadd.f32 %v629_v5, %v203_v4  ;;  %v5220_v9 = vpop.f32.mrb[15].mxu1  ;;  %v208_v5 = vadd.f32 %v6473_v28, %v207_v58 }
 0x3b3   :  { %6048 = vtanh.f32 %v633_v6  ;;  %v4802_v14 = vmul.f32 -1.442695, %v633_v6 }
 0x3b4   :  { %6050 = vpow2.f32 %v4800_v13 }
 0x3b5   :  { %6052 = vpow2.f32 %v4802_v14 }
 0x3b7   :  { %v6047_v10 = vpop.eup %6046 }
 0x3b8   :  { %547 = vrot.lane.b32.xlu0 %v6047_v10, %s6325_s18 }
 0x3bd   :  { %v6049_v11 = vpop.eup %6048 }
 0x3be   :  { %643 = vrot.lane.b32.xlu1 %v6049_v11, %s6325_s18  ;;  %v6051_v15 = vpop.eup %6050 }
 0x3bf   :  { %v541_v16 = vadd.f32 1.0, %v6051_v15  ;;  %v6053_v17 = vpop.eup %6052 }
 0x3c0   :  { %v637_v18 = vadd.f32 1.0, %v6053_v17 }
 0x3c1   :  { %6054 = vrcp.f32 %v541_v16 }
 0x3c2   :  { %6056 = vrcp.f32 %v637_v18 }
 0x3cb   :  { %v6055_v23 = vpop.eup %6054 }
 0x3cc   :  { %v6057_v32 = vpop.eup %6056  ;;  %v545_v35 = vmul.f32 0.0, %v6055_v23 }
 0x3cd   :  { %v641_v38 = vmul.f32 %v6057_v32, %v6482_v44  ;;  %v59_v44 = vld [vmem:[%s7223_s0 + $0x28] sm:$0xff] }
 0x3ce   :  { %5160 = vmatmul.mubr.msk.f32.gmra.mrb[4].mxu0 %vm78_vm1, %v59_v44 }
 0x3cf   :  { %5162 = vmatprep.mubr.msk.f32.mxu0 %vm78_vm1, %v60_v46 }
 0x3d2   :  { %5163 = vmatmul.mubr.msk.f32.gmra.mrb[6].mxu0 %vm78_vm1, %v61_v47 }
 0x3d3   :  { %5229 = vmatprep.mubr.msk.f32.mxu0 %vm6323_vm2, %v6324_v19 }
 0x42a   :  { %v548_v25 = vpop.permute.xlu0 %547 }
 0x42b   :  { %v550_v31 = vmul.f32 %v6055_v23, %v548_v25 }
 0x42d   :  { %552 = vrot.lane.b32.xlu0 %v550_v31, %s6326_s1 }
 0x430   :  { %v644_v33 = vpop.permute.xlu1 %643 }
 0x431   :  { %v646_v34 = vmul.f32 %v6057_v32, %v644_v33 }
 0x433   :  { %648 = vrot.lane.b32.xlu1 %v646_v34, %s6326_s1 }
 0x49f   :  { %v553_v36 = vpop.permute.xlu0 %552 }
 0x4a0   :  { %v6560_v37 = vadd.f32 %v553_v36, %v545_v35 }
 0x4a1   :  { %v6599_v59 = vpop.f32.mrb[4].mxu0 }
 0x4a2   :  { %6058 = vtanh.f32 %v6560_v37  ;;  %v6601_v60 = vpop.f32.mrb[5].mxu0 }
 0x4a5   :  { %v649_v39 = vpop.permute.xlu1 %648  ;;  %v6603_v61 = vpop.f32.mrb[6].mxu0 }
 0x4a6   :  { %v6564_v40 = vadd.f32 %v649_v39, %v641_v38  ;;  %v6605_v62 = vpop.f32.mrb[7].mxu0 }
 0x4a8   :  { %6060 = vtanh.f32 %v6564_v40 }
 0x4ac   :  { %v6059_v45 = vpop.eup %6058 }
 0x4ad   :  { %558 = vrot.lane.b32.xlu0 %v6059_v45, %s6325_s18 }
 0x4b2   :  { %v6061_v49 = vpop.eup %6060 }
 0x4b3   :  { %654 = vrot.lane.b32.xlu1 %v6061_v49, %s6325_s18 }
 0x51f   :  { %v559_v51 = vpop.permute.xlu0 %558 }
 0x520   :  { %v561_v52 = vmul.f32 %v6055_v23, %v559_v51 }
 0x522   :  { %659 = vrot.lane.b32.xlu0 %v561_v52, %s6326_s1 }
 0x525   :  { %v655_v54 = vpop.permute.xlu1 %654 }
 0x526   :  { %v657_v55 = vmul.f32 %v6057_v32, %v655_v54 }
 0x528   :  { %734 = vrot.lane.b32.xlu1 %v657_v55, %s6326_s1 }
 0x594   :  { %v660_v0 = vpop.permute.xlu0 %659 }
 0x595   :  { %5230 = vmatmul.mubr.msk.f32.vlgmr.msra.gmra.mrb[8].mxu0 %vm293_vm3, %v660_v0 }
 0x596   :  { %5762 = vmatpush3.bf16.msra.mxu0 %v6403_v7  ;;  %5251 = vmatprep.mubr.msk.f32.mxu0 %vm6323_vm2, %v6324_v19 }
 0x597   :  { %5763 = vmatprep.subr.bf16.mxu0 %v6322_v8 }
 0x59a   :  { %5765 = vmatpush3.bf16.msra.mxu0 %v6419_v12  ;;  %v735_v1 = vpop.permute.xlu1 %734 }
 0x59b   :  { %5241 = vmatmul.mubr.msk.f32.vlgmr.msra.gmra.mrb[16].mxu1 %vm293_vm3, %v735_v1  ;;  %5772 = vmatprep.subr.bf16.mxu0 %v6322_v8 }
 0x59c   :  { %5768 = vmatpush3.bf16.msra.mxu1 %v6494_v48  ;;  %5262 = vmatprep.mubr.msk.f32.mxu1 %vm6323_vm2, %v6324_v19 }
 0x59d   :  { %5252 = vmatmul.mubr.msk.f32.vlgmr.msra.gmra.mrb[10].mxu0 %vm293_vm3, %v735_v1  ;;  %5769 = vmatprep.subr.bf16.mxu1 %v6322_v8 }
 0x59e   :  { %5774 = vmatpush3.bf16.msra.mxu0 %v6512_v53  ;;  %5273 = vmatprep.mubr.msk.f32.mxu0 %vm6323_vm2, %v6324_v19 }
 0x59f   :  { %5775 = vmatprep.subr.bf16.mxu0 %v6322_v8 }
 0x5a0   :  { %5771 = vmatpush3.bf16.msra.mxu1 %v6500_v50 }
 0x5a1   :  { %5778 = vmatprep.subr.bf16.mxu1 %v6322_v8 }
 0x5a2   :  { %5777 = vmatpush3.bf16.msra.mxu0 %v6526_v57 }
 0x5a3   :  { %5784 = vmatprep.subr.bf16.mxu0 %v6322_v8 }
 0x668   :  { %v729_v2 = vpop.f32.mrb[8].mxu0 }
 0x669   :  { %v5231_v3 = vpop.f32.mrb[9].mxu0 }
 0x66e   :  { %v804_v4 = vpop.f32.mrb[16].mxu1 }
 0x66f   :  { %v805_v6 = vadd.f32 %v804_v4, %v729_v2  ;;  %v5242_v9 = vpop.f32.mrb[17].mxu1 }
 0x670   :  { %v900_v10 = vpop.f32.mrb[10].mxu0 }
 0x671   :  { %v808_v11 = vadd.f32 %v6551_v63, %v805_v6  ;;  %v904_v13 = vadd.f32 %v900_v10, %v208_v5  ;;  %v5253_v14 = vpop.f32.mrb[11].mxu0  ;;  %v213_v5 = vadd.f32 %v6597_v56, %v6473_v28 }
 0x673   :  { %6062 = vtanh.f32 %v808_v11  ;;  %v4805_v17 = vmul.f32 -1.442695, %v808_v11  ;;  %v4807_v18 = vmul.f32 -1.442695, %v904_v13 }
 0x674   :  { %6064 = vtanh.f32 %v904_v13 }
 0x675   :  { %6066 = vpow2.f32 %v4805_v17 }
 0x676   :  { %6068 = vpow2.f32 %v4807_v18 }
 0x67d   :  { %v6063_v15 = vpop.eup %6062 }
 0x67e   :  { %v6065_v16 = vpop.eup %6064  ;;  %818 = vrot.lane.b32.xlu0 %v6063_v15, %s6325_s18 }
 0x67f   :  { %914 = vrot.lane.b32.xlu1 %v6065_v16, %s6325_s18  ;;  %v6067_v23 = vpop.eup %6066 }
 0x680   :  { %v6069_v25 = vpop.eup %6068  ;;  %v812_v31 = vadd.f32 1.0, %v6067_v23 }
 0x681   :  { %v908_v32 = vadd.f32 1.0, %v6069_v25 }
 0x682   :  { %6070 = vrcp.f32 %v812_v31 }
 0x683   :  { %6072 = vrcp.f32 %v908_v32 }
 0x68c   :  { %v6071_v33 = vpop.eup %6070 }
 0x68d   :  { %v6073_v35 = vpop.eup %6072  ;;  %v816_v41 = vmul.f32 %v6071_v33, %v6560_v37 }
 0x68e   :  { %v912_v42 = vmul.f32 %v6073_v35, %v6564_v40 }
 0x6f0   :  { %v819_v34 = vpop.permute.xlu0 %818 }
 0x6f1   :  { %v915_v36 = vpop.permute.xlu1 %914  ;;  %v821_v38 = vmul.f32 %v6071_v33, %v819_v34 }
 0x6f2   :  { %v917_v39 = vmul.f32 %v6073_v35, %v915_v36 }
 0x6f3   :  { %823 = vrot.lane.b32.xlu0 %v821_v38, %s6326_s1 }
 0x6f4   :  { %919 = vrot.lane.b32.xlu1 %v917_v39, %s6326_s1 }
 0x765   :  { %v824_v43 = vpop.permute.xlu0 %823 }
 0x766   :  { %v920_v44 = vpop.permute.xlu1 %919  ;;  %v6636_v45 = vadd.f32 %v824_v43, %v816_v41 }
 0x767   :  { %v6638_v46 = vadd.f32 %v920_v44, %v912_v42 }
 0x768   :  { %6074 = vtanh.f32 %v6636_v45 }
 0x769   :  { %6076 = vtanh.f32 %v6638_v46 }
 0x772   :  { %v6075_v47 = vpop.eup %6074 }
 0x773   :  { %v6077_v49 = vpop.eup %6076  ;;  %829 = vrot.lane.b32.xlu0 %v6075_v47, %s6325_s18 }
 0x774   :  { %925 = vrot.lane.b32.xlu1 %v6077_v49, %s6325_s18 }
 0x7e5   :  { %v830_v51 = vpop.permute.xlu0 %829 }
 0x7e6   :  { %v926_v37 = vpop.permute.xlu1 %925  ;;  %v832_v52 = vmul.f32 %v6071_v33, %v830_v51 }
 0x7e7   :  { %v928_v40 = vmul.f32 %v6073_v35, %v926_v37 }
 0x7e8   :  { %930 = vrot.lane.b32.xlu0 %v832_v52, %s6326_s1 }
 0x7e9   :  { %1005 = vrot.lane.b32.xlu1 %v928_v40, %s6326_s1 }
 0x85a   :  { %v931_v54 = vpop.permute.xlu0 %930 }
 0x85b   :  { %v1006_v55 = vpop.permute.xlu1 %1005  ;;  %5263 = vmatmul.mubr.msk.f32.vlgmr.msra.gmra.mrb[18].mxu1 %vm293_vm3, %v931_v54 }
 0x85c   :  { %5274 = vmatmul.mubr.msk.f32.vlgmr.msra.gmra.mrb[12].mxu0 %vm293_vm3, %v1006_v55  ;;  %5780 = vmatpush3.bf16.msra.mxu1 %v6403_v7 }
 0x85d   :  { %5781 = vmatprep.subr.bf16.mxu1 %v6322_v8  ;;  %5284 = vmatprep.mubr.msk.f32.mxu1 %vm6323_vm2, %v6324_v19 }
 0x85e   :  { %5786 = vmatpush3.bf16.msra.mxu0 %v6494_v48  ;;  %5295 = vmatprep.mubr.msk.f32.mxu0 %vm6323_vm2, %v6324_v19 }
 0x85f   :  { %5787 = vmatprep.subr.bf16.mxu0 %v6322_v8 }
 0x860   :  { %5783 = vmatpush3.bf16.msra.mxu1 %v6419_v12 }
 0x861   :  { %5790 = vmatprep.subr.bf16.mxu1 %v6322_v8 }
 0x862   :  { %5789 = vmatpush3.bf16.msra.mxu0 %v6500_v50 }
 0x863   :  { %5285 = vmatmul.mubr.msk.f32.vlgmr.msra.gmra.mrb[20].mxu1 %vm293_vm3, %v1006_v55  ;;  %5796 = vmatprep.subr.bf16.mxu0 %v6322_v8 }
 0x864   :  { %5792 = vmatpush3.bf16.msra.mxu1 %v6512_v53  ;;  %5306 = vmatprep.mubr.msk.f32.mxu1 %vm6323_vm2, %v6324_v19 }
 0x865   :  { %5793 = vmatprep.subr.bf16.mxu1 %v6322_v8 }
 0x868   :  { %5795 = vmatpush3.bf16.msra.mxu1 %v6526_v57 }
 0x869   :  { %5802 = vmatprep.subr.bf16.mxu1 %v6322_v8 }
 0x92e   :  { %v1000_v58 = vpop.f32.mrb[18].mxu1 }
 0x92f   :  { %v1075_v0 = vpop.f32.mrb[12].mxu0  ;;  %v5264_v1 = vpop.f32.mrb[19].mxu1 }
 0x930   :  { %v1076_v2 = vadd.f32 %v1075_v0, %v1000_v58  ;;  %v5275_v3 = vpop.f32.mrb[13].mxu0  ;;  %v218_v0 = vadd.f32 %v6473_v28, %v6601_v60 }
 0x932   :  { %v1079_v4 = vadd.f32 %v6551_v63, %v1076_v2 }
 0x934   :  { %6078 = vtanh.f32 %v1079_v4  ;;  %v4810_v14 = vmul.f32 -1.442695, %v1079_v4 }
 0x936   :  { %v1171_v6 = vpop.f32.mrb[20].mxu1 }
 0x937   :  { %v1175_v9 = vadd.f32 %v1171_v6, %v213_v5  ;;  %v5286_v10 = vpop.f32.mrb[21].mxu1 }
 0x939   :  { %6080 = vtanh.f32 %v1175_v9  ;;  %v4812_v15 = vmul.f32 -1.442695, %v1175_v9 }
 0x93a   :  { %6082 = vpow2.f32 %v4810_v14 }
 0x93b   :  { %6084 = vpow2.f32 %v4812_v15 }
 0x93e   :  { %v6079_v11 = vpop.eup %6078 }
 0x93f   :  { %1089 = vrot.lane.b32.xlu0 %v6079_v11, %s6325_s18 }
 0x943   :  { %v6081_v13 = vpop.eup %6080 }
 0x944   :  { %1185 = vrot.lane.b32.xlu1 %v6081_v13, %s6325_s18  ;;  %v6083_v16 = vpop.eup %6082 }
 0x945   :  { %v1083_v17 = vadd.f32 1.0, %v6083_v16  ;;  %v6085_v18 = vpop.eup %6084 }
 0x946   :  { %v1179_v23 = vadd.f32 1.0, %v6085_v18 }
 0x947   :  { %6086 = vrcp.f32 %v1083_v17 }
 0x948   :  { %6088 = vrcp.f32 %v1179_v23 }
 0x951   :  { %v6087_v56 = vpop.eup %6086 }
 0x952   :  { %v6089_v32 = vpop.eup %6088  ;;  %v1087_v35 = vmul.f32 %v6087_v56, %v6636_v45 }
 0x953   :  { %v1183_v39 = vmul.f32 %v6089_v32, %v6638_v46 }
 0x9b1   :  { %v1090_v25 = vpop.permute.xlu0 %1089 }
 0x9b2   :  { %v1092_v31 = vmul.f32 %v6087_v56, %v1090_v25 }
 0x9b4   :  { %1094 = vrot.lane.b32.xlu0 %v1092_v31, %s6326_s1 }
 0x9b6   :  { %v1186_v33 = vpop.permute.xlu1 %1185 }
 0x9b7   :  { %v1188_v34 = vmul.f32 %v6089_v32, %v1186_v33 }
 0x9b9   :  { %1190 = vrot.lane.b32.xlu1 %v1188_v34, %s6326_s1 }
 0xa26   :  { %v1095_v36 = vpop.permute.xlu0 %1094 }
 0xa27   :  { %v6675_v38 = vadd.f32 %v1095_v36, %v1087_v35 }
 0xa29   :  { %6090 = vtanh.f32 %v6675_v38 }
 0xa2b   :  { %v1191_v41 = vpop.permute.xlu1 %1190 }
 0xa2c   :  { %v6679_v42 = vadd.f32 %v1191_v41, %v1183_v39 }
 0xa2e   :  { %6092 = vtanh.f32 %v6679_v42 }
 0xa33   :  { %v6091_v43 = vpop.eup %6090 }
 0xa34   :  { %1100 = vrot.lane.b32.xlu0 %v6091_v43, %s6325_s18 }
 0xa38   :  { %v6093_v44 = vpop.eup %6092 }
 0xa39   :  { %1196 = vrot.lane.b32.xlu1 %v6093_v44, %s6325_s18 }
 0xaa6   :  { %v1101_v47 = vpop.permute.xlu0 %1100 }
 0xaa7   :  { %v1103_v45 = vmul.f32 %v6087_v56, %v1101_v47 }
 0xaa9   :  { %1201 = vrot.lane.b32.xlu0 %v1103_v45, %s6326_s1 }
 0xaab   :  { %v1197_v49 = vpop.permute.xlu1 %1196 }
 0xaac   :  { %v1199_v51 = vmul.f32 %v6089_v32, %v1197_v49 }
 0xaae   :  { %1276 = vrot.lane.b32.xlu1 %v1199_v51, %s6326_s1 }
 0xb1b   :  { %v1202_v46 = vpop.permute.xlu0 %1201 }
 0xb1c   :  { %5296 = vmatmul.mubr.msk.f32.vlgmr.msra.gmra.mrb[14].mxu0 %vm293_vm3, %v1202_v46 }
 0xb1d   :  { %5798 = vmatpush3.bf16.msra.mxu0 %v6403_v7  ;;  %5317 = vmatprep.mubr.msk.f32.mxu0 %vm6323_vm2, %v6324_v19 }
 0xb1e   :  { %5799 = vmatprep.subr.bf16.mxu0 %v6322_v8 }
 0xb20   :  { %v1277_v37 = vpop.permute.xlu1 %1276 }
 0xb21   :  { %5801 = vmatpush3.bf16.msra.mxu0 %v6419_v12  ;;  %5307 = vmatmul.mubr.msk.f32.vlgmr.msra.gmra.mrb[22].mxu1 %vm293_vm3, %v1277_v37 }
 0xb22   :  { %5804 = vmatpush3.bf16.msra.mxu1 %v6494_v48  ;;  %5808 = vmatprep.subr.bf16.mxu0 %v6322_v8 }
 0xb23   :  { %5805 = vmatprep.subr.bf16.mxu1 %v6322_v8  ;;  %5328 = vmatprep.mubr.msk.f32.mxu1 %vm6323_vm2, %v6324_v19 }
 0xb24   :  { %5318 = vmatmul.mubr.msk.f32.vlgmr.msra.gmra.mrb[16].mxu0 %vm293_vm3, %v1277_v37 }
 0xb25   :  { %5810 = vmatpush3.bf16.msra.mxu0 %v6512_v53  ;;  %5339 = vmatprep.mubr.msk.f32.mxu0 %vm6323_vm2, %v6324_v19 }
 0xb26   :  { %5807 = vmatpush3.bf16.msra.mxu1 %v6500_v50  ;;  %5811 = vmatprep.subr.bf16.mxu0 %v6322_v8 }
 0xb27   :  { %5814 = vmatprep.subr.bf16.mxu1 %v6322_v8 }
 0xb29   :  { %5813 = vmatpush3.bf16.msra.mxu0 %v6526_v57 }
 0xb2a   :  { %5820 = vmatprep.subr.bf16.mxu0 %v6322_v8 }
 0xbef   :  { %v1271_v52 = vpop.f32.mrb[14].mxu0 }
 0xbf0   :  { %v5297_v40 = vpop.f32.mrb[15].mxu0 }
 0xbf1   :  { %v223_v40 = vadd.f32 %v6599_v59, %v6473_v28 }
 0xbf4   :  { %v1346_v54 = vpop.f32.mrb[22].mxu1 }
 0xbf5   :  { %v1347_v55 = vadd.f32 %v1346_v54, %v1271_v52  ;;  %v5308_v58 = vpop.f32.mrb[23].mxu1 }
 0xbf7   :  { %v1350_v1 = vadd.f32 %v6551_v63, %v1347_v55  ;;  %v1442_v2 = vpop.f32.mrb[16].mxu0 }
 0xbf8   :  { %v1446_v3 = vadd.f32 %v1442_v2, %v218_v0  ;;  %v5319_v4 = vpop.f32.mrb[17].mxu0 }
 0xbf9   :  { %6094 = vtanh.f32 %v1350_v1  ;;  %v4815_v9 = vmul.f32 -1.442695, %v1350_v1 }
 0xbfa   :  { %6096 = vtanh.f32 %v1446_v3  ;;  %v4817_v10 = vmul.f32 -1.442695, %v1446_v3 }
 0xbfb   :  { %6098 = vpow2.f32 %v4815_v9 }
 0xbfc   :  { %6100 = vpow2.f32 %v4817_v10 }
 0xc03   :  { %v6095_v5 = vpop.eup %6094 }
 0xc04   :  { %v6097_v6 = vpop.eup %6096  ;;  %1360 = vrot.lane.b32.xlu0 %v6095_v5, %s6325_s18 }
 0xc05   :  { %1456 = vrot.lane.b32.xlu1 %v6097_v6, %s6325_s18  ;;  %v6099_v11 = vpop.eup %6098 }
 0xc06   :  { %v6101_v13 = vpop.eup %6100  ;;  %v1354_v60 = vadd.f32 1.0, %v6099_v11 }
 0xc07   :  { %v1450_v14 = vadd.f32 1.0, %v6101_v13 }
 0xc08   :  { %6102 = vrcp.f32 %v1354_v60 }
 0xc09   :  { %6104 = vrcp.f32 %v1450_v14 }
 0xc12   :  { %v6103_v15 = vpop.eup %6102 }
 0xc13   :  { %v6105_v17 = vpop.eup %6104  ;;  %v1358_v25 = vmul.f32 %v6103_v15, %v6675_v38 }
 0xc14   :  { %v1454_v31 = vmul.f32 %v6105_v17, %v6679_v42 }
 0xc76   :  { %v1361_v16 = vpop.permute.xlu0 %1360 }
 0xc77   :  { %v1457_v18 = vpop.permute.xlu1 %1456  ;;  %v1363_v23 = vmul.f32 %v6103_v15, %v1361_v16 }
 0xc78   :  { %v1459_v56 = vmul.f32 %v6105_v17, %v1457_v18 }
 0xc79   :  { %1365 = vrot.lane.b32.xlu0 %v1363_v23, %s6326_s1 }
 0xc7a   :  { %1461 = vrot.lane.b32.xlu1 %v1459_v56, %s6326_s1 }
 0xceb   :  { %v1366_v32 = vpop.permute.xlu0 %1365 }
 0xcec   :  { %v1462_v33 = vpop.permute.xlu1 %1461  ;;  %v6716_v34 = vadd.f32 %v1366_v32, %v1358_v25 }
 0xced   :  { %v6718_v35 = vadd.f32 %v1462_v33, %v1454_v31 }
 0xcee   :  { %6106 = vtanh.f32 %v6716_v34 }
 0xcef   :  { %6108 = vtanh.f32 %v6718_v35 }
 0xcf8   :  { %v6107_v36 = vpop.eup %6106 }
 0xcf9   :  { %v6109_v39 = vpop.eup %6108  ;;  %1371 = vrot.lane.b32.xlu0 %v6107_v36, %s6325_s18 }
 0xcfa   :  { %1467 = vrot.lane.b32.xlu1 %v6109_v39, %s6325_s18 }
 0xd6b   :  { %v1372_v41 = vpop.permute.xlu0 %1371 }
 0xd6c   :  { %v1468_v38 = vpop.permute.xlu1 %1467  ;;  %v1374_v43 = vmul.f32 %v6103_v15, %v1372_v41 }
 0xd6d   :  { %v1470_v42 = vmul.f32 %v6105_v17, %v1468_v38 }
 0xd6e   :  { %1472 = vrot.lane.b32.xlu0 %v1374_v43, %s6326_s1 }
 0xd6f   :  { %1547 = vrot.lane.b32.xlu1 %v1470_v42, %s6326_s1 }
 0xde0   :  { %v1473_v44 = vpop.permute.xlu0 %1472 }
 0xde1   :  { %v1548_v47 = vpop.permute.xlu1 %1547  ;;  %5329 = vmatmul.mubr.msk.f32.vlgmr.msra.gmra.mrb[24].mxu1 %vm293_vm3, %v1473_v44 }
 0xde2   :  { %5340 = vmatmul.mubr.msk.f32.vlgmr.msra.gmra.mrb[18].mxu0 %vm293_vm3, %v1548_v47  ;;  %5816 = vmatpush3.bf16.msra.mxu1 %v6403_v7 }
 0xde3   :  { %5817 = vmatprep.subr.bf16.mxu1 %v6322_v8  ;;  %5350 = vmatprep.mubr.msk.f32.mxu1 %vm6323_vm2, %v6324_v19 }
 0xde4   :  { %5822 = vmatpush3.bf16.msra.mxu0 %v6494_v48  ;;  %5361 = vmatprep.mubr.msk.f32.mxu0 %vm6323_vm2, %v6324_v19 }
 0xde5   :  { %5823 = vmatprep.subr.bf16.mxu0 %v6322_v8 }
 0xde6   :  { %5819 = vmatpush3.bf16.msra.mxu1 %v6419_v12 }
 0xde7   :  { %5826 = vmatprep.subr.bf16.mxu1 %v6322_v8 }
 0xde8   :  { %5825 = vmatpush3.bf16.msra.mxu0 %v6500_v50 }
 0xde9   :  { %5351 = vmatmul.mubr.msk.f32.vlgmr.msra.gmra.mrb[26].mxu1 %vm293_vm3, %v1548_v47  ;;  %5832 = vmatprep.subr.bf16.mxu0 %v6322_v8  ;;  %v228_v47 = vadd.f32 %v6473_v28, %v6605_v62 }
 0xdea   :  { %5828 = vmatpush3.bf16.msra.mxu1 %v6512_v53  ;;  %5372 = vmatprep.mubr.msk.f32.mxu1 %vm6323_vm2, %v6324_v19 }
 0xdeb   :  { %5829 = vmatprep.subr.bf16.mxu1 %v6322_v8 }
 0xdee   :  { %5831 = vmatpush3.bf16.msra.mxu1 %v6526_v57 }
 0xdef   :  { %5838 = vmatprep.subr.bf16.mxu1 %v6322_v8 }
 0xeb4   :  { %v1542_v45 = vpop.f32.mrb[24].mxu1 }
 0xeb5   :  { %v1617_v49 = vpop.f32.mrb[18].mxu0  ;;  %v5330_v51 = vpop.f32.mrb[25].mxu1 }
 0xeb6   :  { %v1618_v46 = vadd.f32 %v1617_v49, %v1542_v45  ;;  %v5341_v37 = vpop.f32.mrb[19].mxu0 }
 0xeb8   :  { %v1621_v52 = vadd.f32 %v6551_v63, %v1618_v46 }
 0xeba   :  { %6110 = vtanh.f32 %v1621_v52  ;;  %v4820_v2 = vmul.f32 -1.442695, %v1621_v52 }
 0xebc   :  { %v1713_v54 = vpop.f32.mrb[26].mxu1 }
 0xebd   :  { %v1717_v55 = vadd.f32 %v1713_v54, %v223_v40  ;;  %v5352_v58 = vpop.f32.mrb[27].mxu1 }
 0xebf   :  { %6112 = vtanh.f32 %v1717_v55  ;;  %v4822_v3 = vmul.f32 -1.442695, %v1717_v55 }
 0xec0   :  { %6114 = vpow2.f32 %v4820_v2 }
 0xec1   :  { %6116 = vpow2.f32 %v4822_v3 }
 0xec4   :  { %v6111_v0 = vpop.eup %6110 }
 0xec5   :  { %1631 = vrot.lane.b32.xlu0 %v6111_v0, %s6325_s18 }
 0xec9   :  { %v6113_v1 = vpop.eup %6112 }
 0xeca   :  { %1727 = vrot.lane.b32.xlu1 %v6113_v1, %s6325_s18  ;;  %v6115_v4 = vpop.eup %6114 }
 0xecb   :  { %v1625_v5 = vadd.f32 1.0, %v6115_v4  ;;  %v6117_v6 = vpop.eup %6116 }
 0xecc   :  { %v1721_v9 = vadd.f32 1.0, %v6117_v6 }
 0xecd   :  { %6118 = vrcp.f32 %v1625_v5 }
 0xece   :  { %6120 = vrcp.f32 %v1721_v9 }
 0xed7   :  { %v6119_v59 = vpop.eup %6118 }
 0xed8   :  { %v6121_v13 = vpop.eup %6120  ;;  %v1629_v15 = vmul.f32 %v6119_v59, %v6716_v34 }
 0xed9   :  { %v1725_v18 = vmul.f32 %v6121_v13, %v6718_v35 }
 0xf37   :  { %v1632_v10 = vpop.permute.xlu0 %1631 }
 0xf38   :  { %v1634_v11 = vmul.f32 %v6119_v59, %v1632_v10 }
 0xf3a   :  { %1636 = vrot.lane.b32.xlu0 %v1634_v11, %s6326_s1 }
 0xf3c   :  { %v1728_v60 = vpop.permute.xlu1 %1727 }
 0xf3d   :  { %v1730_v14 = vmul.f32 %v6121_v13, %v1728_v60 }
 0xf3f   :  { %1732 = vrot.lane.b32.xlu1 %v1730_v14, %s6326_s1 }
 0xfac   :  { %v1637_v16 = vpop.permute.xlu0 %1636 }
 0xfad   :  { %v6755_v17 = vadd.f32 %v1637_v16, %v1629_v15 }
 0xfaf   :  { %6122 = vtanh.f32 %v6755_v17 }
 0xfb1   :  { %v1733_v23 = vpop.permute.xlu1 %1732 }
 0xfb2   :  { %v6759_v56 = vadd.f32 %v1733_v23, %v1725_v18 }
 0xfb4   :  { %6124 = vtanh.f32 %v6759_v56 }
 0xfb9   :  { %v6123_v25 = vpop.eup %6122 }
 0xfba   :  { %1642 = vrot.lane.b32.xlu0 %v6123_v25, %s6325_s18 }
 0xfbe   :  { %v6125_v31 = vpop.eup %6124 }
 0xfbf   :  { %1738 = vrot.lane.b32.xlu1 %v6125_v31, %s6325_s18 }
0x102c   :  { %v1643_v32 = vpop.permute.xlu0 %1642 }
0x102d   :  { %v1645_v33 = vmul.f32 %v6119_v59, %v1643_v32 }
0x102f   :  { %1743 = vrot.lane.b32.xlu0 %v1645_v33, %s6326_s1 }
0x1031   :  { %v1739_v34 = vpop.permute.xlu1 %1738 }
0x1032   :  { %v1741_v36 = vmul.f32 %v6121_v13, %v1739_v34 }
0x1034   :  { %1818 = vrot.lane.b32.xlu1 %v1741_v36, %s6326_s1 }
0x10a1   :  { %v1744_v35 = vpop.permute.xlu0 %1743 }
0x10a2   :  { %5362 = vmatmul.mubr.msk.f32.vlgmr.msra.gmra.mrb[20].mxu0 %vm293_vm3, %v1744_v35  ;;  %v6831_v35 = vld [vmem:[%s7226_s3] ss:$0 sm:$0xff] }
0x10a3   :  { %5834 = vmatpush3.bf16.msra.mxu0 %v6403_v7  ;;  %5383 = vmatprep.mubr.msk.f32.mxu0 %vm6323_vm2, %v6324_v19 }
0x10a4   :  { %5835 = vmatprep.subr.bf16.mxu0 %v6322_v8 }
0x10a6   :  { %v1819_v39 = vpop.permute.xlu1 %1818 }
0x10a7   :  { %5837 = vmatpush3.bf16.msra.mxu0 %v6419_v12  ;;  %5373 = vmatmul.mubr.msk.f32.vlgmr.msra.gmra.mrb[28].mxu1 %vm293_vm3, %v1819_v39 }
0x10a8   :  { %5840 = vmatpush3.bf16.msra.mxu1 %v6494_v48  ;;  %5844 = vmatprep.subr.bf16.mxu0 %v6322_v8 }
0x10a9   :  { %5841 = vmatprep.subr.bf16.mxu1 %v6322_v8  ;;  %5394 = vmatprep.mubr.msk.f32.mxu1 %vm6323_vm2, %v6324_v19 }
0x10aa   :  { %5384 = vmatmul.mubr.msk.f32.vlgmr.msra.gmra.mrb[22].mxu0 %vm293_vm3, %v1819_v39  ;;  %v233_v39 = vadd.f32 %v6831_v35, %v6603_v61 }
0x10ab   :  { %5846 = vmatpush3.bf16.msra.mxu0 %v6512_v53  ;;  %5405 = vmatprep.mubr.msk.f32.mxu0 %vm6323_vm2, %v6324_v19 }
0x10ac   :  { %5843 = vmatpush3.bf16.msra.mxu1 %v6500_v50  ;;  %5847 = vmatprep.subr.bf16.mxu0 %v6322_v8 }
0x10ad   :  { %5850 = vmatprep.subr.bf16.mxu1 %v6322_v8 }
0x10af   :  { %5849 = vmatpush3.bf16.msra.mxu0 %v6526_v57 }
0x10b0   :  { %5856 = vmatprep.subr.bf16.mxu0 %v6322_v8 }
0x1175   :  { %v1813_v41 = vpop.f32.mrb[20].mxu0 }
0x1176   :  { %v5363_v38 = vpop.f32.mrb[21].mxu0 }
0x117a   :  { %v1888_v43 = vpop.f32.mrb[28].mxu1 }
0x117b   :  { %v1889_v42 = vadd.f32 %v1888_v43, %v1813_v41  ;;  %v5374_v44 = vpop.f32.mrb[29].mxu1 }
0x117d   :  { %v1892_v45 = vadd.f32 %v6551_v63, %v1889_v42  ;;  %v1984_v49 = vpop.f32.mrb[22].mxu0 }
0x117e   :  { %v1988_v51 = vadd.f32 %v1984_v49, %v228_v47  ;;  %v5385_v46 = vpop.f32.mrb[23].mxu0 }
0x117f   :  { %6126 = vtanh.f32 %v1892_v45  ;;  %v4825_v40 = vmul.f32 -1.442695, %v1892_v45 }
0x1180   :  { %6128 = vtanh.f32 %v1988_v51  ;;  %v4827_v54 = vmul.f32 -1.442695, %v1988_v51 }
0x1181   :  { %6130 = vpow2.f32 %v4825_v40 }
0x1182   :  { %6132 = vpow2.f32 %v4827_v54 }
0x1189   :  { %v6127_v37 = vpop.eup %6126 }
0x118a   :  { %v6129_v52 = vpop.eup %6128  ;;  %1902 = vrot.lane.b32.xlu0 %v6127_v37, %s6325_s18 }
0x118b   :  { %1998 = vrot.lane.b32.xlu1 %v6129_v52, %s6325_s18  ;;  %v6131_v55 = vpop.eup %6130 }
0x118c   :  { %v6133_v58 = vpop.eup %6132  ;;  %v1896_v28 = vadd.f32 1.0, %v6131_v55 }
0x118d   :  { %v1992_v62 = vadd.f32 1.0, %v6133_v58 }
0x118e   :  { %6134 = vrcp.f32 %v1896_v28 }
0x118f   :  { %6136 = vrcp.f32 %v1992_v62 }
0x1198   :  { %v6135_v0 = vpop.eup %6134 }
0x1199   :  { %v6137_v2 = vpop.eup %6136  ;;  %v1900_v6 = vmul.f32 %v6135_v0, %v6755_v17 }
0x119a   :  { %v1996_v9 = vmul.f32 %v6137_v2, %v6759_v56 }
0x11fc   :  { %v1903_v1 = vpop.permute.xlu0 %1902 }
0x11fd   :  { %v1999_v3 = vpop.permute.xlu1 %1998  ;;  %v1905_v4 = vmul.f32 %v6135_v0, %v1903_v1 }
0x11fe   :  { %v2001_v5 = vmul.f32 %v6137_v2, %v1999_v3 }
0x11ff   :  { %1907 = vrot.lane.b32.xlu0 %v1905_v4, %s6326_s1 }
0x1200   :  { %2003 = vrot.lane.b32.xlu1 %v2001_v5, %s6326_s1 }
0x1271   :  { %v1908_v59 = vpop.permute.xlu0 %1907 }
0x1272   :  { %v2004_v10 = vpop.permute.xlu1 %2003  ;;  %v6796_v11 = vadd.f32 %v1908_v59, %v1900_v6 }
0x1273   :  { %v6798_v13 = vadd.f32 %v2004_v10, %v1996_v9 }
0x1274   :  { %6138 = vtanh.f32 %v6796_v11 }
0x1275   :  { %6140 = vtanh.f32 %v6798_v13 }
0x127e   :  { %v6139_v60 = vpop.eup %6138 }
0x127f   :  { %v6141_v14 = vpop.eup %6140  ;;  %1913 = vrot.lane.b32.xlu0 %v6139_v60, %s6325_s18 }
0x1280   :  { %2009 = vrot.lane.b32.xlu1 %v6141_v14, %s6325_s18 }
0x12f1   :  { %v1914_v15 = vpop.permute.xlu0 %1913 }
0x12f2   :  { %v2010_v16 = vpop.permute.xlu1 %2009  ;;  %v1916_v17 = vmul.f32 %v6135_v0, %v1914_v15 }
0x12f3   :  { %v2012_v18 = vmul.f32 %v6137_v2, %v2010_v16 }
0x12f4   :  { %2014 = vrot.lane.b32.xlu0 %v1916_v17, %s6326_s1  ;;  %v238_v17 = vadd.f32 %v6831_v35, %v6458_v21 }
0x12f5   :  { %2089 = vrot.lane.b32.xlu1 %v2012_v18, %s6326_s1  ;;  %v6877_v18 = vld [vmem:[%s7229_s6] ss:$0 sm:$0xff] }
0x1366   :  { %v2015_v23 = vpop.permute.xlu0 %2014 }
0x1367   :  { %v2090_v56 = vpop.permute.xlu1 %2089  ;;  %5395 = vmatmul.mubr.msk.f32.vlgmr.msra.gmra.mrb[30].mxu1 %vm293_vm3, %v2015_v23 }
0x1368   :  { %5406 = vmatmul.mubr.msk.f32.vlgmr.msra.gmra.mrb[24].mxu0 %vm293_vm3, %v2090_v56  ;;  %5852 = vmatpush3.bf16.msra.mxu1 %v6403_v7 }
0x1369   :  { %5853 = vmatprep.subr.bf16.mxu1 %v6322_v8  ;;  %5416 = vmatprep.mubr.msk.f32.mxu1 %vm6323_vm2, %v6324_v19 }
0x136a   :  { %5858 = vmatpush3.bf16.msra.mxu0 %v6494_v48  ;;  %5427 = vmatprep.mubr.msk.f32.mxu0 %vm6323_vm2, %v6324_v19 }
0x136b   :  { %5859 = vmatprep.subr.bf16.mxu0 %v6322_v8 }
0x136c   :  { %5855 = vmatpush3.bf16.msra.mxu1 %v6419_v12 }
0x136d   :  { %5862 = vmatprep.subr.bf16.mxu1 %v6322_v8 }
0x136e   :  { %5861 = vmatpush3.bf16.msra.mxu0 %v6500_v50 }
0x136f   :  { %5417 = vmatmul.mubr.msk.f32.vlgmr.msra.gmra.mrb[32].mxu1 %vm293_vm3, %v2090_v56  ;;  %5868 = vmatprep.subr.bf16.mxu0 %v6322_v8 }
0x1370   :  { %5864 = vmatpush3.bf16.msra.mxu1 %v6512_v53  ;;  %5438 = vmatprep.mubr.msk.f32.mxu1 %vm6323_vm2, %v6324_v19 }
0x1371   :  { %5865 = vmatprep.subr.bf16.mxu1 %v6322_v8 }
0x1374   :  { %5867 = vmatpush3.bf16.msra.mxu1 %v6526_v57 }
0x1375   :  { %5874 = vmatprep.subr.bf16.mxu1 %v6322_v8 }
0x143a   :  { %v2084_v25 = vpop.f32.mrb[30].mxu1 }
0x143b   :  { %v2159_v31 = vpop.f32.mrb[24].mxu0  ;;  %v5396_v32 = vpop.f32.mrb[31].mxu1 }
0x143c   :  { %v2160_v33 = vadd.f32 %v2159_v31, %v2084_v25  ;;  %v5407_v34 = vpop.f32.mrb[25].mxu0 }
0x143e   :  { %v2163_v36 = vadd.f32 %v6551_v63, %v2160_v33 }
0x1440   :  { %6142 = vtanh.f32 %v2163_v36  ;;  %v4830_v63 = vmul.f32 -1.442695, %v2163_v36 }
0x1442   :  { %v2255_v41 = vpop.f32.mrb[32].mxu1 }
0x1443   :  { %v2259_v38 = vadd.f32 %v2255_v41, %v233_v39  ;;  %v5418_v43 = vpop.f32.mrb[33].mxu1 }
0x1445   :  { %6144 = vtanh.f32 %v2259_v38  ;;  %v4832_v47 = vmul.f32 -1.442695, %v2259_v38 }
0x1446   :  { %6146 = vpow2.f32 %v4830_v63 }
0x1447   :  { %6148 = vpow2.f32 %v4832_v47 }
0x144a   :  { %v6143_v42 = vpop.eup %6142 }
0x144b   :  { %2173 = vrot.lane.b32.xlu0 %v6143_v42, %s6325_s18 }
0x144f   :  { %v6145_v44 = vpop.eup %6144 }
0x1450   :  { %2269 = vrot.lane.b32.xlu1 %v6145_v44, %s6325_s18  ;;  %v6147_v45 = vpop.eup %6146 }
0x1451   :  { %v2167_v49 = vadd.f32 1.0, %v6147_v45  ;;  %v6149_v51 = vpop.eup %6148 }
0x1452   :  { %v2263_v46 = vadd.f32 1.0, %v6149_v51 }
0x1453   :  { %6150 = vrcp.f32 %v2167_v49 }
0x1454   :  { %6152 = vrcp.f32 %v2263_v46 }
0x145d   :  { %v6151_v61 = vpop.eup %6150 }
0x145e   :  { %v6153_v40 = vpop.eup %6152  ;;  %v2171_v58 = vmul.f32 %v6151_v61, %v6796_v11 }
0x145f   :  { %v2267_v0 = vmul.f32 %v6153_v40, %v6798_v13 }
0x14bd   :  { %v2174_v37 = vpop.permute.xlu0 %2173 }
0x14be   :  { %v2176_v52 = vmul.f32 %v6151_v61, %v2174_v37 }
0x14c0   :  { %2178 = vrot.lane.b32.xlu0 %v2176_v52, %s6326_s1 }
0x14c2   :  { %v2270_v54 = vpop.permute.xlu1 %2269 }
0x14c3   :  { %v2272_v55 = vmul.f32 %v6153_v40, %v2270_v54 }
0x14c5   :  { %2274 = vrot.lane.b32.xlu1 %v2272_v55, %s6326_s1 }
0x1532   :  { %v2179_v28 = vpop.permute.xlu0 %2178 }
0x1533   :  { %v6840_v62 = vadd.f32 %v2179_v28, %v2171_v58 }
0x1535   :  { %6154 = vtanh.f32 %v6840_v62 }
0x1537   :  { %v2275_v1 = vpop.permute.xlu1 %2274 }
0x1538   :  { %v6844_v2 = vadd.f32 %v2275_v1, %v2267_v0 }
0x153a   :  { %6156 = vtanh.f32 %v6844_v2 }
0x153f   :  { %v6155_v3 = vpop.eup %6154 }
0x1540   :  { %2184 = vrot.lane.b32.xlu0 %v6155_v3, %s6325_s18 }
0x1544   :  { %v6157_v4 = vpop.eup %6156 }
0x1545   :  { %2280 = vrot.lane.b32.xlu1 %v6157_v4, %s6325_s18 }
0x15b2   :  { %v2185_v5 = vpop.permute.xlu0 %2184 }
0x15b3   :  { %v2187_v6 = vmul.f32 %v6151_v61, %v2185_v5 }
0x15b5   :  { %2285 = vrot.lane.b32.xlu0 %v2187_v6, %s6326_s1 }
0x15b7   :  { %v2281_v9 = vpop.permute.xlu1 %2280 }
0x15b8   :  { %v2283_v59 = vmul.f32 %v6153_v40, %v2281_v9 }
0x15ba   :  { %2360 = vrot.lane.b32.xlu1 %v2283_v59, %s6326_s1  ;;  %v243_v59 = vadd.f32 %v6831_v35, %v6456_v20 }
0x1627   :  { %v2286_v10 = vpop.permute.xlu0 %2285 }
0x1628   :  { %5428 = vmatmul.mubr.msk.f32.vlgmr.msra.gmra.mrb[26].mxu0 %vm293_vm3, %v2286_v10 }
0x1629   :  { %5870 = vmatpush3.bf16.msra.mxu0 %v6403_v7  ;;  %5449 = vmatprep.mubr.msk.f32.mxu0 %vm6323_vm2, %v6324_v19 }
0x162a   :  { %5871 = vmatprep.subr.bf16.mxu0 %v6322_v8 }
0x162c   :  { %v2361_v11 = vpop.permute.xlu1 %2360 }
0x162d   :  { %5873 = vmatpush3.bf16.msra.mxu0 %v6419_v12  ;;  %5439 = vmatmul.mubr.msk.f32.vlgmr.msra.gmra.mrb[34].mxu1 %vm293_vm3, %v2361_v11 }
0x162e   :  { %5876 = vmatpush3.bf16.msra.mxu1 %v6494_v48  ;;  %5880 = vmatprep.subr.bf16.mxu0 %v6322_v8 }
0x162f   :  { %5877 = vmatprep.subr.bf16.mxu1 %v6322_v8  ;;  %5460 = vmatprep.mubr.msk.f32.mxu1 %vm6323_vm2, %v6324_v19 }
0x1630   :  { %5450 = vmatmul.mubr.msk.f32.vlgmr.msra.gmra.mrb[28].mxu0 %vm293_vm3, %v2361_v11 }
0x1631   :  { %5882 = vmatpush3.bf16.msra.mxu0 %v6512_v53  ;;  %5471 = vmatprep.mubr.msk.f32.mxu0 %vm6323_vm2, %v6324_v19 }
0x1632   :  { %5879 = vmatpush3.bf16.msra.mxu1 %v6500_v50  ;;  %5883 = vmatprep.subr.bf16.mxu0 %v6322_v8 }
0x1633   :  { %5886 = vmatprep.subr.bf16.mxu1 %v6322_v8 }
0x1635   :  { %5885 = vmatpush3.bf16.msra.mxu0 %v6526_v57 }
0x1636   :  { %5892 = vmatprep.subr.bf16.mxu0 %v6322_v8 }
0x16fb   :  { %v2355_v13 = vpop.f32.mrb[26].mxu0 }
0x16fc   :  { %v5429_v60 = vpop.f32.mrb[27].mxu0 }
0x1700   :  { %v2430_v14 = vpop.f32.mrb[34].mxu1 }
0x1701   :  { %v2431_v15 = vadd.f32 %v2430_v14, %v2355_v13  ;;  %v5440_v16 = vpop.f32.mrb[35].mxu1 }
0x1703   :  { %v2434_v23 = vadd.f32 %v6877_v18, %v2431_v15  ;;  %v2526_v56 = vpop.f32.mrb[28].mxu0 }
0x1704   :  { %v2530_v25 = vadd.f32 %v2526_v56, %v238_v17  ;;  %v5451_v31 = vpop.f32.mrb[29].mxu0 }
0x1705   :  { %6158 = vtanh.f32 %v2434_v23  ;;  %v4835_v34 = vmul.f32 -1.442695, %v2434_v23 }
0x1706   :  { %6160 = vtanh.f32 %v2530_v25  ;;  %v4837_v21 = vmul.f32 -1.442695, %v2530_v25 }
0x1707   :  { %6162 = vpow2.f32 %v4835_v34 }
0x1708   :  { %6164 = vpow2.f32 %v4837_v21 }
0x170f   :  { %v6159_v32 = vpop.eup %6158 }
0x1710   :  { %v6161_v33 = vpop.eup %6160  ;;  %2444 = vrot.lane.b32.xlu0 %v6159_v32, %s6325_s18 }
0x1711   :  { %2540 = vrot.lane.b32.xlu1 %v6161_v33, %s6325_s18  ;;  %v6163_v36 = vpop.eup %6162 }
0x1712   :  { %v6165_v39 = vpop.eup %6164  ;;  %v2438_v41 = vadd.f32 1.0, %v6163_v36 }
0x1713   :  { %v2534_v38 = vadd.f32 1.0, %v6165_v39 }
0x1714   :  { %6166 = vrcp.f32 %v2438_v41 }
0x1715   :  { %6168 = vrcp.f32 %v2534_v38 }
0x171e   :  { %v6167_v43 = vpop.eup %6166 }
0x171f   :  { %v6169_v44 = vpop.eup %6168  ;;  %v2442_v49 = vmul.f32 %v6167_v43, %v6840_v62 }
0x1720   :  { %v2538_v51 = vmul.f32 %v6169_v44, %v6844_v2 }
0x1782   :  { %v2445_v42 = vpop.permute.xlu0 %2444 }
0x1783   :  { %v2541_v63 = vpop.permute.xlu1 %2540  ;;  %v2447_v47 = vmul.f32 %v6167_v43, %v2445_v42 }
0x1784   :  { %v2543_v45 = vmul.f32 %v6169_v44, %v2541_v63 }
0x1785   :  { %2449 = vrot.lane.b32.xlu0 %v2447_v47, %s6326_s1 }
0x1786   :  { %2545 = vrot.lane.b32.xlu1 %v2543_v45, %s6326_s1 }
0x17f7   :  { %v2450_v46 = vpop.permute.xlu0 %2449 }
0x17f8   :  { %v2546_v61 = vpop.permute.xlu1 %2545  ;;  %v6886_v37 = vadd.f32 %v2450_v46, %v2442_v49 }
0x17f9   :  { %v6888_v52 = vadd.f32 %v2546_v61, %v2538_v51 }
0x17fa   :  { %6170 = vtanh.f32 %v6886_v37 }
0x17fb   :  { %6172 = vtanh.f32 %v6888_v52 }
0x1804   :  { %v6171_v40 = vpop.eup %6170 }
0x1805   :  { %v6173_v54 = vpop.eup %6172  ;;  %2455 = vrot.lane.b32.xlu0 %v6171_v40, %s6325_s18 }
0x1806   :  { %2551 = vrot.lane.b32.xlu1 %v6173_v54, %s6325_s18 }
0x1877   :  { %v2456_v55 = vpop.permute.xlu0 %2455 }
0x1878   :  { %v2552_v58 = vpop.permute.xlu1 %2551  ;;  %v2458_v28 = vmul.f32 %v6167_v43, %v2456_v55 }
0x1879   :  { %v2554_v62 = vmul.f32 %v6169_v44, %v2552_v58  ;;  %v248_v58 = vadd.f32 %v6831_v35, %v6464_v24 }
0x187a   :  { %2556 = vrot.lane.b32.xlu0 %v2458_v28, %s6326_s1 }
0x187b   :  { %2631 = vrot.lane.b32.xlu1 %v2554_v62, %s6326_s1 }
0x18ec   :  { %v2557_v0 = vpop.permute.xlu0 %2556 }
0x18ed   :  { %v2632_v1 = vpop.permute.xlu1 %2631  ;;  %5461 = vmatmul.mubr.msk.f32.vlgmr.msra.gmra.mrb[36].mxu1 %vm293_vm3, %v2557_v0 }
0x18ee   :  { %5472 = vmatmul.mubr.msk.f32.vlgmr.msra.gmra.mrb[30].mxu0 %vm293_vm3, %v2632_v1  ;;  %5888 = vmatpush3.bf16.msra.mxu1 %v6403_v7 }
0x18ef   :  { %5889 = vmatprep.subr.bf16.mxu1 %v6322_v8  ;;  %5482 = vmatprep.mubr.msk.f32.mxu1 %vm6323_vm2, %v6324_v19 }
0x18f0   :  { %5894 = vmatpush3.bf16.msra.mxu0 %v6494_v48  ;;  %5493 = vmatprep.mubr.msk.f32.mxu0 %vm6323_vm2, %v6324_v19 }
0x18f1   :  { %5895 = vmatprep.subr.bf16.mxu0 %v6322_v8 }
0x18f2   :  { %5891 = vmatpush3.bf16.msra.mxu1 %v6419_v12 }
0x18f3   :  { %5898 = vmatprep.subr.bf16.mxu1 %v6322_v8 }
0x18f4   :  { %5897 = vmatpush3.bf16.msra.mxu0 %v6500_v50 }
0x18f5   :  { %5483 = vmatmul.mubr.msk.f32.vlgmr.msra.gmra.mrb[38].mxu1 %vm293_vm3, %v2632_v1  ;;  %5904 = vmatprep.subr.bf16.mxu0 %v6322_v8 }
0x18f6   :  { %5900 = vmatpush3.bf16.msra.mxu1 %v6512_v53  ;;  %5504 = vmatprep.mubr.msk.f32.mxu1 %vm6323_vm2, %v6324_v19 }
0x18f7   :  { %5901 = vmatprep.subr.bf16.mxu1 %v6322_v8 }
0x18fa   :  { %5903 = vmatpush3.bf16.msra.mxu1 %v6526_v57 }
0x18fb   :  { %5910 = vmatprep.subr.bf16.mxu1 %v6322_v8 }
0x19c0   :  { %v2626_v2 = vpop.f32.mrb[36].mxu1 }
0x19c1   :  { %v2701_v3 = vpop.f32.mrb[30].mxu0  ;;  %v5462_v4 = vpop.f32.mrb[37].mxu1 }
0x19c2   :  { %v2702_v5 = vadd.f32 %v2701_v3, %v2626_v2  ;;  %v5473_v6 = vpop.f32.mrb[31].mxu0 }
0x19c4   :  { %v2705_v9 = vadd.f32 %v6877_v18, %v2702_v5 }
0x19c6   :  { %6174 = vtanh.f32 %v2705_v9  ;;  %v4840_v15 = vmul.f32 -1.442695, %v2705_v9 }
0x19c8   :  { %v2802_v10 = vpop.f32.mrb[38].mxu1 }
0x19c9   :  { %v2806_v11 = vadd.f32 %v2802_v10, %v243_v59  ;;  %v5484_v13 = vpop.f32.mrb[39].mxu1 }
0x19cb   :  { %6176 = vtanh.f32 %v2806_v11  ;;  %v4842_v16 = vmul.f32 -1.442695, %v2806_v11 }
0x19cc   :  { %6178 = vpow2.f32 %v4840_v15 }
0x19cd   :  { %6180 = vpow2.f32 %v4842_v16 }
0x19d0   :  { %v6175_v60 = vpop.eup %6174 }
0x19d1   :  { %2715 = vrot.lane.b32.xlu0 %v6175_v60, %s6325_s18 }
0x19d5   :  { %v6177_v14 = vpop.eup %6176 }
0x19d6   :  { %2816 = vrot.lane.b32.xlu1 %v6177_v14, %s6325_s18  ;;  %v6179_v17 = vpop.eup %6178 }
0x19d7   :  { %v2709_v23 = vadd.f32 1.0, %v6179_v17  ;;  %v6181_v56 = vpop.eup %6180 }
0x19d8   :  { %v2810_v25 = vadd.f32 1.0, %v6181_v56 }
0x19d9   :  { %6182 = vrcp.f32 %v2709_v23 }
0x19da   :  { %6184 = vrcp.f32 %v2810_v25 }
0x19e3   :  { %v6183_v20 = vpop.eup %6182 }
0x19e4   :  { %v6185_v33 = vpop.eup %6184  ;;  %v2713_v36 = vmul.f32 %v6183_v20, %v6886_v37 }
0x19e5   :  { %v2814_v38 = vmul.f32 %v6185_v33, %v6888_v52 }
0x1a43   :  { %v2716_v31 = vpop.permute.xlu0 %2715 }
0x1a44   :  { %v2718_v32 = vmul.f32 %v6183_v20, %v2716_v31 }
0x1a46   :  { %2720 = vrot.lane.b32.xlu0 %v2718_v32, %s6326_s1 }
0x1a48   :  { %v2817_v34 = vpop.permute.xlu1 %2816 }
0x1a49   :  { %v2819_v21 = vmul.f32 %v6185_v33, %v2817_v34 }
0x1a4b   :  { %2821 = vrot.lane.b32.xlu1 %v2819_v21, %s6326_s1 }
0x1ab8   :  { %v2721_v39 = vpop.permute.xlu0 %2720 }
0x1ab9   :  { %v6925_v41 = vadd.f32 %v2721_v39, %v2713_v36 }
0x1abb   :  { %6186 = vtanh.f32 %v6925_v41 }
0x1abd   :  { %v2822_v43 = vpop.permute.xlu1 %2821 }
0x1abe   :  { %v6929_v42 = vadd.f32 %v2822_v43, %v2814_v38 }
0x1ac0   :  { %6188 = vtanh.f32 %v6929_v42 }
0x1ac5   :  { %v6187_v44 = vpop.eup %6186 }
0x1ac6   :  { %2726 = vrot.lane.b32.xlu0 %v6187_v44, %s6325_s18 }
0x1aca   :  { %v6189_v63 = vpop.eup %6188 }
0x1acb   :  { %2827 = vrot.lane.b32.xlu1 %v6189_v63, %s6325_s18 }
0x1b38   :  { %v2727_v47 = vpop.permute.xlu0 %2726 }
0x1b39   :  { %v2729_v45 = vmul.f32 %v6183_v20, %v2727_v47 }
0x1b3b   :  { %2731 = vrot.lane.b32.xlu0 %v2729_v45, %s6326_s1  ;;  %v253_v45 = vadd.f32 %v6831_v35, %v6460_v22 }
0x1b3d   :  { %v2828_v49 = vpop.permute.xlu1 %2827 }
0x1b3e   :  { %v2830_v51 = vmul.f32 %v6185_v33, %v2828_v49 }
0x1b40   :  { %2904 = vrot.lane.b32.xlu1 %v2830_v51, %s6326_s1 }
0x1bad   :  { %v2732_v46 = vpop.permute.xlu0 %2731 }
0x1bae   :  { %2734 = vst.msk [vmem:[#allocation3] sm:$0xff] %vm293_vm3, %v2732_v46  ;;  %5494 = vmatmul.mubr.msk.f32.vlgmr.msra.gmra.mrb[32].mxu0 %vm293_vm3, %v2732_v46 }
0x1baf   :  { %5906 = vmatpush3.bf16.msra.mxu0 %v6403_v7  ;;  %5515 = vmatprep.mubr.msk.f32.mxu0 %vm6323_vm2, %v6324_v19 }
0x1bb0   :  { %5907 = vmatprep.subr.bf16.mxu0 %v6322_v8 }
0x1bb2   :  { %v2905_v61 = vpop.permute.xlu1 %2904 }
0x1bb3   :  { %5909 = vmatpush3.bf16.msra.mxu0 %v6419_v12  ;;  %5505 = vmatmul.mubr.msk.f32.vlgmr.msra.gmra.mrb[40].mxu1 %vm293_vm3, %v2905_v61 }
0x1bb4   :  { %5912 = vmatpush3.bf16.msra.mxu1 %v6494_v48  ;;  %5916 = vmatprep.subr.bf16.mxu0 %v6322_v8 }
0x1bb5   :  { %5913 = vmatprep.subr.bf16.mxu1 %v6322_v8  ;;  %5526 = vmatprep.mubr.msk.f32.mxu1 %vm6323_vm2, %v6324_v19 }
0x1bb6   :  { %5516 = vmatmul.mubr.msk.f32.vlgmr.msra.gmra.mrb[34].mxu0 %vm293_vm3, %v2905_v61 }
0x1bb7   :  { %5918 = vmatpush3.bf16.msra.mxu0 %v6512_v53  ;;  %5537 = vmatprep.mubr.msk.f32.mxu0 %vm6323_vm2, %v6324_v19 }
0x1bb8   :  { %5915 = vmatpush3.bf16.msra.mxu1 %v6500_v50  ;;  %5919 = vmatprep.subr.bf16.mxu0 %v6322_v8 }
0x1bb9   :  { %5922 = vmatprep.subr.bf16.mxu1 %v6322_v8 }
0x1bbb   :  { %5921 = vmatpush3.bf16.msra.mxu0 %v6526_v57 }
0x1bbc   :  { %5928 = vmatprep.subr.bf16.mxu0 %v6322_v8 }
0x1c81   :  { %v2899_v37 = vpop.f32.mrb[32].mxu0 }
0x1c82   :  { %v5495_v52 = vpop.f32.mrb[33].mxu0 }
0x1c86   :  { %v2974_v40 = vpop.f32.mrb[40].mxu1 }
0x1c87   :  { %v2975_v54 = vadd.f32 %v2974_v40, %v2899_v37  ;;  %v5506_v55 = vpop.f32.mrb[41].mxu1 }
0x1c89   :  { %v2978_v28 = vadd.f32 %v6877_v18, %v2975_v54  ;;  %v3075_v62 = vpop.f32.mrb[34].mxu0 }
0x1c8a   :  { %v3079_v0 = vadd.f32 %v3075_v62, %v248_v58  ;;  %v5517_v1 = vpop.f32.mrb[35].mxu0 }
0x1c8b   :  { %6190 = vtanh.f32 %v2978_v28  ;;  %v4845_v4 = vmul.f32 -1.442695, %v2978_v28 }
0x1c8c   :  { %6192 = vtanh.f32 %v3079_v0  ;;  %v4847_v5 = vmul.f32 -1.442695, %v3079_v0 }
0x1c8d   :  { %6194 = vpow2.f32 %v4845_v4 }
0x1c8e   :  { %6196 = vpow2.f32 %v4847_v5 }
0x1c95   :  { %v6191_v2 = vpop.eup %6190 }
0x1c96   :  { %v6193_v3 = vpop.eup %6192  ;;  %2988 = vrot.lane.b32.xlu0 %v6191_v2, %s6325_s18 }
0x1c97   :  { %3089 = vrot.lane.b32.xlu1 %v6193_v3, %s6325_s18  ;;  %v6195_v6 = vpop.eup %6194 }
0x1c98   :  { %v6197_v9 = vpop.eup %6196  ;;  %v2982_v24 = vadd.f32 1.0, %v6195_v6 }
0x1c99   :  { %v3083_v59 = vadd.f32 1.0, %v6197_v9 }
0x1c9a   :  { %6198 = vrcp.f32 %v2982_v24 }
0x1c9b   :  { %6200 = vrcp.f32 %v3083_v59 }
0x1ca4   :  { %v6199_v10 = vpop.eup %6198 }
0x1ca5   :  { %v6201_v13 = vpop.eup %6200  ;;  %v2986_v16 = vmul.f32 %v6199_v10, %v6925_v41 }
0x1ca6   :  { %v3087_v17 = vmul.f32 %v6201_v13, %v6929_v42 }
0x1d08   :  { %v2989_v11 = vpop.permute.xlu0 %2988 }
0x1d09   :  { %v3090_v60 = vpop.permute.xlu1 %3089  ;;  %v2991_v14 = vmul.f32 %v6199_v10, %v2989_v11 }
0x1d0a   :  { %v3092_v15 = vmul.f32 %v6201_v13, %v3090_v60 }
0x1d0b   :  { %2993 = vrot.lane.b32.xlu0 %v2991_v14, %s6326_s1 }
0x1d0c   :  { %3094 = vrot.lane.b32.xlu1 %v3092_v15, %s6326_s1 }
0x1d7d   :  { %v2994_v23 = vpop.permute.xlu0 %2993 }
0x1d7e   :  { %v3095_v56 = vpop.permute.xlu1 %3094  ;;  %v6967_v25 = vadd.f32 %v2994_v23, %v2986_v16 }
0x1d7f   :  { %v6969_v20 = vadd.f32 %v3095_v56, %v3087_v17 }
0x1d80   :  { %6202 = vtanh.f32 %v6967_v25 }
0x1d81   :  { %6204 = vtanh.f32 %v6969_v20 }
0x1d8a   :  { %v6203_v31 = vpop.eup %6202 }
0x1d8b   :  { %v6205_v32 = vpop.eup %6204  ;;  %2999 = vrot.lane.b32.xlu0 %v6203_v31, %s6325_s18 }
0x1d8c   :  { %3100 = vrot.lane.b32.xlu1 %v6205_v32, %s6325_s18  ;;  %v258_v32 = vadd.f32 %v6831_v35, %v6468_v27 }
0x1dfd   :  { %v3000_v33 = vpop.permute.xlu0 %2999 }
0x1dfe   :  { %v3101_v34 = vpop.permute.xlu1 %3100  ;;  %v3002_v21 = vmul.f32 %v6199_v10, %v3000_v33 }
0x1dff   :  { %v3103_v36 = vmul.f32 %v6201_v13, %v3101_v34 }
0x1e00   :  { %3004 = vrot.lane.b32.xlu0 %v3002_v21, %s6326_s1 }
0x1e01   :  { %3177 = vrot.lane.b32.xlu1 %v3103_v36, %s6326_s1 }
0x1e72   :  { %v3005_v39 = vpop.permute.xlu0 %3004 }
0x1e73   :  { %v3178_v41 = vpop.permute.xlu1 %3177  ;;  %3007 = vst.msk [vmem:[#allocation3 + $0x8] sm:$0xff] %vm293_vm3, %v3005_v39  ;;  %5527 = vmatmul.mubr.msk.f32.vlgmr.msra.gmra.mrb[42].mxu1 %vm293_vm3, %v3005_v39 }
0x1e74   :  { %5538 = vmatmul.mubr.msk.f32.vlgmr.msra.gmra.mrb[36].mxu0 %vm293_vm3, %v3178_v41  ;;  %5924 = vmatpush3.bf16.msra.mxu1 %v6403_v7 }
0x1e75   :  { %5925 = vmatprep.subr.bf16.mxu1 %v6322_v8  ;;  %5548 = vmatprep.mubr.msk.f32.mxu1 %vm6323_vm2, %v6324_v19 }
0x1e76   :  { %5930 = vmatpush3.bf16.msra.mxu0 %v6494_v48  ;;  %5559 = vmatprep.mubr.msk.f32.mxu0 %vm6323_vm2, %v6324_v19 }
0x1e77   :  { %5931 = vmatprep.subr.bf16.mxu0 %v6322_v8 }
0x1e78   :  { %5927 = vmatpush3.bf16.msra.mxu1 %v6419_v12 }
0x1e79   :  { %5934 = vmatprep.subr.bf16.mxu1 %v6322_v8 }
0x1e7a   :  { %5933 = vmatpush3.bf16.msra.mxu0 %v6500_v50 }
0x1e7b   :  { %5549 = vmatmul.mubr.msk.f32.vlgmr.msra.gmra.mrb[44].mxu1 %vm293_vm3, %v3178_v41  ;;  %5940 = vmatprep.subr.bf16.mxu0 %v6322_v8 }
0x1e7c   :  { %5936 = vmatpush3.bf16.msra.mxu1 %v6512_v53  ;;  %5570 = vmatprep.mubr.msk.f32.mxu1 %vm6323_vm2, %v6324_v19 }
0x1e7d   :  { %5937 = vmatprep.subr.bf16.mxu1 %v6322_v8 }
0x1e80   :  { %5939 = vmatpush3.bf16.msra.mxu1 %v6526_v57 }
0x1e81   :  { %5946 = vmatprep.subr.bf16.mxu1 %v6322_v8 }
0x1f46   :  { %v3172_v38 = vpop.f32.mrb[42].mxu1 }
0x1f47   :  { %v3247_v43 = vpop.f32.mrb[36].mxu0  ;;  %v5528_v42 = vpop.f32.mrb[43].mxu1 }
0x1f48   :  { %v3248_v44 = vadd.f32 %v3247_v43, %v3172_v38  ;;  %v5539_v63 = vpop.f32.mrb[37].mxu0 }
0x1f4a   :  { %v3251_v47 = vadd.f32 %v6877_v18, %v3248_v44 }
0x1f4c   :  { %6206 = vtanh.f32 %v3251_v47  ;;  %v4850_v52 = vmul.f32 -1.442695, %v3251_v47 }
0x1f4e   :  { %v3348_v49 = vpop.f32.mrb[44].mxu1 }
0x1f4f   :  { %v3352_v51 = vadd.f32 %v3348_v49, %v253_v45  ;;  %v5550_v46 = vpop.f32.mrb[45].mxu1 }
0x1f51   :  { %6208 = vtanh.f32 %v3352_v51  ;;  %v4852_v40 = vmul.f32 -1.442695, %v3352_v51 }
0x1f52   :  { %6210 = vpow2.f32 %v4850_v52 }
0x1f53   :  { %6212 = vpow2.f32 %v4852_v40 }
0x1f56   :  { %v6207_v61 = vpop.eup %6206 }
0x1f57   :  { %3261 = vrot.lane.b32.xlu0 %v6207_v61, %s6325_s18 }
0x1f5b   :  { %v6209_v37 = vpop.eup %6208 }
0x1f5c   :  { %3362 = vrot.lane.b32.xlu1 %v6209_v37, %s6325_s18  ;;  %v6211_v54 = vpop.eup %6210 }
0x1f5d   :  { %v3255_v55 = vadd.f32 1.0, %v6211_v54  ;;  %v6213_v58 = vpop.eup %6212 }
0x1f5e   :  { %v3356_v28 = vadd.f32 1.0, %v6213_v58 }
0x1f5f   :  { %6214 = vrcp.f32 %v3255_v55 }
0x1f60   :  { %6216 = vrcp.f32 %v3356_v28 }
0x1f69   :  { %v6215_v22 = vpop.eup %6214 }
0x1f6a   :  { %v6217_v1 = vpop.eup %6216  ;;  %v3259_v4 = vmul.f32 %v6215_v22, %v6967_v25 }
0x1f6b   :  { %v3360_v9 = vmul.f32 %v6217_v1, %v6969_v20 }
0x1fc9   :  { %v3262_v62 = vpop.permute.xlu0 %3261 }
0x1fca   :  { %v3264_v0 = vmul.f32 %v6215_v22, %v3262_v62 }
0x1fcc   :  { %3266 = vrot.lane.b32.xlu0 %v3264_v0, %s6326_s1 }
0x1fce   :  { %v3363_v2 = vpop.permute.xlu1 %3362 }
0x1fcf   :  { %v3365_v3 = vmul.f32 %v6217_v1, %v3363_v2 }
0x1fd1   :  { %3367 = vrot.lane.b32.xlu1 %v3365_v3, %s6326_s1 }
0x203e   :  { %v3267_v5 = vpop.permute.xlu0 %3266 }
0x203f   :  { %v7007_v6 = vadd.f32 %v3267_v5, %v3259_v4 }
0x2041   :  { %6218 = vtanh.f32 %v7007_v6 }
0x2043   :  { %v3368_v24 = vpop.permute.xlu1 %3367 }
0x2044   :  { %v7011_v59 = vadd.f32 %v3368_v24, %v3360_v9 }
0x2046   :  { %6220 = vtanh.f32 %v7011_v59 }
0x204b   :  { %v6219_v10 = vpop.eup %6218 }
0x204c   :  { %3272 = vrot.lane.b32.xlu0 %v6219_v10, %s6325_s18 }
0x2050   :  { %v6221_v11 = vpop.eup %6220 }
0x2051   :  { %3373 = vrot.lane.b32.xlu1 %v6221_v11, %s6325_s18  ;;  %v263_v11 = vadd.f32 %v6831_v35, %v6466_v26 }
0x20be   :  { %v3273_v13 = vpop.permute.xlu0 %3272 }
0x20bf   :  { %v3275_v60 = vmul.f32 %v6215_v22, %v3273_v13 }
0x20c1   :  { %3277 = vrot.lane.b32.xlu0 %v3275_v60, %s6326_s1 }
0x20c3   :  { %v3374_v14 = vpop.permute.xlu1 %3373 }
0x20c4   :  { %v3376_v15 = vmul.f32 %v6217_v1, %v3374_v14 }
0x20c6   :  { %3450 = vrot.lane.b32.xlu1 %v3376_v15, %s6326_s1 }
0x2133   :  { %v3278_v16 = vpop.permute.xlu0 %3277 }
0x2134   :  { %3280 = vst.msk [vmem:[#allocation3 + $0x10] sm:$0xff] %vm293_vm3, %v3278_v16  ;;  %5560 = vmatmul.mubr.msk.f32.vlgmr.msra.gmra.mrb[38].mxu0 %vm293_vm3, %v3278_v16 }
0x2135   :  { %5942 = vmatpush3.bf16.msra.mxu0 %v6403_v7  ;;  %5581 = vmatprep.mubr.msk.f32.mxu0 %vm6323_vm2, %v6324_v19 }
0x2136   :  { %5943 = vmatprep.subr.bf16.mxu0 %v6322_v8 }
0x2138   :  { %v3451_v17 = vpop.permute.xlu1 %3450 }
0x2139   :  { %5945 = vmatpush3.bf16.msra.mxu0 %v6419_v12  ;;  %5571 = vmatmul.mubr.msk.f32.vlgmr.msra.gmra.mrb[46].mxu1 %vm293_vm3, %v3451_v17 }
0x213a   :  { %5948 = vmatpush3.bf16.msra.mxu1 %v6494_v48  ;;  %5952 = vmatprep.subr.bf16.mxu0 %v6322_v8 }
0x213b   :  { %5949 = vmatprep.subr.bf16.mxu1 %v6322_v8  ;;  %5592 = vmatprep.mubr.msk.f32.mxu1 %vm6323_vm2, %v6324_v19 }
0x213c   :  { %5582 = vmatmul.mubr.msk.f32.vlgmr.msra.gmra.mrb[40].mxu0 %vm293_vm3, %v3451_v17 }
0x213d   :  { %5954 = vmatpush3.bf16.msra.mxu0 %v6512_v53  ;;  %5603 = vmatprep.mubr.msk.f32.mxu0 %vm6323_vm2, %v6324_v19 }
0x213e   :  { %5951 = vmatpush3.bf16.msra.mxu1 %v6500_v50  ;;  %5955 = vmatprep.subr.bf16.mxu0 %v6322_v8 }
0x213f   :  { %5958 = vmatprep.subr.bf16.mxu1 %v6322_v8 }
0x2141   :  { %5957 = vmatpush3.bf16.msra.mxu0 %v6526_v57 }
0x2142   :  { %5964 = vmatprep.subr.bf16.mxu0 %v6322_v8 }
0x2207   :  { %v3445_v23 = vpop.f32.mrb[38].mxu0 }
0x2208   :  { %v5561_v56 = vpop.f32.mrb[39].mxu0 }
0x220c   :  { %v3520_v25 = vpop.f32.mrb[46].mxu1 }
0x220d   :  { %v3521_v20 = vadd.f32 %v3520_v25, %v3445_v23  ;;  %v5572_v31 = vpop.f32.mrb[47].mxu1 }
0x220f   :  { %v3524_v33 = vadd.f32 %v6877_v18, %v3521_v20  ;;  %v3621_v34 = vpop.f32.mrb[40].mxu0 }
0x2210   :  { %v3625_v21 = vadd.f32 %v3621_v34, %v258_v32  ;;  %v5583_v36 = vpop.f32.mrb[41].mxu0 }
0x2211   :  { %6222 = vtanh.f32 %v3524_v33  ;;  %v4855_v38 = vmul.f32 -1.442695, %v3524_v33 }
0x2212   :  { %6224 = vtanh.f32 %v3625_v21  ;;  %v4857_v43 = vmul.f32 -1.442695, %v3625_v21 }
0x2213   :  { %6226 = vpow2.f32 %v4855_v38 }
0x2214   :  { %6228 = vpow2.f32 %v4857_v43 }
0x221b   :  { %v6223_v39 = vpop.eup %6222 }
0x221c   :  { %v6225_v41 = vpop.eup %6224  ;;  %3534 = vrot.lane.b32.xlu0 %v6223_v39, %s6325_s18 }
0x221d   :  { %3635 = vrot.lane.b32.xlu1 %v6225_v41, %s6325_s18  ;;  %v6227_v42 = vpop.eup %6226 }
0x221e   :  { %v6229_v44 = vpop.eup %6228  ;;  %v3528_v27 = vadd.f32 1.0, %v6227_v42 }
0x221f   :  { %v3629_v63 = vadd.f32 1.0, %v6229_v44 }
0x2220   :  { %6230 = vrcp.f32 %v3528_v27 }
0x2221   :  { %6232 = vrcp.f32 %v3629_v63 }
0x222a   :  { %v6231_v47 = vpop.eup %6230 }
0x222b   :  { %v6233_v49 = vpop.eup %6232  ;;  %v3532_v37 = vmul.f32 %v6231_v47, %v7007_v6 }
0x222c   :  { %v3633_v52 = vmul.f32 %v6233_v49, %v7011_v59 }
0x228e   :  { %v3535_v45 = vpop.permute.xlu0 %3534 }
0x228f   :  { %v3636_v51 = vpop.permute.xlu1 %3635  ;;  %v3537_v46 = vmul.f32 %v6231_v47, %v3535_v45 }
0x2290   :  { %v3638_v61 = vmul.f32 %v6233_v49, %v3636_v51 }
0x2291   :  { %3539 = vrot.lane.b32.xlu0 %v3537_v46, %s6326_s1 }
0x2292   :  { %3640 = vrot.lane.b32.xlu1 %v3638_v61, %s6326_s1 }
0x2303   :  { %v3540_v40 = vpop.permute.xlu0 %3539 }
0x2304   :  { %v3641_v54 = vpop.permute.xlu1 %3640  ;;  %v7049_v55 = vadd.f32 %v3540_v40, %v3532_v37 }
0x2305   :  { %v7051_v58 = vadd.f32 %v3641_v54, %v3633_v52 }
0x2306   :  { %6234 = vtanh.f32 %v7049_v55 }
0x2307   :  { %6236 = vtanh.f32 %v7051_v58 }
0x2310   :  { %v6235_v28 = vpop.eup %6234 }
0x2311   :  { %v6237_v22 = vpop.eup %6236  ;;  %3545 = vrot.lane.b32.xlu0 %v6235_v28, %s6325_s18 }
0x2312   :  { %3646 = vrot.lane.b32.xlu1 %v6237_v22, %s6325_s18 }
0x2383   :  { %v3546_v62 = vpop.permute.xlu0 %3545 }
0x2384   :  { %v3647_v0 = vpop.permute.xlu1 %3646  ;;  %v3548_v1 = vmul.f32 %v6231_v47, %v3546_v62 }
0x2385   :  { %v3649_v2 = vmul.f32 %v6233_v49, %v3647_v0 }
0x2386   :  { %3550 = vrot.lane.b32.xlu0 %v3548_v1, %s6326_s1 }
0x2387   :  { %3723 = vrot.lane.b32.xlu1 %v3649_v2, %s6326_s1 }
0x23f8   :  { %v3551_v3 = vpop.permute.xlu0 %3550 }
0x23f9   :  { %v3724_v4 = vpop.permute.xlu1 %3723  ;;  %3553 = vst.msk [vmem:[#allocation3 + $0x18] sm:$0xff] %vm293_vm3, %v3551_v3  ;;  %5593 = vmatmul.mubr.msk.f32.vlgmr.msra.gmra.mrb[48].mxu1 %vm293_vm3, %v3551_v3 }
0x23fa   :  { %5604 = vmatmul.mubr.msk.f32.vlgmr.msra.gmra.mrb[42].mxu0 %vm293_vm3, %v3724_v4  ;;  %5960 = vmatpush3.bf16.msra.mxu1 %v6403_v7 }
0x23fb   :  { %5961 = vmatprep.subr.bf16.mxu1 %v6322_v8  ;;  %5614 = vmatprep.mubr.msk.f32.mxu1 %vm6323_vm2, %v6324_v19 }
0x23fc   :  { %5966 = vmatpush3.bf16.msra.mxu0 %v6494_v48  ;;  %5625 = vmatprep.mubr.msk.f32.mxu0 %vm6323_vm2, %v6324_v19 }
0x23fd   :  { %5967 = vmatprep.subr.bf16.mxu0 %v6322_v8 }
0x23fe   :  { %5963 = vmatpush3.bf16.msra.mxu1 %v6419_v12 }
0x23ff   :  { %5970 = vmatprep.subr.bf16.mxu1 %v6322_v8 }
0x2400   :  { %5969 = vmatpush3.bf16.msra.mxu0 %v6500_v50 }
0x2401   :  { %5615 = vmatmul.mubr.msk.f32.vlgmr.msra.gmra.mrb[50].mxu1 %vm293_vm3, %v3724_v4  ;;  %5976 = vmatprep.subr.bf16.mxu0 %v6322_v8 }
0x2402   :  { %5972 = vmatpush3.bf16.msra.mxu1 %v6512_v53  ;;  %5636 = vmatprep.mubr.msk.f32.mxu1 %vm6323_vm2, %v6324_v19 }
0x2403   :  { %5973 = vmatprep.subr.bf16.mxu1 %v6322_v8 }
0x2406   :  { %5975 = vmatpush3.bf16.msra.mxu1 %v6526_v57 }
0x2407   :  { %5982 = vmatprep.subr.bf16.mxu1 %v6322_v8 }
0x24cc   :  { %v3718_v5 = vpop.f32.mrb[48].mxu1 }
0x24cd   :  { %v3793_v6 = vpop.f32.mrb[42].mxu0  ;;  %v5594_v9 = vpop.f32.mrb[49].mxu1 }
0x24ce   :  { %v3794_v24 = vadd.f32 %v3793_v6, %v3718_v5  ;;  %v5605_v59 = vpop.f32.mrb[43].mxu0 }
0x24d0   :  { %v3797_v10 = vadd.f32 %v6877_v18, %v3794_v24 }
0x24d2   :  { %6238 = vtanh.f32 %v3797_v10  ;;  %v4860_v17 = vmul.f32 -1.442695, %v3797_v10 }
0x24d4   :  { %v3894_v13 = vpop.f32.mrb[50].mxu1 }
0x24d5   :  { %v3898_v60 = vadd.f32 %v3894_v13, %v263_v11  ;;  %v5616_v14 = vpop.f32.mrb[51].mxu1 }
0x24d7   :  { %6240 = vtanh.f32 %v3898_v60  ;;  %v4862_v23 = vmul.f32 -1.442695, %v3898_v60 }
0x24d8   :  { %6242 = vpow2.f32 %v4860_v17 }
0x24d9   :  { %6244 = vpow2.f32 %v4862_v23 }
0x24dc   :  { %v6239_v15 = vpop.eup %6238 }
0x24dd   :  { %3807 = vrot.lane.b32.xlu0 %v6239_v15, %s6325_s18 }
0x24e1   :  { %v6241_v16 = vpop.eup %6240 }
0x24e2   :  { %3908 = vrot.lane.b32.xlu1 %v6241_v16, %s6325_s18  ;;  %v6243_v56 = vpop.eup %6242 }
0x24e3   :  { %v3801_v25 = vadd.f32 1.0, %v6243_v56  ;;  %v6245_v20 = vpop.eup %6244 }
0x24e4   :  { %v3902_v31 = vadd.f32 1.0, %v6245_v20 }
0x24e5   :  { %6246 = vrcp.f32 %v3801_v25 }
0x24e6   :  { %6248 = vrcp.f32 %v3902_v31 }
0x24ef   :  { %v6247_v26 = vpop.eup %6246 }
0x24f0   :  { %v6249_v34 = vpop.eup %6248  ;;  %v3805_v39 = vmul.f32 %v6247_v26, %v7049_v55 }
0x24f1   :  { %v3906_v43 = vmul.f32 %v6249_v34, %v7051_v58  ;;  %v268_v58 = vadd.f32 %v6831_v35, %v6477_v30 }
0x254f   :  { %v3808_v32 = vpop.permute.xlu0 %3807 }
0x2550   :  { %v3810_v33 = vmul.f32 %v6247_v26, %v3808_v32 }
0x2552   :  { %3812 = vrot.lane.b32.xlu0 %v3810_v33, %s6326_s1 }
0x2554   :  { %v3909_v21 = vpop.permute.xlu1 %3908 }
0x2555   :  { %v3911_v36 = vmul.f32 %v6249_v34, %v3909_v21 }
0x2557   :  { %3913 = vrot.lane.b32.xlu1 %v3911_v36, %s6326_s1 }
0x25c4   :  { %v3813_v41 = vpop.permute.xlu0 %3812 }
0x25c5   :  { %v7089_v38 = vadd.f32 %v3813_v41, %v3805_v39  ;;  %v6296_v39 = vld [vmem:[%s7226_s3] ss:$0 sm:$0xff] }
0x25c7   :  { %6250 = vtanh.f32 %v7089_v38 }
0x25c9   :  { %v3914_v42 = vpop.permute.xlu1 %3913 }
0x25ca   :  { %v7093_v44 = vadd.f32 %v3914_v42, %v3906_v43 }
0x25cc   :  { %6252 = vtanh.f32 %v7093_v44 }
0x25d1   :  { %v6251_v27 = vpop.eup %6250 }
0x25d2   :  { %3818 = vrot.lane.b32.xlu0 %v6251_v27, %s6325_s18 }
0x25d6   :  { %v6253_v63 = vpop.eup %6252 }
0x25d7   :  { %3919 = vrot.lane.b32.xlu1 %v6253_v63, %s6325_s18 }
0x2644   :  { %v3819_v47 = vpop.permute.xlu0 %3818 }
0x2645   :  { %v3821_v45 = vmul.f32 %v6247_v26, %v3819_v47 }
0x2647   :  { %3823 = vrot.lane.b32.xlu0 %v3821_v45, %s6326_s1 }
0x2649   :  { %v3920_v49 = vpop.permute.xlu1 %3919 }
0x264a   :  { %v3922_v51 = vmul.f32 %v6249_v34, %v3920_v49 }
0x264c   :  { %3996 = vrot.lane.b32.xlu1 %v3922_v51, %s6326_s1 }
0x26b9   :  { %v3824_v46 = vpop.permute.xlu0 %3823 }
0x26ba   :  { %3826 = vst.msk [vmem:[#allocation3 + $0x20] sm:$0xff] %vm293_vm3, %v3824_v46  ;;  %5626 = vmatmul.mubr.msk.f32.vlgmr.msra.gmra.mrb[44].mxu0 %vm293_vm3, %v3824_v46 }
0x26bb   :  { %5978 = vmatpush3.bf16.msra.mxu0 %v6403_v7  ;;  %5647 = vmatprep.mubr.msk.f32.mxu0 %vm6323_vm2, %v6324_v19 }
0x26bc   :  { %5979 = vmatprep.subr.bf16.mxu0 %v6322_v8 }
0x26be   :  { %v3997_v61 = vpop.permute.xlu1 %3996 }
0x26bf   :  { %5981 = vmatpush3.bf16.msra.mxu0 %v6419_v12  ;;  %5637 = vmatmul.mubr.msk.f32.vlgmr.msra.gmra.mrb[52].mxu1 %vm293_vm3, %v3997_v61 }
0x26c0   :  { %5984 = vmatpush3.bf16.msra.mxu1 %v6494_v48  ;;  %5988 = vmatprep.subr.bf16.mxu0 %v6322_v8 }
0x26c1   :  { %5985 = vmatprep.subr.bf16.mxu1 %v6322_v8  ;;  %5658 = vmatprep.mubr.msk.f32.mxu1 %vm6323_vm2, %v6324_v19 }
0x26c2   :  { %5648 = vmatmul.mubr.msk.f32.vlgmr.msra.gmra.mrb[46].mxu0 %vm293_vm3, %v3997_v61 }
0x26c3   :  { %5990 = vmatpush3.bf16.msra.mxu0 %v6512_v53  ;;  %5669 = vmatprep.mubr.msk.f32.mxu0 %vm6323_vm2, %v6324_v19 }
0x26c4   :  { %5987 = vmatpush3.bf16.msra.mxu1 %v6500_v50  ;;  %5991 = vmatprep.subr.bf16.mxu0 %v6322_v8 }
0x26c5   :  { %5994 = vmatprep.subr.bf16.mxu1 %v6322_v8 }
0x26c7   :  { %5993 = vmatpush3.bf16.msra.mxu0 %v6526_v57 }
0x26c8   :  { %6000 = vmatprep.subr.bf16.mxu0 %v6322_v8 }
0x278d   :  { %v3991_v37 = vpop.f32.mrb[44].mxu0 }
0x278e   :  { %v5627_v52 = vpop.f32.mrb[45].mxu0 }
0x2792   :  { %v4066_v40 = vpop.f32.mrb[52].mxu1 }
0x2793   :  { %v4067_v54 = vadd.f32 %v4066_v40, %v3991_v37  ;;  %v5638_v55 = vpop.f32.mrb[53].mxu1 }
0x2795   :  { %v4070_v28 = vadd.f32 %v6877_v18, %v4067_v54  ;;  %v4167_v22 = vpop.f32.mrb[46].mxu0 }
0x2796   :  { %v4171_v62 = vadd.f32 %v4167_v22, %v268_v58  ;;  %v5649_v0 = vpop.f32.mrb[47].mxu0 }
0x2797   :  { %6254 = vtanh.f32 %v4070_v28  ;;  %v4865_v3 = vmul.f32 -1.442695, %v4070_v28 }
0x2798   :  { %6256 = vtanh.f32 %v4171_v62  ;;  %v4867_v4 = vmul.f32 -1.442695, %v4171_v62 }
0x2799   :  { %6258 = vpow2.f32 %v4865_v3 }
0x279a   :  { %6260 = vpow2.f32 %v4867_v4  ;;  %v4647_v4 = vld [vmem:[#allocation3 + $0x8] sm:$0xff] }
0x27a1   :  { %v6255_v1 = vpop.eup %6254 }
0x27a2   :  { %v6257_v2 = vpop.eup %6256  ;;  %4080 = vrot.lane.b32.xlu0 %v6255_v1, %s6325_s18 }
0x27a3   :  { %4181 = vrot.lane.b32.xlu1 %v6257_v2, %s6325_s18  ;;  %v6259_v5 = vpop.eup %6258 }
0x27a4   :  { %v6261_v6 = vpop.eup %6260  ;;  %v4074_v30 = vadd.f32 1.0, %v6259_v5  ;;  %v4646_v5 = vld [vmem:[#allocation3] sm:$0xff] }
0x27a5   :  { %v4175_v35 = vadd.f32 1.0, %v6261_v6 }
0x27a6   :  { %6262 = vrcp.f32 %v4074_v30 }
0x27a7   :  { %6264 = vrcp.f32 %v4175_v35  ;;  %v6013_v35 = vpack.c.bf16 %v4647_v4, %v4646_v5 }
0x27b0   :  { %v6263_v9 = vpop.eup %6262 }
0x27b1   :  { %v6265_v59 = vpop.eup %6264  ;;  %v4078_v60 = vmul.f32 %v6263_v9, %v7089_v38 }
0x27b2   :  { %v4179_v14 = vmul.f32 %v6265_v59, %v7093_v44 }
0x2814   :  { %v4081_v24 = vpop.permute.xlu0 %4080 }
0x2815   :  { %v4182_v10 = vpop.permute.xlu1 %4181  ;;  %v4083_v11 = vmul.f32 %v6263_v9, %v4081_v24  ;;  %v4649_v24 = vld [vmem:[#allocation3 + $0x18] sm:$0xff] }
0x2816   :  { %v4184_v13 = vmul.f32 %v6265_v59, %v4182_v10 }
0x2817   :  { %4085 = vrot.lane.b32.xlu0 %v4083_v11, %s6326_s1 }
0x2818   :  { %4186 = vrot.lane.b32.xlu1 %v4184_v13, %s6326_s1  ;;  %v4650_v13 = vld [vmem:[#allocation3 + $0x20] sm:$0xff] }
0x2889   :  { %v4086_v15 = vpop.permute.xlu0 %4085 }
0x288a   :  { %v4187_v16 = vpop.permute.xlu1 %4186  ;;  %v7131_v17 = vadd.f32 %v4086_v15, %v4078_v60 }
0x288b   :  { %v7133_v23 = vadd.f32 %v4187_v16, %v4179_v14 }
0x288c   :  { %6266 = vtanh.f32 %v7131_v17 }
0x288d   :  { %6268 = vtanh.f32 %v7133_v23 }
0x2896   :  { %v6267_v56 = vpop.eup %6266 }
0x2897   :  { %v6269_v25 = vpop.eup %6268  ;;  %4091 = vrot.lane.b32.xlu0 %v6267_v56, %s6325_s18 }
0x2898   :  { %4192 = vrot.lane.b32.xlu1 %v6269_v25, %s6325_s18 }
0x2909   :  { %v4092_v20 = vpop.permute.xlu0 %4091 }
0x290a   :  { %v4193_v31 = vpop.permute.xlu1 %4192  ;;  %v4094_v26 = vmul.f32 %v6263_v9, %v4092_v20 }
0x290b   :  { %v4195_v32 = vmul.f32 %v6265_v59, %v4193_v31  ;;  %v4648_v59 = vld [vmem:[#allocation3 + $0x10] sm:$0xff] }
0x290c   :  { %4096 = vrot.lane.b32.xlu0 %v4094_v26, %s6326_s1  ;;  %v6017_v10 = vpack.c.bf16 %v4649_v24, %v4648_v59 }
0x290d   :  { %4269 = vrot.lane.b32.xlu1 %v4195_v32, %s6326_s1 }
0x297e   :  { %v4097_v33 = vpop.permute.xlu0 %4096 }
0x297f   :  { %v4270_v34 = vpop.permute.xlu1 %4269  ;;  %4099 = vst.msk [vmem:[#allocation3 + $0x28] sm:$0xff] %vm293_vm3, %v4097_v33  ;;  %5659 = vmatmul.mubr.msk.f32.vlgmr.msra.gmra.mrb[54].mxu1 %vm293_vm3, %v4097_v33 }
0x2980   :  { %5670 = vmatmul.mubr.msk.f32.vlgmr.msra.gmra.mrb[48].mxu0 %vm293_vm3, %v4270_v34  ;;  %5996 = vmatpush3.bf16.msra.mxu1 %v6403_v7 }
0x2981   :  { %5997 = vmatprep.subr.bf16.mxu1 %v6322_v8  ;;  %5680 = vmatprep.mubr.msk.f32.mxu1 %vm6323_vm2, %v6324_v19 }
0x2982   :  { %6002 = vmatpush3.bf16.msra.mxu0 %v6494_v48  ;;  %5691 = vmatprep.mubr.msk.f32.mxu0 %vm6323_vm2, %v6324_v19 }
0x2983   :  { %6003 = vmatprep.subr.bf16.mxu0 %v6322_v8 }
0x2984   :  { %5999 = vmatpush3.bf16.msra.mxu1 %v6419_v12 }
0x2985   :  { %6006 = vmatprep.subr.bf16.mxu1 %v6322_v8 }
0x2986   :  { %6005 = vmatpush3.bf16.msra.mxu0 %v6500_v50  ;;  %v4651_v11 = vld [vmem:[#allocation3 + $0x28] sm:$0xff] }
0x2987   :  { %5681 = vmatmul.mubr.msk.f32.vlgmr.msra.gmra.mrb[56].mxu1 %vm293_vm3, %v4270_v34  ;;  %6012 = vmatprep.subr.bf16.mxu0 %v6322_v8  ;;  %v6021_v60 = vpack.c.bf16 %v4651_v11, %v4650_v13 }
0x2988   :  { %6008 = vmatpush3.bf16.msra.mxu1 %v6512_v53  ;;  %5702 = vmatprep.mubr.msk.f32.mxu1 %vm6323_vm2, %v6324_v19  ;;  %v273_v53 = vadd.f32 %v6296_v39, %v6475_v29  ;;  %v6327_v39 = vmov 0  }
0x2989   :  { %6009 = vmatprep.subr.bf16.mxu1 %v6322_v8  ;;  %6037 = vset.pattern.permute.xlu0 %v6327_v39 }
0x298c   :  { %6011 = vmatpush3.bf16.msra.mxu1 %v6526_v57 }
0x2a52   :  { %v4264_v7 = vpop.f32.mrb[54].mxu1 }
0x2a53   :  { %v4339_v48 = vpop.f32.mrb[48].mxu0  ;;  %v5660_v12 = vpop.f32.mrb[55].mxu1 }
0x2a54   :  { %v4340_v21 = vadd.f32 %v4339_v48, %v4264_v7  ;;  %v5671_v36 = vpop.f32.mrb[49].mxu0 }
0x2a56   :  { %v4343_v50 = vadd.f32 %v6877_v18, %v4340_v21 }
0x2a58   :  { %6270 = vtanh.f32 %v4343_v50  ;;  %v4870_v44 = vmul.f32 -1.442695, %v4343_v50  ;;  %v4752_v50 = vld [vmem:[#allocation4] sm:$0x1] }
0x2a5a   :  { %v4440_v41 = vpop.f32.mrb[56].mxu1 }
0x2a5b   :  { %v4444_v38 = vadd.f32 %v4440_v41, %v273_v53  ;;  %v5682_v43 = vpop.f32.mrb[57].mxu1 }
0x2a5d   :  { %6272 = vtanh.f32 %v4444_v38  ;;  %v4872_v18 = vmul.f32 -1.442695, %v4444_v38 }
0x2a5e   :  { %6274 = vpow2.f32 %v4870_v44 }
0x2a5f   :  { %6276 = vpow2.f32 %v4872_v18 }
0x2a62   :  { %v6271_v42 = vpop.eup %6270 }
0x2a63   :  { %4353 = vrot.lane.b32.xlu0 %v6271_v42, %s6325_s18  ;;  %v4654_v42 = vld [vmem:[%s7230_s7] sm:$0xff] }
0x2a67   :  { %v6273_v57 = vpop.eup %6272 }
0x2a68   :  { %4454 = vrot.lane.b32.xlu1 %v6273_v57, %s6325_s18  ;;  %v6275_v27 = vpop.eup %6274  ;;  %v4758_v57 = vlaneseq }
0x2a69   :  { %v4347_v63 = vadd.f32 1.0, %v6275_v27  ;;  %v6277_v47 = vpop.eup %6276 }
0x2a6a   :  { %v4448_v45 = vadd.f32 1.0, %v6277_v47  ;;  %v4759_v44 = vshrl.u32 %v4758_v57, 7 }
0x2a6b   :  { %6278 = vrcp.f32 %v4347_v63 }
0x2a6c   :  { %6280 = vrcp.f32 %v4448_v45  ;;  %v4760_v18 = vsub.s32 0, %v4759_v44 }
0x2a75   :  { %v6279_v29 = vpop.eup %6278 }
0x2a76   :  { %v6281_v46 = vpop.eup %6280  ;;  %v4351_v52 = vmul.f32 %v6279_v29, %v7131_v17 }
0x2a77   :  { %v4452_v55 = vmul.f32 %v6281_v46, %v7133_v23  ;;  %v6297_v23 = vld [vmem:[%s7229_s6] ss:$0 sm:$0xff] }
0x2ad5   :  { %v4354_v49 = vpop.permute.xlu0 %4353 }
0x2ad6   :  { %v4356_v51 = vmul.f32 %v6279_v29, %v4354_v49 }
0x2ad8   :  { %4358 = vrot.lane.b32.xlu0 %v4356_v51, %s6326_s1 }
0x2ada   :  { %v4455_v61 = vpop.permute.xlu1 %4454 }
0x2adb   :  { %v4457_v37 = vmul.f32 %v6281_v46, %v4455_v61 }
0x2add   :  { %4459 = vrot.lane.b32.xlu1 %v4457_v37, %s6326_s1 }
0x2b4a   :  { %v4359_v40 = vpop.permute.xlu0 %4358 }
0x2b4b   :  { %v4361_v54 = vadd.f32 %v4359_v40, %v4351_v52 }
0x2b4d   :  { %6282 = vtanh.f32 %v4361_v54 }
0x2b4f   :  { %v4460_v58 = vpop.permute.xlu1 %4459 }
0x2b50   :  { %v4462_v28 = vadd.f32 %v4460_v58, %v4452_v55 }
0x2b52   :  { %6284 = vtanh.f32 %v4462_v28 }
0x2b57   :  { %v6283_v22 = vpop.eup %6282 }
0x2b58   :  { %4364 = vrot.lane.b32.xlu0 %v6283_v22, %s6325_s18 }
0x2b5c   :  { %v6285_v62 = vpop.eup %6284 }
0x2b5d   :  { %4465 = vrot.lane.b32.xlu1 %v6285_v62, %s6325_s18 }
0x2bca   :  { %v4365_v0 = vpop.permute.xlu0 %4364 }
0x2bcb   :  { %v4367_v1 = vmul.f32 %v6279_v29, %v4365_v0 }
0x2bcd   :  { %4369 = vrot.lane.b32.xlu0 %v4367_v1, %s6326_s1 }
0x2bcf   :  { %v4466_v2 = vpop.permute.xlu1 %4465 }
0x2bd0   :  { %v4468_v3 = vmul.f32 %v6281_v46, %v4466_v2 }
0x2bd2   :  { %4542 = vrot.lane.b32.xlu1 %v4468_v3, %s6326_s1 }
0x2c3f   :  { %v4370_v30 = vpop.permute.xlu0 %4369 }
0x2c40   :  { %4372 = vst.msk [vmem:[#allocation3 + $0x30] sm:$0xff] %vm293_vm3, %v4370_v30  ;;  %5692 = vmatmul.mubr.msk.f32.vlgmr.msra.gmra.mrb[50].mxu0 %vm293_vm3, %v4370_v30 }
0x2c41   :  { %6015 = vmatpush3.bf16.xpose.msk.msra.mxu0 %vm7179_vm4, %v6013_v35  ;;  %5721 = vmatprep.mubr.msk.f32.mxu0 %vm6323_vm2, %v6324_v19 }
0x2c42   :  { %6016 = vmatprep.subr.bf16.mxu0 %v6322_v8 }
0x2c44   :  { %v4543_v9 = vpop.permute.xlu1 %4542 }
0x2c45   :  { %5703 = vmatmul.mubr.msk.f32.vlgmr.msra.gmra.mrb[58].mxu1 %vm293_vm3, %v4543_v9 }
0x2c47   :  { %v4652_v41 = vld [vmem:[#allocation3 + $0x30] sm:$0xff] }
0x2c49   :  { %6019 = vmatpush3.bf16.xpose.msk.msra.mxu0 %vm7179_vm4, %v6017_v10 }
0x2c4a   :  { %6020 = vmatprep.subr.bf16.mxu0 %v6322_v8 }
0x2c51   :  { %6023 = vmatpush3.bf16.xpose.msk.msra.mxu0 %vm7179_vm4, %v6021_v60 }
0x2c52   :  { %6024 = vmatprep.subr.bf16.mxu0 %v6322_v8 }
0x2d13   :  { %v4537_v19 = vpop.f32.mrb[50].mxu0 }
0x2d14   :  { %v5693_v14 = vpop.f32.mrb[51].mxu0 }
0x2d18   :  { %v4612_v15 = vpop.f32.mrb[58].mxu1 }
0x2d19   :  { %v4613_v16 = vadd.f32 %v4612_v15, %v4537_v19  ;;  %v5704_v17 = vpop.f32.mrb[59].mxu1 }
0x2d1b   :  { %v4616_v56 = vadd.f32 %v6297_v23, %v4613_v16 }
0x2d1d   :  { %6286 = vtanh.f32 %v4616_v56  ;;  %v4875_v20 = vmul.f32 -1.442695, %v4616_v56 }
0x2d1f   :  { %6288 = vpow2.f32 %v4875_v20 }
0x2d27   :  { %v6287_v25 = vpop.eup %6286 }
0x2d28   :  { %4626 = vrot.lane.b32.xlu0 %v6287_v25, %s6325_s18 }
0x2d29   :  { %v6289_v31 = vpop.eup %6288 }
0x2d2a   :  { %v4620_v26 = vadd.f32 1.0, %v6289_v31 }
0x2d2c   :  { %6290 = vrcp.f32 %v4620_v26 }
0x2d36   :  { %v6291_v8 = vpop.eup %6290 }
0x2d37   :  { %v4624_v34 = vmul.f32 %v6291_v8, %v4361_v54 }
0x2d9a   :  { %v4627_v32 = vpop.permute.xlu0 %4626 }
0x2d9b   :  { %v4629_v33 = vmul.f32 %v6291_v8, %v4627_v32 }
0x2d9d   :  { %4631 = vrot.lane.b32.xlu1 %v4629_v33, %s6326_s1 }
0x2e0f   :  { %v4632_v7 = vpop.permute.xlu1 %4631 }
0x2e10   :  { %v4634_v48 = vadd.f32 %v4632_v7, %v4624_v34 }
0x2e12   :  { %6292 = vtanh.f32 %v4634_v48 }
0x2e1c   :  { %v6293_v12 = vpop.eup %6292 }
0x2e1d   :  { %4637 = vrot.lane.b32.xlu0 %v6293_v12, %s6325_s18  ;;  %s6328_s18 = smov [#allocation5]  }
0x2e21   :  { %4755 = vperm.xlu0 %6037, %v4752_v50  }
0x2e8f   :  { %v4638_v21 = vpop.permute.xlu0 %4637 }
0x2e90   :  { %v4640_v36 = vmul.f32 %v6291_v8, %v4638_v21 }
0x2e92   :  { %4642 = vrot.lane.b32.xlu1 %v4640_v36, %s6326_s1  ;;  %s4771_s1 = sshll.u32 %s6328_s18, 4  ;;  %s4772_s1 = int_to_ptr.vmem [resolvable:$true] %s4771_s1 }
0x2e93   :  { %s6298_s10 = scalar_lea.vmem %s4772_s1, 16  ;;  %s6302_s2 = scalar_lea.vmem %s4772_s1, 32 }
0x2e94   :  { %p6299_p0 = scmp.ne.s32.totalorder %s4772_s1, %s6298_s10  ;;  %p6303_p1 = scmp.lt.s32.totalorder %s4772_s1, %s4772_s1 }
0x2e95   :  { %p6304_p2 = scmp.lt.s32.totalorder %s6302_s2, %s6298_s10 }
0x2e97   :  { %p6305_p3 = por %p6304_p2, %p6303_p1 }
0x2e99   :  { %p6306_p4 = pnand %p6305_p3, %p6299_p0 }
0x2ea0   :  { %v4756_v27 = vpop.permute.xlu0 %4755 }
0x2ea1   :  { %v4761_v63 = vrot.slane %v4756_v27, %v4760_v18 }
0x2f04   :  { %v4643_v53 = vpop.permute.xlu1 %4642 }
0x2f05   :  { %4645 = vst.msk [vmem:[#allocation3 + $0x38] sm:$0xff] %vm293_vm3, %v4643_v53 }
0x2f0c   :  { %v4653_v38 = vld [vmem:[#allocation3 + $0x38] sm:$0xff] }
0x2f0d   :  { %v6025_v43 = vpack.c.bf16 %v4653_v38, %v4652_v41 }
0x2f0f   :  { %6027 = vmatpush3.bf16.xpose.msk.msra.mxu0 %vm7179_vm4, %v6025_v43 }
0x2f16   :  { %5722 = vmatmul.mubr.msk.f32.vlgmr.msra.gmra.mrb[52].mxu0 %vm293_vm3, %v4654_v42 }
0x2fe9   :  { %v4748_v47 = vpop.f32.mrb[52].mxu0 }
0x2fea   :  { %v4762_v45 = vadd.f32 %v4761_v63, %v4748_v47  ;;  %v5723_v29 = vpop.f32.mrb[53].mxu0 }
0x2fec   :  { %4764 = vst.msk [vmem:[#allocation5] sm:$0x1] %vm4763_vm5, %v4762_v45 }
0x2fed   :  { %6309 = shalt.err (!%p6306_p4)
}
0x2fee   :  { %s6310_s4 = scalar_lea.hbm %s7232_s9, 16 }
0x2fef   :  { %p6311_p5 = scmp.ne.s32.totalorder %s7232_s9, %s6310_s4  ;;  %p6314_p6 = scmp.lt.u32.totalorder %s6310_s4, %s7232_s9 }
0x2ff1   :  { %p6316_p7 = pnand %p6314_p6, %p6311_p5 }
0x2ff3   :  { %6319 = shalt.err (!%p6316_p7)
}
0x2ff4   :  { %4774 = dma.vmem_to_hbm [thread:$0]  %s4772_s1, 16, %s7232_s9, [#allocation6]  }
0x2ff5   :  { %6320 = dma.done.wait [#allocation6], 16  }
0x2ff6   :  { %6321 = vsyncadd [#allocation6], 4294967280 }
0x2ff7   :  { %4778 = vsyncpa [#allocation6], 1 }

</bundles_post_ra>
